<compile_context>
chip_gen: v7x
topology: tpu7x:2x2x1
jax: 0.10.0
libtpu: 0.0.40
codegen_flags: <defaults>
</compile_context>

<pallas_src>
import functools
import math

import jax
import jax.numpy as jnp
from jax.experimental import pallas as pl
from jax.experimental.pallas import tpu as pltpu


# ----------------------------------------------------------------------------
# Tiling constants.
# 256-wide tiles feed the v6e/v7x 256-wide MXU; v5e's 128-wide MXU just loops
# twice (harmless).  The explicit scoped-VMEM budget is safe on all of
# v5e/v6e (128 MiB physical) and v7x (64 MiB physical): the tiles below are a
# few MiB even double-buffered.
# ----------------------------------------------------------------------------
_TM = 256          # matmul row tile
_TN = 256          # matmul output-feature tile
_TK = 512          # matmul reduction tile
_TROWS = 1024      # LayerNorm row tile
_VMEM_LIMIT = 32 * 1024 * 1024


def _fit_tile(dim, target, align):
    """Full dim if it fits, else the largest `align`-multiple <= target."""
    if dim <= target:
        return dim
    return max(align, (target // align) * align)


def _fit_reduce_tile(dim, target, align):
    """Reduction-axis tile: must divide `dim` exactly (padded edge blocks on a
    reduction axis would contribute garbage to valid outputs)."""
    if dim <= target:
        return dim
    t = (target // align) * align
    while t >= align:
        if dim % t == 0:
            return t
        t -= align
    return dim


# ----------------------------------------------------------------------------
# Pallas kernels
# ----------------------------------------------------------------------------
def _linear_kernel(activation, x_ref, w_ref, b_ref, o_ref, acc_ref):
    @pl.when(pl.program_id(2) == 0)
    def _():
        acc_ref[...] = jnp.zeros_like(acc_ref)

    acc_ref[...] += jnp.dot(x_ref[...].astype(jnp.bfloat16),
                            w_ref[...].astype(jnp.bfloat16),
                            preferred_element_type=jnp.float32)

    @pl.when(pl.program_id(2) == pl.num_programs(2) - 1)
    def _():
        y = acc_ref[...] + b_ref[...]
        if activation == "gelu":
            # TODO(synk): PyTorch nn.GELU defaults to exact erf; tanh approx used.
            y = jax.nn.gelu(y)
        elif activation == "relu":
            y = jnp.maximum(y, 0.0)
        o_ref[...] = y.astype(o_ref.dtype)


def linear(x, w, b, activation=None):
    """x:(M,K) @ w:(K,N) + b:(1,N), tiled (M,N,K) grid with a VMEM accumulator."""
    M, K = x.shape
    N = w.shape[1]
    tm = _fit_tile(M, _TM, 8)
    tn = _fit_tile(N, _TN, 128)
    tk = _fit_reduce_tile(K, _TK, 128)
    grid = (pl.cdiv(M, tm), pl.cdiv(N, tn), pl.cdiv(K, tk))
    cost = pl.CostEstimate(
        flops=2 * M * N * K,
        transcendentals=(M * N if activation == "gelu" else 0),
        bytes_accessed=4 * M * K + 2 * K * N + 4 * M * N + 4 * N)
    return pl.pallas_call(
        functools.partial(_linear_kernel, activation),
        out_shape=jax.ShapeDtypeStruct((M, N), jnp.float32),
        grid_spec=pltpu.PrefetchScalarGridSpec(
            num_scalar_prefetch=0,
            grid=grid,
            in_specs=[
                pl.BlockSpec((tm, tk), lambda i, j, k: (i, k)),
                pl.BlockSpec((tk, tn), lambda i, j, k: (k, j)),
                pl.BlockSpec((1, tn), lambda i, j, k: (0, j)),
            ],
            out_specs=pl.BlockSpec((tm, tn), lambda i, j, k: (i, j)),
            scratch_shapes=[pltpu.VMEM((tm, tn), jnp.float32)],
        ),
        compiler_params=pltpu.CompilerParams(
            dimension_semantics=("parallel", "parallel", "arbitrary"),
            vmem_limit_bytes=_VMEM_LIMIT),
        cost_estimate=cost,
    )(x, w, b)


def _ln_linear_kernel(eps, activation, x_ref, g_ref, bln_ref, w_ref, b_ref, o_ref):
    x = x_ref[...]
    mu = jnp.mean(x, axis=-1, keepdims=True)
    var = jnp.mean(jnp.square(x - mu), axis=-1, keepdims=True)
    h = (x - mu) * jax.lax.rsqrt(var + eps)
    h = h * g_ref[...] + bln_ref[...]
    y = jnp.dot(h.astype(jnp.bfloat16), w_ref[...].astype(jnp.bfloat16),
                preferred_element_type=jnp.float32) + b_ref[...]
    if activation == "gelu":
        y = jax.nn.gelu(y)
    elif activation == "relu":
        y = jnp.maximum(y, 0.0)
    o_ref[...] = y.astype(o_ref.dtype)


def ln_linear(x, g, bln, w, b, activation=None, eps=1e-6):
    """Fused LayerNorm(x) @ w + b (+activation).  Grid over (M tiles, N tiles);
    the reduction (=D) stays whole because LN needs the full row anyway."""
    M, D = x.shape
    N = w.shape[1]
    tm = _fit_tile(M, _TM, 8)
    tn = _fit_tile(N, _TN, 128)
    grid = (pl.cdiv(M, tm), pl.cdiv(N, tn))
    cost = pl.CostEstimate(
        flops=2 * M * N * D + 8 * M * D,
        transcendentals=M + (M * N if activation == "gelu" else 0),
        bytes_accessed=4 * M * D + 2 * D * N + 4 * M * N + 12 * D)
    return pl.pallas_call(
        functools.partial(_ln_linear_kernel, eps, activation),
        out_shape=jax.ShapeDtypeStruct((M, N), jnp.float32),
        grid=grid,
        in_specs=[
            pl.BlockSpec((tm, D), lambda i, j: (i, 0)),
            pl.BlockSpec((1, D), lambda i, j: (0, 0)),
            pl.BlockSpec((1, D), lambda i, j: (0, 0)),
            pl.BlockSpec((D, tn), lambda i, j: (0, j)),
            pl.BlockSpec((1, tn), lambda i, j: (0, j)),
        ],
        out_specs=pl.BlockSpec((tm, tn), lambda i, j: (i, j)),
        compiler_params=pltpu.CompilerParams(
            dimension_semantics=("parallel", "parallel"),
            vmem_limit_bytes=_VMEM_LIMIT),
        cost_estimate=cost,
    )(x, g, bln, w, b)


def _layernorm_kernel(eps, x_ref, g_ref, b_ref, o_ref):
    x = x_ref[...]
    mu = jnp.mean(x, axis=-1, keepdims=True)
    var = jnp.mean(jnp.square(x - mu), axis=-1, keepdims=True)
    y = (x - mu) * jax.lax.rsqrt(var + eps)
    o_ref[...] = (y * g_ref[...] + b_ref[...]).astype(o_ref.dtype)


def layernorm(x, g, b, eps=1e-12):
    """Row-tiled LayerNorm: streams (tm, D) row blocks, gamma/beta resident."""
    M, D = x.shape
    tm = _fit_tile(M, _TROWS, 8)
    return pl.pallas_call(
        functools.partial(_layernorm_kernel, eps),
        out_shape=jax.ShapeDtypeStruct((M, D), jnp.float32),
        grid=(pl.cdiv(M, tm),),
        in_specs=[
            pl.BlockSpec((tm, D), lambda i: (i, 0)),
            pl.BlockSpec((1, D), lambda i: (0, 0)),
            pl.BlockSpec((1, D), lambda i: (0, 0)),
        ],
        out_specs=pl.BlockSpec((tm, D), lambda i: (i, 0)),
        compiler_params=pltpu.CompilerParams(
            dimension_semantics=("parallel",),
            vmem_limit_bytes=_VMEM_LIMIT),
    )(x, g, b)


def _add_layernorm_kernel(eps, x_ref, y_ref, g_ref, b_ref, o_ref):
    x = x_ref[...] + y_ref[...]
    mu = jnp.mean(x, axis=-1, keepdims=True)
    var = jnp.mean(jnp.square(x - mu), axis=-1, keepdims=True)
    h = (x - mu) * jax.lax.rsqrt(var + eps)
    o_ref[...] = (h * g_ref[...] + b_ref[...]).astype(o_ref.dtype)


def add_layernorm(x, y, g, b, eps=1e-12):
    """Fused residual-add + LayerNorm (BERT post-LN)."""
    M, D = x.shape
    tm = _fit_tile(M, _TROWS, 8)
    return pl.pallas_call(
        functools.partial(_add_layernorm_kernel, eps),
        out_shape=jax.ShapeDtypeStruct((M, D), jnp.float32),
        grid=(pl.cdiv(M, tm),),
        in_specs=[
            pl.BlockSpec((tm, D), lambda i: (i, 0)),
            pl.BlockSpec((tm, D), lambda i: (i, 0)),
            pl.BlockSpec((1, D), lambda i: (0, 0)),
            pl.BlockSpec((1, D), lambda i: (0, 0)),
        ],
        out_specs=pl.BlockSpec((tm, D), lambda i: (i, 0)),
        compiler_params=pltpu.CompilerParams(
            dimension_semantics=("parallel",),
            vmem_limit_bytes=_VMEM_LIMIT),
    )(x, y, g, b)


def _mha_kernel(num_heads, scale, q_ref, k_ref, v_ref, o_ref):
    q = q_ref[0]                             # (Lq, D) — heads packed on lanes
    k = k_ref[0]                             # (Lk, D)
    v = v_ref[0]
    dh = q.shape[-1] // num_heads
    outs = []
    for h in range(num_heads):               # static unrolled head loop
        sl = slice(h * dh, (h + 1) * dh)
        qh = q[:, sl].astype(jnp.bfloat16)
        kh = k[:, sl].astype(jnp.bfloat16)
        vh = v[:, sl].astype(jnp.bfloat16)
        s = jax.lax.dot_general(qh, kh, (((1,), (1,)), ((), ())),
                                preferred_element_type=jnp.float32) * scale
        s = s - jnp.max(s, axis=-1, keepdims=True)
        p = jnp.exp(s)
        p = p * pl.reciprocal(jnp.sum(p, axis=-1, keepdims=True), approx=True)
        outs.append(jnp.dot(p.astype(jnp.bfloat16), vh,
                            preferred_element_type=jnp.float32))
    o_ref[0] = jnp.concatenate(outs, axis=-1).astype(o_ref.dtype)


def mha_attention(q, k, v, num_heads):
    """q:(B,Lq,D), k/v:(B,Lk,D) -> (B,Lq,D).  Heads stay packed on the lane
    axis (no host-side (B,H,L,Dh) transposes); one grid step per batch row."""
    B, Lq, D = q.shape
    Lk = k.shape[1]
    scale = 1.0 / math.sqrt(D // num_heads)
    cost = pl.CostEstimate(
        flops=4 * B * Lq * Lk * D,
        transcendentals=B * num_heads * Lq * Lk,
        bytes_accessed=4 * (2 * B * Lq * D + 2 * B * Lk * D))
    return pl.pallas_call(
        functools.partial(_mha_kernel, num_heads, scale),
        out_shape=jax.ShapeDtypeStruct((B, Lq, D), jnp.float32),
        grid=(B,),
        in_specs=[
            pl.BlockSpec((1, Lq, D), lambda b: (b, 0, 0)),
            pl.BlockSpec((1, Lk, D), lambda b: (b, 0, 0)),
            pl.BlockSpec((1, Lk, D), lambda b: (b, 0, 0)),
        ],
        out_specs=pl.BlockSpec((1, Lq, D), lambda b: (b, 0, 0)),
        compiler_params=pltpu.CompilerParams(
            dimension_semantics=("parallel",),
            vmem_limit_bytes=_VMEM_LIMIT),
        cost_estimate=cost,
    )(q, k, v)


def _fusion_head_kernel(h_ref, w1_ref, b1_ref, w2_ref, b2_ref, o_ref):
    h = h_ref[...]
    y = jnp.dot(h.astype(jnp.bfloat16), w1_ref[...].astype(jnp.bfloat16),
                preferred_element_type=jnp.float32) + b1_ref[...]
    y = jnp.maximum(y, 0.0)                              # ReLU
    z = jnp.dot(y.astype(jnp.bfloat16), w2_ref[...].astype(jnp.bfloat16),
                preferred_element_type=jnp.float32) + b2_ref[...]
    z = z - jnp.max(z, axis=-1, keepdims=True)           # softmax(dim=-1)
    e = jnp.exp(z)
    o_ref[...] = (e * pl.reciprocal(jnp.sum(e, axis=-1, keepdims=True),
                                    approx=True)).astype(o_ref.dtype)


def fusion_head(h, w1, b1, w2, b2):
    """Fused Linear -> ReLU -> Linear -> softmax.  Batch rows tiled; weights
    stay resident across the grid."""
    B, D2 = h.shape
    D = w1.shape[1]
    O = w2.shape[1]
    tb = _fit_tile(B, _TM, 8)
    # TODO(synk): at production sizes pad output_size to a multiple of 128 so
    # the final store is lane-dense (unmasked vst); the toy O=16 is accepted.
    return pl.pallas_call(
        _fusion_head_kernel,
        out_shape=jax.ShapeDtypeStruct((B, O), jnp.float32),
        grid=(pl.cdiv(B, tb),),
        in_specs=[
            pl.BlockSpec((tb, D2), lambda i: (i, 0)),
            pl.BlockSpec((D2, D), lambda i: (0, 0)),
            pl.BlockSpec((1, D), lambda i: (0, 0)),
            pl.BlockSpec((D, O), lambda i: (0, 0)),
            pl.BlockSpec((1, O), lambda i: (0, 0)),
        ],
        out_specs=pl.BlockSpec((tb, O), lambda i: (i, 0)),
        compiler_params=pltpu.CompilerParams(
            dimension_semantics=("parallel",),
            vmem_limit_bytes=_VMEM_LIMIT),
    )(h, w1, b1, w2, b2)


# ----------------------------------------------------------------------------
# Deterministic parameter construction (synthetic weights; no checkpoint load)
# ----------------------------------------------------------------------------
def _dense(key, din, dout):
    # Matmul weights stored in bf16 (halves weight HBM traffic; f32 MXU accum).
    w = (jax.random.normal(key, (din, dout), jnp.float32)
         * (1.0 / math.sqrt(din))).astype(jnp.bfloat16)
    b = jnp.zeros((1, dout), jnp.float32)
    return {"w": w, "b": b}


def _ln(d):
    return {"g": jnp.ones((1, d), jnp.float32), "b": jnp.zeros((1, d), jnp.float32)}


def _block_params(key, d, mlp_ratio=4):
    ks = jax.random.split(key, 4)
    return {
        "ln1": _ln(d),
        "qkv": _dense(ks[0], d, 3 * d),          # fused Q|K|V projection
        "o": _dense(ks[1], d, d),
        "ln2": _ln(d),
        "fc1": _dense(ks[2], d, d * mlp_ratio),
        "fc2": _dense(ks[3], d * mlp_ratio, d),
    }


def init_params(key, cfg):
    keys = jax.random.split(key, 12)
    D = cfg["hidden"]
    P = cfg["patch"]
    C = cfg["in_chans"]
    n_patches = (cfg["image_size"] // P) ** 2

    vit = {
        "patch": _dense(keys[0], C * P * P, D),
        "cls": jax.random.normal(keys[1], (1, 1, D), jnp.float32) * 0.02,
        "pos": jax.random.normal(keys[2], (1, n_patches + 1, D), jnp.float32) * 0.02,
        "blocks": [_block_params(k, D)
                   for k in jax.random.split(keys[3], cfg["vit_depth"])],
        "ln_f": _ln(D),
    }
    bert = {
        "tok_emb": jax.random.normal(keys[4], (cfg["vocab"], D), jnp.float32) * 0.02,
        "type_emb": jax.random.normal(keys[5], (cfg["type_vocab"], D), jnp.float32) * 0.02,
        "pos_emb": jax.random.normal(keys[6], (cfg["max_pos"], D), jnp.float32) * 0.02,
        "emb_ln": _ln(D),
        "blocks": [_block_params(k, D)
                   for k in jax.random.split(keys[7], cfg["bert_depth"])],
    }

    def xattn(k):
        ks = jax.random.split(k, 3)
        return {"q": _dense(ks[0], D, D),
                "kv": _dense(ks[1], D, 2 * D),   # fused K|V projection
                "o": _dense(ks[2], D, D)}

    return {
        "vit": vit,
        "bert": bert,
        "local_attn": xattn(keys[8]),
        "global_attn": xattn(keys[9]),
        "fusion1": _dense(keys[10], 2 * D, D),
        "fusion2": _dense(keys[11], D, cfg["output_size"]),
    }


# ----------------------------------------------------------------------------
# Model forward (glue around the Pallas kernels)
# ----------------------------------------------------------------------------
def vit_encoder(p, image, patch, num_heads):
    """Image (B,C,H,W) NCHW -> (B, 1+num_patches, D) token embeddings."""
    B, C, H, W = image.shape
    gh, gw = H // patch, W // patch
    # conv-as-matmul (im2col): (B,C,gh,P,gw,P) -> (B*gh*gw, C*P*P)
    patches = image.reshape(B, C, gh, patch, gw, patch)
    patches = patches.transpose(0, 2, 4, 1, 3, 5).reshape(B * gh * gw,
                                                          C * patch * patch)
    D = p["patch"]["w"].shape[1]
    x = linear(patches, p["patch"]["w"], p["patch"]["b"]).reshape(B, gh * gw, D)
    cls = jnp.broadcast_to(p["cls"], (B, 1, D))
    x = jnp.concatenate([cls, x], axis=1) + p["pos"]

    L = x.shape[1]
    for blk in p["blocks"]:                       # pre-LN ViT block
        xf = x.reshape(B * L, D)
        # fused LN1 + QKV projection (one kernel, one read of x)
        qkv = ln_linear(xf, blk["ln1"]["g"], blk["ln1"]["b"],
                        blk["qkv"]["w"], blk["qkv"]["b"],
                        eps=1e-6).reshape(B, L, 3 * D)
        q, k, v = jnp.split(qkv, 3, axis=-1)
        ctx = mha_attention(q, k, v, num_heads).reshape(B * L, D)
        x = x + linear(ctx, blk["o"]["w"], blk["o"]["b"]).reshape(B, L, D)
        # fused LN2 + fc1 (+GELU)
        h = ln_linear(x.reshape(B * L, D), blk["ln2"]["g"], blk["ln2"]["b"],
                      blk["fc1"]["w"], blk["fc1"]["b"],
                      activation="gelu", eps=1e-6)
        x = x + linear(h, blk["fc2"]["w"], blk["fc2"]["b"]).reshape(B, L, D)

    xf = x.reshape(B * L, D)
    return layernorm(xf, p["ln_f"]["g"], p["ln_f"]["b"], eps=1e-6).reshape(B, L, D)


def bert_encoder(p, tokens, segment_ids, position_ids, num_heads):
    """tokens/segment_ids/position_ids (B,L) int32 -> (B, L, D)."""
    emb = (jnp.take(p["tok_emb"], tokens, axis=0)
           + jnp.take(p["type_emb"], segment_ids, axis=0)
           + jnp.take(p["pos_emb"], position_ids, axis=0))
    B, L, D = emb.shape
    x = layernorm(emb.reshape(B * L, D), p["emb_ln"]["g"],
                  p["emb_ln"]["b"]).reshape(B, L, D)
    for blk in p["blocks"]:                       # post-LN BERT block
        xf = x.reshape(B * L, D)
        qkv = linear(xf, blk["qkv"]["w"], blk["qkv"]["b"]).reshape(B, L, 3 * D)
        q, k, v = jnp.split(qkv, 3, axis=-1)
        ctx = mha_attention(q, k, v, num_heads).reshape(B * L, D)
        attn_out = linear(ctx, blk["o"]["w"], blk["o"]["b"])
        x = add_layernorm(xf, attn_out, blk["ln1"]["g"], blk["ln1"]["b"])
        h = linear(x, blk["fc1"]["w"], blk["fc1"]["b"], activation="gelu")
        ff = linear(h, blk["fc2"]["w"], blk["fc2"]["b"])
        x = add_layernorm(x, ff, blk["ln2"]["g"], blk["ln2"]["b"]).reshape(B, L, D)
    return x


def cross_attention(p, query_seq, kv_seq, num_heads=2):
    # TODO(synk): the custom MultiHeadAttention source is not provided; its
    # output must be (B, 1, D) (forward squeezes dim 1), so the query sequence
    # is pooled to its first ([CLS]) token before 2-head cross-attention.
    B, _, D = query_seq.shape
    Lk = kv_seq.shape[1]
    q = linear(query_seq[:, 0, :], p["q"]["w"], p["q"]["b"]).reshape(B, 1, D)
    kv = linear(kv_seq.reshape(B * Lk, D), p["kv"]["w"],
                p["kv"]["b"]).reshape(B, Lk, 2 * D)
    k, v = jnp.split(kv, 2, axis=-1)
    ctx = mha_attention(q, k, v, num_heads).reshape(B, D)
    return linear(ctx, p["o"]["w"], p["o"]["b"])          # (B, D)


def bivision_vqa_forward(params, cfg, image, tokens, segment_ids, input_mask):
    image_local_embeds = vit_encoder(params["vit"], image, cfg["patch"],
                                     cfg["vit_heads"])
    # NOTE: the reference forward passes input_mask as position_ids — replicated.
    question_embeds = bert_encoder(params["bert"], tokens, segment_ids,
                                   input_mask, cfg["bert_heads"])
    local_out = cross_attention(params["local_attn"], question_embeds,
                                image_local_embeds[:, 1:, :])
    global_out = cross_attention(params["global_attn"], question_embeds,
                                 image_local_embeds[:, 0:1, :])
    h = jnp.concatenate([local_out, global_out], axis=1)   # (B, 2D)
    # TODO(synk): nn.Dropout between the fusion linears omitted (inference run).
    # NOTE: like the reference, the output is post-softmax probabilities.
    logits = fusion_head(h,
                         params["fusion1"]["w"], params["fusion1"]["b"],
                         params["fusion2"]["w"], params["fusion2"]["b"])
    return logits


# ----------------------------------------------------------------------------
if __name__ == "__main__":
    cfg = dict(image_size=16, patch=8, in_chans=3, hidden=32,
               vit_depth=2, vit_heads=2, bert_depth=2, bert_heads=2,
               vocab=64, type_vocab=2, max_pos=32, output_size=16)

    key = jax.random.PRNGKey(0)
    pkey, ikey, tkey = jax.random.split(key, 3)
    params = init_params(pkey, cfg)

    B, L = 2, 8
    image = jax.random.normal(
        ikey, (B, cfg["in_chans"], cfg["image_size"], cfg["image_size"]), jnp.float32)
    tokens = jax.random.randint(tkey, (B, L), 0, cfg["vocab"], dtype=jnp.int32)
    segment_ids = jnp.zeros((B, L), jnp.int32)
    input_mask = jnp.ones((B, L), jnp.int32)   # used as position_ids, as in the reference

    fwd = jax.jit(functools.partial(bivision_vqa_forward, params, cfg))
    logits = fwd(image, tokens, segment_ids, input_mask)
    jax.block_until_ready(logits)

    assert logits.shape == (B, cfg["output_size"])
    assert bool(jnp.all(jnp.isfinite(logits)))
    print("KERNEL_OK")
</pallas_src>

<mosaic_0001>
module attributes {stable_mosaic.version = 11 : i64} {
  func.func @_linear_kernel(%arg0: i32, %arg1: i32, %arg2: i32, %arg3: memref<8x192xf32, #tpu.memory_space<vmem>>, %arg4: memref<192x32xbf16, #tpu.memory_space<vmem>>, %arg5: memref<1x32xf32, #tpu.memory_space<vmem>>, %arg6: memref<8x32xf32, #tpu.memory_space<vmem>>, %arg7: memref<8x32xf32, #tpu.memory_space<vmem>>) attributes {dimension_semantics = [#tpu.dimension_semantics<parallel>, #tpu.dimension_semantics<parallel>, #tpu.dimension_semantics<arbitrary>], iteration_bounds = array<i64: 1, 1, 1>, scalar_prefetch = 0 : i64, scratch_operands = 1 : i64, tpu.core_type = #tpu.core_type<tc>, window_params = [{transform_indices = @transform_0, window_bounds = array<i64: 8, 192>}, {transform_indices = @transform_1, window_bounds = array<i64: 192, 32>}, {transform_indices = @transform_2, window_bounds = array<i64: 1, 32>}, {transform_indices = @transform_3, window_bounds = array<i64: 8, 32>}]} {
    %c0_i32 = arith.constant 0 : i32
    %0 = arith.cmpi eq, %arg2, %c0_i32 : i32
    %1 = arith.extui %0 : i1 to i32
    %c0_i32_0 = arith.constant 0 : i32
    %2 = arith.cmpi ne, %1, %c0_i32_0 : i32
    scf.if %2 {
      %cst_10 = arith.constant 0.000000e+00 : f32
      %13 = vector.broadcast %cst_10 : f32 to vector<8x32xf32>
      %c0_11 = arith.constant 0 : index
      %c0_12 = arith.constant 0 : index
      %14 = vector.load %arg7[%c0_11, %c0_12] : memref<8x32xf32, #tpu.memory_space<vmem>>, vector<8x32xf32>
      tpu.vector_store %arg7[%c0_11, %c0_12], %13 {strides = array<i32>} : memref<8x32xf32, #tpu.memory_space<vmem>>, vector<8x32xf32>,
    } else {
    }
    %c0 = arith.constant 0 : index
    %c0_1 = arith.constant 0 : index
    %3 = vector.load %arg7[%c0, %c0_1] : memref<8x32xf32, #tpu.memory_space<vmem>>, vector<8x32xf32>
    %c0_2 = arith.constant 0 : index
    %c0_3 = arith.constant 0 : index
    %4 = vector.load %arg3[%c0_2, %c0_3] : memref<8x192xf32, #tpu.memory_space<vmem>>, vector<8x192xf32>
    %5 = arith.truncf %4 : vector<8x192xf32> to vector<8x192xbf16>
    %c0_4 = arith.constant 0 : index
    %c0_5 = arith.constant 0 : index
    %6 = vector.load %arg4[%c0_4, %c0_5] : memref<192x32xbf16, #tpu.memory_space<vmem>>, vector<192x32xbf16>
    %cst = arith.constant dense<0.000000e+00> : vector<8x32xf32>
    %7 = tpu.matmul %5, %6, %cst {dimension_numbers = #tpu.dot_dimension_numbers<[1], [0], [0], [1], [0, 0, 1, 1], [], []>} : vector<8x192xbf16>, vector<192x32xbf16>, vector<8x32xf32> -> vector<8x32xf32>
    %8 = arith.addf %3, %7 : vector<8x32xf32>
    %c0_6 = arith.constant 0 : index
    %c0_7 = arith.constant 0 : index
    %9 = vector.load %arg7[%c0_6, %c0_7] : memref<8x32xf32, #tpu.memory_space<vmem>>, vector<8x32xf32>
    tpu.vector_store %arg7[%c0_6, %c0_7], %8 {strides = array<i32>} : memref<8x32xf32, #tpu.memory_space<vmem>>, vector<8x32xf32>,
    %c0_i32_8 = arith.constant 0 : i32
    %10 = arith.cmpi eq, %arg2, %c0_i32_8 : i32
    %11 = arith.extui %10 : i1 to i32
    %c0_i32_9 = arith.constant 0 : i32
    %12 = arith.cmpi ne, %11, %c0_i32_9 : i32
    scf.if %12 {
      %c0_10 = arith.constant 0 : index
      %c0_11 = arith.constant 0 : index
      %13 = vector.load %arg7[%c0_10, %c0_11] : memref<8x32xf32, #tpu.memory_space<vmem>>, vector<8x32xf32>
      %c0_12 = arith.constant 0 : index
      %c0_13 = arith.constant 0 : index
      %14 = vector.load %arg5[%c0_12, %c0_13] : memref<1x32xf32, #tpu.memory_space<vmem>>, vector<1x32xf32>
      %15 = vector.broadcast %14 : vector<1x32xf32> to vector<8x32xf32>
      %16 = arith.addf %13, %15 : vector<8x32xf32>
      %c0_14 = arith.constant 0 : index
      %c0_15 = arith.constant 0 : index
      %17 = vector.load %arg6[%c0_14, %c0_15] : memref<8x32xf32, #tpu.memory_space<vmem>>, vector<8x32xf32>
      tpu.vector_store %arg6[%c0_14, %c0_15], %16 {strides = array<i32>} : memref<8x32xf32, #tpu.memory_space<vmem>>, vector<8x32xf32>,
    } else {
    }
    return
  }
  func.func @transform_0(%arg0: i32, %arg1: i32, %arg2: i32) -> (i32, i32) {
    %c0_i32 = arith.constant 0 : i32
    return %arg0, %arg2 : i32, i32
  }
  func.func @transform_1(%arg0: i32, %arg1: i32, %arg2: i32) -> (i32, i32) {
    %c0_i32 = arith.constant 0 : i32
    return %arg2, %arg1 : i32, i32
  }
  func.func @transform_2(%arg0: i32, %arg1: i32, %arg2: i32) -> (i32, i32) {
    %c0_i32 = arith.constant 0 : i32
    %c0_i32_0 = arith.constant 0 : i32
    return %c0_i32, %arg1 : i32, i32
  }
  func.func @transform_3(%arg0: i32, %arg1: i32, %arg2: i32) -> (i32, i32) {
    %c0_i32 = arith.constant 0 : i32
    return %arg0, %arg1 : i32, i32
  }
}

module attributes {stable_mosaic.version = 11 : i64} {
  func.func @_ln_linear_kernel(%arg0: i32, %arg1: i32, %arg2: memref<10x32xf32, #tpu.memory_space<vmem>>, %arg3: memref<1x32xf32, #tpu.memory_space<vmem>>, %arg4: memref<1x32xf32, #tpu.memory_space<vmem>>, %arg5: memref<32x96xbf16, #tpu.memory_space<vmem>>, %arg6: memref<1x96xf32, #tpu.memory_space<vmem>>, %arg7: memref<10x96xf32, #tpu.memory_space<vmem>>) attributes {dimension_semantics = [#tpu.dimension_semantics<parallel>, #tpu.dimension_semantics<parallel>], iteration_bounds = array<i64: 1, 1>, scalar_prefetch = 0 : i64, scratch_operands = 0 : i64, tpu.core_type = #tpu.core_type<tc>, window_params = [{transform_indices = @transform_0, window_bounds = array<i64: 10, 32>}, {pipeline_mode = #tpu.pipeline_mode<synchronous>, transform_indices = @transform_1, window_bounds = array<i64: 1, 32>}, {pipeline_mode = #tpu.pipeline_mode<synchronous>, transform_indices = @transform_2, window_bounds = array<i64: 1, 32>}, {transform_indices = @transform_3, window_bounds = array<i64: 32, 96>}, {transform_indices = @transform_4, window_bounds = array<i64: 1, 96>}, {transform_indices = @transform_5, window_bounds = array<i64: 10, 96>}]} {
    %c0 = arith.constant 0 : index
    %c0_0 = arith.constant 0 : index
    %0 = vector.load %arg2[%c0, %c0_0] : memref<10x32xf32, #tpu.memory_space<vmem>>, vector<10x32xf32>
    %cst = arith.constant dense<0.000000e+00> : vector<10xf32>
    %1 = vector.multi_reduction <add>, %0, %cst [1] : vector<10x32xf32> to vector<10xf32>
    %2 = vector.shape_cast %1 : vector<10xf32> to vector<10x1xf32>
    %cst_1 = arith.constant 3.200000e+01 : f32
    %3 = vector.broadcast %cst_1 : f32 to vector<10x1xf32>
    %4 = arith.divf %2, %3 : vector<10x1xf32>
    %5 = vector.broadcast %4 : vector<10x1xf32> to vector<10x32xf32>
    %6 = arith.subf %0, %5 : vector<10x32xf32>
    %7 = arith.mulf %6, %6 : vector<10x32xf32>
    %cst_2 = arith.constant dense<0.000000e+00> : vector<10xf32>
    %8 = vector.multi_reduction <add>, %7, %cst_2 [1] : vector<10x32xf32> to vector<10xf32>
    %9 = vector.shape_cast %8 : vector<10xf32> to vector<10x1xf32>
    %cst_3 = arith.constant 3.200000e+01 : f32
    %10 = vector.broadcast %cst_3 : f32 to vector<10x1xf32>
    %11 = arith.divf %9, %10 : vector<10x1xf32>
    %12 = vector.broadcast %4 : vector<10x1xf32> to vector<10x32xf32>
    %13 = arith.subf %0, %12 : vector<10x32xf32>
    %cst_4 = arith.constant 9.99999997E-7 : f32
    %14 = vector.broadcast %cst_4 : f32 to vector<10x1xf32>
    %15 = arith.addf %11, %14 : vector<10x1xf32>
    %16 = math.rsqrt %15 : vector<10x1xf32>
    %17 = vector.broadcast %16 : vector<10x1xf32> to vector<10x32xf32>
    %18 = arith.mulf %13, %17 : vector<10x32xf32>
    %c0_5 = arith.constant 0 : index
    %c0_6 = arith.constant 0 : index
    %19 = vector.load %arg3[%c0_5, %c0_6] : memref<1x32xf32, #tpu.memory_space<vmem>>, vector<1x32xf32>
    %20 = vector.broadcast %19 : vector<1x32xf32> to vector<10x32xf32>
    %21 = arith.mulf %18, %20 : vector<10x32xf32>
    %c0_7 = arith.constant 0 : index
    %c0_8 = arith.constant 0 : index
    %22 = vector.load %arg4[%c0_7, %c0_8] : memref<1x32xf32, #tpu.memory_space<vmem>>, vector<1x32xf32>
    %23 = vector.broadcast %22 : vector<1x32xf32> to vector<10x32xf32>
    %24 = arith.addf %21, %23 : vector<10x32xf32>
    %25 = arith.truncf %24 : vector<10x32xf32> to vector<10x32xbf16>
    %c0_9 = arith.constant 0 : index
    %c0_10 = arith.constant 0 : index
    %26 = vector.load %arg5[%c0_9, %c0_10] : memref<32x96xbf16, #tpu.memory_space<vmem>>, vector<32x96xbf16>
    %cst_11 = arith.constant dense<0.000000e+00> : vector<10x96xf32>
    %27 = tpu.matmul %25, %26, %cst_11 {dimension_numbers = #tpu.dot_dimension_numbers<[1], [0], [0], [1], [0, 0, 1, 1], [], []>} : vector<10x32xbf16>, vector<32x96xbf16>, vector<10x96xf32> -> vector<10x96xf32>
    %c0_12 = arith.constant 0 : index
    %c0_13 = arith.constant 0 : index
    %28 = vector.load %arg6[%c0_12, %c0_13] : memref<1x96xf32, #tpu.memory_space<vmem>>, vector<1x96xf32>
    %29 = vector.broadcast %28 : vector<1x96xf32> to vector<10x96xf32>
    %30 = arith.addf %27, %29 : vector<10x96xf32>
    %c0_14 = arith.constant 0 : index
    %c0_15 = arith.constant 0 : index
    %31 = vector.load %arg7[%c0_14, %c0_15] : memref<10x96xf32, #tpu.memory_space<vmem>>, vector<10x96xf32>
    tpu.vector_store %arg7[%c0_14, %c0_15], %30 {strides = array<i32>} : memref<10x96xf32, #tpu.memory_space<vmem>>, vector<10x96xf32>,
    return
  }
  func.func @transform_0(%arg0: i32, %arg1: i32) -> (i32, i32) {
    %c0_i32 = arith.constant 0 : i32
    %c0_i32_0 = arith.constant 0 : i32
    return %arg0, %c0_i32 : i32, i32
  }
  func.func @transform_1(%arg0: i32, %arg1: i32) -> (i32, i32) {
    %c0_i32 = arith.constant 0 : i32
    %c0_i32_0 = arith.constant 0 : i32
    %c0_i32_1 = arith.constant 0 : i32
    return %c0_i32, %c0_i32_0 : i32, i32
  }
  func.func @transform_2(%arg0: i32, %arg1: i32) -> (i32, i32) {
    %c0_i32 = arith.constant 0 : i32
    %c0_i32_0 = arith.constant 0 : i32
    %c0_i32_1 = arith.constant 0 : i32
    return %c0_i32, %c0_i32_0 : i32, i32
  }
  func.func @transform_3(%arg0: i32, %arg1: i32) -> (i32, i32) {
    %c0_i32 = arith.constant 0 : i32
    %c0_i32_0 = arith.constant 0 : i32
    return %c0_i32, %arg1 : i32, i32
  }
  func.func @transform_4(%arg0: i32, %arg1: i32) -> (i32, i32) {
    %c0_i32 = arith.constant 0 : i32
    %c0_i32_0 = arith.constant 0 : i32
    return %c0_i32, %arg1 : i32, i32
  }
  func.func @transform_5(%arg0: i32, %arg1: i32) -> (i32, i32) {
    %c0_i32 = arith.constant 0 : i32
    return %arg0, %arg1 : i32, i32
  }
}

module attributes {stable_mosaic.version = 11 : i64} {
  func.func @_mha_kernel(%arg0: i32, %arg1: memref<1x5x32xf32, #tpu.memory_space<vmem>>, %arg2: memref<1x5x32xf32, #tpu.memory_space<vmem>>, %arg3: memref<1x5x32xf32, #tpu.memory_space<vmem>>, %arg4: memref<1x5x32xf32, #tpu.memory_space<vmem>>) attributes {dimension_semantics = [#tpu.dimension_semantics<parallel>], iteration_bounds = array<i64: 2>, scalar_prefetch = 0 : i64, scratch_operands = 0 : i64, tpu.core_type = #tpu.core_type<tc>, window_params = [{transform_indices = @transform_0, window_bounds = array<i64: 1, 5, 32>}, {transform_indices = @transform_1, window_bounds = array<i64: 1, 5, 32>}, {transform_indices = @transform_2, window_bounds = array<i64: 1, 5, 32>}, {transform_indices = @transform_3, window_bounds = array<i64: 1, 5, 32>}]} {
    %c0 = arith.constant 0 : index
    %c0_0 = arith.constant 0 : index
    %c0_1 = arith.constant 0 : index
    %0 = vector.load %arg1[%c0, %c0_0, %c0_1] : memref<1x5x32xf32, #tpu.memory_space<vmem>>, vector<1x5x32xf32>
    %1 = vector.shape_cast %0 : vector<1x5x32xf32> to vector<5x32xf32>
    %c0_2 = arith.constant 0 : index
    %c0_3 = arith.constant 0 : index
    %c0_4 = arith.constant 0 : index
    %2 = vector.load %arg2[%c0_2, %c0_3, %c0_4] : memref<1x5x32xf32, #tpu.memory_space<vmem>>, vector<1x5x32xf32>
    %3 = vector.shape_cast %2 : vector<1x5x32xf32> to vector<5x32xf32>
    %c0_5 = arith.constant 0 : index
    %c0_6 = arith.constant 0 : index
    %c0_7 = arith.constant 0 : index
    %4 = vector.load %arg3[%c0_5, %c0_6, %c0_7] : memref<1x5x32xf32, #tpu.memory_space<vmem>>, vector<1x5x32xf32>
    %5 = vector.shape_cast %4 : vector<1x5x32xf32> to vector<5x32xf32>
    %6 = vector.extract_strided_slice %1 {offsets = [0, 0], sizes = [5, 16], strides = [1, 1]} : vector<5x32xf32> to vector<5x16xf32>
    %7 = arith.truncf %6 : vector<5x16xf32> to vector<5x16xbf16>
    %8 = vector.extract_strided_slice %3 {offsets = [0, 0], sizes = [5, 16], strides = [1, 1]} : vector<5x32xf32> to vector<5x16xf32>
    %9 = arith.truncf %8 : vector<5x16xf32> to vector<5x16xbf16>
    %10 = vector.extract_strided_slice %5 {offsets = [0, 0], sizes = [5, 16], strides = [1, 1]} : vector<5x32xf32> to vector<5x16xf32>
    %11 = arith.truncf %10 : vector<5x16xf32> to vector<5x16xbf16>
    %cst = arith.constant dense<0.000000e+00> : vector<5x5xf32>
    %12 = tpu.matmul %7, %9, %cst {dimension_numbers = #tpu.dot_dimension_numbers<[1], [1], [0], [0], [0, 0, 1, 0], [], []>} : vector<5x16xbf16>, vector<5x16xbf16>, vector<5x5xf32> -> vector<5x5xf32>
    %cst_8 = arith.constant 2.500000e-01 : f32
    %13 = vector.broadcast %cst_8 : f32 to vector<5x5xf32>
    %14 = arith.mulf %12, %13 : vector<5x5xf32>
    %cst_9 = arith.constant dense<0xFF800000> : vector<5xf32>
    %15 = vector.multi_reduction <maximumf>, %14, %cst_9 [1] : vector<5x5xf32> to vector<5xf32>
    %16 = vector.shape_cast %15 : vector<5xf32> to vector<5x1xf32>
    %17 = vector.broadcast %16 : vector<5x1xf32> to vector<5x5xf32>
    %18 = arith.subf %14, %17 : vector<5x5xf32>
    %19 = math.exp %18 : vector<5x5xf32>
    %cst_10 = arith.constant dense<0.000000e+00> : vector<5xf32>
    %20 = vector.multi_reduction <add>, %19, %cst_10 [1] : vector<5x5xf32> to vector<5xf32>
    %21 = vector.shape_cast %20 : vector<5xf32> to vector<5x1xf32>
    %22 = tpu.reciprocal %21 {approx = true} : vector<5x1xf32> -> vector<5x1xf32>
    %23 = vector.broadcast %22 : vector<5x1xf32> to vector<5x5xf32>
    %24 = arith.mulf %19, %23 : vector<5x5xf32>
    %25 = arith.truncf %24 : vector<5x5xf32> to vector<5x5xbf16>
    %cst_11 = arith.constant dense<0.000000e+00> : vector<5x16xf32>
    %26 = tpu.matmul %25, %11, %cst_11 {dimension_numbers = #tpu.dot_dimension_numbers<[1], [0], [0], [1], [0, 0, 1, 1], [], []>} : vector<5x5xbf16>, vector<5x16xbf16>, vector<5x16xf32> -> vector<5x16xf32>
    %27 = vector.extract_strided_slice %1 {offsets = [0, 16], sizes = [5, 16], strides = [1, 1]} : vector<5x32xf32> to vector<5x16xf32>
    %28 = arith.truncf %27 : vector<5x16xf32> to vector<5x16xbf16>
    %29 = vector.extract_strided_slice %3 {offsets = [0, 16], sizes = [5, 16], strides = [1, 1]} : vector<5x32xf32> to vector<5x16xf32>
    %30 = arith.truncf %29 : vector<5x16xf32> to vector<5x16xbf16>
    %31 = vector.extract_strided_slice %5 {offsets = [0, 16], sizes = [5, 16], strides = [1, 1]} : vector<5x32xf32> to vector<5x16xf32>
    %32 = arith.truncf %31 : vector<5x16xf32> to vector<5x16xbf16>
    %cst_12 = arith.constant dense<0.000000e+00> : vector<5x5xf32>
    %33 = tpu.matmul %28, %30, %cst_12 {dimension_numbers = #tpu.dot_dimension_numbers<[1], [1], [0], [0], [0, 0, 1, 0], [], []>} : vector<5x16xbf16>, vector<5x16xbf16>, vector<5x5xf32> -> vector<5x5xf32>
    %cst_13 = arith.constant 2.500000e-01 : f32
    %34 = vector.broadcast %cst_13 : f32 to vector<5x5xf32>
    %35 = arith.mulf %33, %34 : vector<5x5xf32>
    %cst_14 = arith.constant dense<0xFF800000> : vector<5xf32>
    %36 = vector.multi_reduction <maximumf>, %35, %cst_14 [1] : vector<5x5xf32> to vector<5xf32>
    %37 = vector.shape_cast %36 : vector<5xf32> to vector<5x1xf32>
    %38 = vector.broadcast %37 : vector<5x1xf32> to vector<5x5xf32>
    %39 = arith.subf %35, %38 : vector<5x5xf32>
    %40 = math.exp %39 : vector<5x5xf32>
    %cst_15 = arith.constant dense<0.000000e+00> : vector<5xf32>
    %41 = vector.multi_reduction <add>, %40, %cst_15 [1] : vector<5x5xf32> to vector<5xf32>
    %42 = vector.shape_cast %41 : vector<5xf32> to vector<5x1xf32>
    %43 = tpu.reciprocal %42 {approx = true} : vector<5x1xf32> -> vector<5x1xf32>
    %44 = vector.broadcast %43 : vector<5x1xf32> to vector<5x5xf32>
    %45 = arith.mulf %40, %44 : vector<5x5xf32>
    %46 = arith.truncf %45 : vector<5x5xf32> to vector<5x5xbf16>
    %cst_16 = arith.constant dense<0.000000e+00> : vector<5x16xf32>
    %47 = tpu.matmul %46, %32, %cst_16 {dimension_numbers = #tpu.dot_dimension_numbers<[1], [0], [0], [1], [0, 0, 1, 1], [], []>} : vector<5x5xbf16>, vector<5x16xbf16>, vector<5x16xf32> -> vector<5x16xf32>
    %48 = tpu.concatenate %26, %47 in 1 : vector<5x16xf32>, vector<5x16xf32> -> vector<5x32xf32>
    %c0_17 = arith.constant 0 : index
    %c0_18 = arith.constant 0 : index
    %c0_19 = arith.constant 0 : index
    %49 = vector.load %arg4[%c0_17, %c0_18, %c0_19] : memref<1x5x32xf32, #tpu.memory_space<vmem>>, vector<1x5x32xf32>
    %50 = vector.shape_cast %49 : vector<1x5x32xf32> to vector<5x32xf32>
    %51 = vector.shape_cast %48 : vector<5x32xf32> to vector<1x5x32xf32>
    tpu.vector_store %arg4[%c0_17, %c0_18, %c0_19], %51 {strides = array<i32>} : memref<1x5x32xf32, #tpu.memory_space<vmem>>, vector<1x5x32xf32>,
    return
  }
  func.func @transform_0(%arg0: i32) -> (i32, i32, i32) {
    %c0_i32 = arith.constant 0 : i32
    %c0_i32_0 = arith.constant 0 : i32
    %c0_i32_1 = arith.constant 0 : i32
    return %arg0, %c0_i32, %c0_i32_0 : i32, i32, i32
  }
  func.func @transform_1(%arg0: i32) -> (i32, i32, i32) {
    %c0_i32 = arith.constant 0 : i32
    %c0_i32_0 = arith.constant 0 : i32
    %c0_i32_1 = arith.constant 0 : i32
    return %arg0, %c0_i32, %c0_i32_0 : i32, i32, i32
  }
  func.func @transform_2(%arg0: i32) -> (i32, i32, i32) {
    %c0_i32 = arith.constant 0 : i32
    %c0_i32_0 = arith.constant 0 : i32
    %c0_i32_1 = arith.constant 0 : i32
    return %arg0, %c0_i32, %c0_i32_0 : i32, i32, i32
  }
  func.func @transform_3(%arg0: i32) -> (i32, i32, i32) {
    %c0_i32 = arith.constant 0 : i32
    %c0_i32_0 = arith.constant 0 : i32
    %c0_i32_1 = arith.constant 0 : i32
    return %arg0, %c0_i32, %c0_i32_0 : i32, i32, i32
  }
}

module attributes {stable_mosaic.version = 11 : i64} {
  func.func @_linear_kernel(%arg0: i32, %arg1: i32, %arg2: i32, %arg3: memref<10x32xf32, #tpu.memory_space<vmem>>, %arg4: memref<32x32xbf16, #tpu.memory_space<vmem>>, %arg5: memref<1x32xf32, #tpu.memory_space<vmem>>, %arg6: memref<10x32xf32, #tpu.memory_space<vmem>>, %arg7: memref<10x32xf32, #tpu.memory_space<vmem>>) attributes {dimension_semantics = [#tpu.dimension_semantics<parallel>, #tpu.dimension_semantics<parallel>, #tpu.dimension_semantics<arbitrary>], iteration_bounds = array<i64: 1, 1, 1>, scalar_prefetch = 0 : i64, scratch_operands = 1 : i64, tpu.core_type = #tpu.core_type<tc>, window_params = [{transform_indices = @transform_0, window_bounds = array<i64: 10, 32>}, {transform_indices = @transform_1, window_bounds = array<i64: 32, 32>}, {transform_indices = @transform_2, window_bounds = array<i64: 1, 32>}, {transform_indices = @transform_3, window_bounds = array<i64: 10, 32>}]} {
    %c0_i32 = arith.constant 0 : i32
    %0 = arith.cmpi eq, %arg2, %c0_i32 : i32
    %1 = arith.extui %0 : i1 to i32
    %c0_i32_0 = arith.constant 0 : i32
    %2 = arith.cmpi ne, %1, %c0_i32_0 : i32
    scf.if %2 {
      %cst_10 = arith.constant 0.000000e+00 : f32
      %13 = vector.broadcast %cst_10 : f32 to vector<10x32xf32>
      %c0_11 = arith.constant 0 : index
      %c0_12 = arith.constant 0 : index
      %14 = vector.load %arg7[%c0_11, %c0_12] : memref<10x32xf32, #tpu.memory_space<vmem>>, vector<10x32xf32>
      tpu.vector_store %arg7[%c0_11, %c0_12], %13 {strides = array<i32>} : memref<10x32xf32, #tpu.memory_space<vmem>>, vector<10x32xf32>,
    } else {
    }
    %c0 = arith.constant 0 : index
    %c0_1 = arith.constant 0 : index
    %3 = vector.load %arg7[%c0, %c0_1] : memref<10x32xf32, #tpu.memory_space<vmem>>, vector<10x32xf32>
    %c0_2 = arith.constant 0 : index
    %c0_3 = arith.constant 0 : index
    %4 = vector.load %arg3[%c0_2, %c0_3] : memref<10x32xf32, #tpu.memory_space<vmem>>, vector<10x32xf32>
    %5 = arith.truncf %4 : vector<10x32xf32> to vector<10x32xbf16>
    %c0_4 = arith.constant 0 : index
    %c0_5 = arith.constant 0 : index
    %6 = vector.load %arg4[%c0_4, %c0_5] : memref<32x32xbf16, #tpu.memory_space<vmem>>, vector<32x32xbf16>
    %cst = arith.constant dense<0.000000e+00> : vector<10x32xf32>
    %7 = tpu.matmul %5, %6, %cst {dimension_numbers = #tpu.dot_dimension_numbers<[1], [0], [0], [1], [0, 0, 1, 1], [], []>} : vector<10x32xbf16>, vector<32x32xbf16>, vector<10x32xf32> -> vector<10x32xf32>
    %8 = arith.addf %3, %7 : vector<10x32xf32>
    %c0_6 = arith.constant 0 : index
    %c0_7 = arith.constant 0 : index
    %9 = vector.load %arg7[%c0_6, %c0_7] : memref<10x32xf32, #tpu.memory_space<vmem>>, vector<10x32xf32>
    tpu.vector_store %arg7[%c0_6, %c0_7], %8 {strides = array<i32>} : memref<10x32xf32, #tpu.memory_space<vmem>>, vector<10x32xf32>,
    %c0_i32_8 = arith.constant 0 : i32
    %10 = arith.cmpi eq, %arg2, %c0_i32_8 : i32
    %11 = arith.extui %10 : i1 to i32
    %c0_i32_9 = arith.constant 0 : i32
    %12 = arith.cmpi ne, %11, %c0_i32_9 : i32
    scf.if %12 {
      %c0_10 = arith.constant 0 : index
      %c0_11 = arith.constant 0 : index
      %13 = vector.load %arg7[%c0_10, %c0_11] : memref<10x32xf32, #tpu.memory_space<vmem>>, vector<10x32xf32>
      %c0_12 = arith.constant 0 : index
      %c0_13 = arith.constant 0 : index
      %14 = vector.load %arg5[%c0_12, %c0_13] : memref<1x32xf32, #tpu.memory_space<vmem>>, vector<1x32xf32>
      %15 = vector.broadcast %14 : vector<1x32xf32> to vector<10x32xf32>
      %16 = arith.addf %13, %15 : vector<10x32xf32>
      %c0_14 = arith.constant 0 : index
      %c0_15 = arith.constant 0 : index
      %17 = vector.load %arg6[%c0_14, %c0_15] : memref<10x32xf32, #tpu.memory_space<vmem>>, vector<10x32xf32>
      tpu.vector_store %arg6[%c0_14, %c0_15], %16 {strides = array<i32>} : memref<10x32xf32, #tpu.memory_space<vmem>>, vector<10x32xf32>,
    } else {
    }
    return
  }
  func.func @transform_0(%arg0: i32, %arg1: i32, %arg2: i32) -> (i32, i32) {
    %c0_i32 = arith.constant 0 : i32
    return %arg0, %arg2 : i32, i32
  }
  func.func @transform_1(%arg0: i32, %arg1: i32, %arg2: i32) -> (i32, i32) {
    %c0_i32 = arith.constant 0 : i32
    return %arg2, %arg1 : i32, i32
  }
  func.func @transform_2(%arg0: i32, %arg1: i32, %arg2: i32) -> (i32, i32) {
    %c0_i32 = arith.constant 0 : i32
    %c0_i32_0 = arith.constant 0 : i32
    return %c0_i32, %arg1 : i32, i32
  }
  func.func @transform_3(%arg0: i32, %arg1: i32, %arg2: i32) -> (i32, i32) {
    %c0_i32 = arith.constant 0 : i32
    return %arg0, %arg1 : i32, i32
  }
}

module attributes {stable_mosaic.version = 11 : i64} {
  func.func @_linear_kernel(%arg0: i32, %arg1: i32, %arg2: i32, %arg3: memref<10x128xf32, #tpu.memory_space<vmem>>, %arg4: memref<128x32xbf16, #tpu.memory_space<vmem>>, %arg5: memref<1x32xf32, #tpu.memory_space<vmem>>, %arg6: memref<10x32xf32, #tpu.memory_space<vmem>>, %arg7: memref<10x32xf32, #tpu.memory_space<vmem>>) attributes {dimension_semantics = [#tpu.dimension_semantics<parallel>, #tpu.dimension_semantics<parallel>, #tpu.dimension_semantics<arbitrary>], iteration_bounds = array<i64: 1, 1, 1>, scalar_prefetch = 0 : i64, scratch_operands = 1 : i64, tpu.core_type = #tpu.core_type<tc>, window_params = [{transform_indices = @transform_0, window_bounds = array<i64: 10, 128>}, {transform_indices = @transform_1, window_bounds = array<i64: 128, 32>}, {transform_indices = @transform_2, window_bounds = array<i64: 1, 32>}, {transform_indices = @transform_3, window_bounds = array<i64: 10, 32>}]} {
    %c0_i32 = arith.constant 0 : i32
    %0 = arith.cmpi eq, %arg2, %c0_i32 : i32
    %1 = arith.extui %0 : i1 to i32
    %c0_i32_0 = arith.constant 0 : i32
    %2 = arith.cmpi ne, %1, %c0_i32_0 : i32
    scf.if %2 {
      %cst_10 = arith.constant 0.000000e+00 : f32
      %13 = vector.broadcast %cst_10 : f32 to vector<10x32xf32>
      %c0_11 = arith.constant 0 : index
      %c0_12 = arith.constant 0 : index
      %14 = vector.load %arg7[%c0_11, %c0_12] : memref<10x32xf32, #tpu.memory_space<vmem>>, vector<10x32xf32>
      tpu.vector_store %arg7[%c0_11, %c0_12], %13 {strides = array<i32>} : memref<10x32xf32, #tpu.memory_space<vmem>>, vector<10x32xf32>,
    } else {
    }
    %c0 = arith.constant 0 : index
    %c0_1 = arith.constant 0 : index
    %3 = vector.load %arg7[%c0, %c0_1] : memref<10x32xf32, #tpu.memory_space<vmem>>, vector<10x32xf32>
    %c0_2 = arith.constant 0 : index
    %c0_3 = arith.constant 0 : index
    %4 = vector.load %arg3[%c0_2, %c0_3] : memref<10x128xf32, #tpu.memory_space<vmem>>, vector<10x128xf32>
    %5 = arith.truncf %4 : vector<10x128xf32> to vector<10x128xbf16>
    %c0_4 = arith.constant 0 : index
    %c0_5 = arith.constant 0 : index
    %6 = vector.load %arg4[%c0_4, %c0_5] : memref<128x32xbf16, #tpu.memory_space<vmem>>, vector<128x32xbf16>
    %cst = arith.constant dense<0.000000e+00> : vector<10x32xf32>
    %7 = tpu.matmul %5, %6, %cst {dimension_numbers = #tpu.dot_dimension_numbers<[1], [0], [0], [1], [0, 0, 1, 1], [], []>} : vector<10x128xbf16>, vector<128x32xbf16>, vector<10x32xf32> -> vector<10x32xf32>
    %8 = arith.addf %3, %7 : vector<10x32xf32>
    %c0_6 = arith.constant 0 : index
    %c0_7 = arith.constant 0 : index
    %9 = vector.load %arg7[%c0_6, %c0_7] : memref<10x32xf32, #tpu.memory_space<vmem>>, vector<10x32xf32>
    tpu.vector_store %arg7[%c0_6, %c0_7], %8 {strides = array<i32>} : memref<10x32xf32, #tpu.memory_space<vmem>>, vector<10x32xf32>,
    %c0_i32_8 = arith.constant 0 : i32
    %10 = arith.cmpi eq, %arg2, %c0_i32_8 : i32
    %11 = arith.extui %10 : i1 to i32
    %c0_i32_9 = arith.constant 0 : i32
    %12 = arith.cmpi ne, %11, %c0_i32_9 : i32
    scf.if %12 {
      %c0_10 = arith.constant 0 : index
      %c0_11 = arith.constant 0 : index
      %13 = vector.load %arg7[%c0_10, %c0_11] : memref<10x32xf32, #tpu.memory_space<vmem>>, vector<10x32xf32>
      %c0_12 = arith.constant 0 : index
      %c0_13 = arith.constant 0 : index
      %14 = vector.load %arg5[%c0_12, %c0_13] : memref<1x32xf32, #tpu.memory_space<vmem>>, vector<1x32xf32>
      %15 = vector.broadcast %14 : vector<1x32xf32> to vector<10x32xf32>
      %16 = arith.addf %13, %15 : vector<10x32xf32>
      %c0_14 = arith.constant 0 : index
      %c0_15 = arith.constant 0 : index
      %17 = vector.load %arg6[%c0_14, %c0_15] : memref<10x32xf32, #tpu.memory_space<vmem>>, vector<10x32xf32>
      tpu.vector_store %arg6[%c0_14, %c0_15], %16 {strides = array<i32>} : memref<10x32xf32, #tpu.memory_space<vmem>>, vector<10x32xf32>,
    } else {
    }
    return
  }
  func.func @transform_0(%arg0: i32, %arg1: i32, %arg2: i32) -> (i32, i32) {
    %c0_i32 = arith.constant 0 : i32
    return %arg0, %arg2 : i32, i32
  }
  func.func @transform_1(%arg0: i32, %arg1: i32, %arg2: i32) -> (i32, i32) {
    %c0_i32 = arith.constant 0 : i32
    return %arg2, %arg1 : i32, i32
  }
  func.func @transform_2(%arg0: i32, %arg1: i32, %arg2: i32) -> (i32, i32) {
    %c0_i32 = arith.constant 0 : i32
    %c0_i32_0 = arith.constant 0 : i32
    return %c0_i32, %arg1 : i32, i32
  }
  func.func @transform_3(%arg0: i32, %arg1: i32, %arg2: i32) -> (i32, i32) {
    %c0_i32 = arith.constant 0 : i32
    return %arg0, %arg1 : i32, i32
  }
}

module attributes {stable_mosaic.version = 11 : i64} {
  func.func @_layernorm_kernel(%arg0: i32, %arg1: memref<10x32xf32, #tpu.memory_space<vmem>>, %arg2: memref<1x32xf32, #tpu.memory_space<vmem>>, %arg3: memref<1x32xf32, #tpu.memory_space<vmem>>, %arg4: memref<10x32xf32, #tpu.memory_space<vmem>>) attributes {dimension_semantics = [#tpu.dimension_semantics<parallel>], iteration_bounds = array<i64: 1>, scalar_prefetch = 0 : i64, scratch_operands = 0 : i64, tpu.core_type = #tpu.core_type<tc>, window_params = [{transform_indices = @transform_0, window_bounds = array<i64: 10, 32>}, {pipeline_mode = #tpu.pipeline_mode<synchronous>, transform_indices = @transform_1, window_bounds = array<i64: 1, 32>}, {pipeline_mode = #tpu.pipeline_mode<synchronous>, transform_indices = @transform_2, window_bounds = array<i64: 1, 32>}, {transform_indices = @transform_3, window_bounds = array<i64: 10, 32>}]} {
    %c0 = arith.constant 0 : index
    %c0_0 = arith.constant 0 : index
    %0 = vector.load %arg1[%c0, %c0_0] : memref<10x32xf32, #tpu.memory_space<vmem>>, vector<10x32xf32>
    %cst = arith.constant dense<0.000000e+00> : vector<10xf32>
    %1 = vector.multi_reduction <add>, %0, %cst [1] : vector<10x32xf32> to vector<10xf32>
    %2 = vector.shape_cast %1 : vector<10xf32> to vector<10x1xf32>
    %cst_1 = arith.constant 3.200000e+01 : f32
    %3 = vector.broadcast %cst_1 : f32 to vector<10x1xf32>
    %4 = arith.divf %2, %3 : vector<10x1xf32>
    %5 = vector.broadcast %4 : vector<10x1xf32> to vector<10x32xf32>
    %6 = arith.subf %0, %5 : vector<10x32xf32>
    %7 = arith.mulf %6, %6 : vector<10x32xf32>
    %cst_2 = arith.constant dense<0.000000e+00> : vector<10xf32>
    %8 = vector.multi_reduction <add>, %7, %cst_2 [1] : vector<10x32xf32> to vector<10xf32>
    %9 = vector.shape_cast %8 : vector<10xf32> to vector<10x1xf32>
    %cst_3 = arith.constant 3.200000e+01 : f32
    %10 = vector.broadcast %cst_3 : f32 to vector<10x1xf32>
    %11 = arith.divf %9, %10 : vector<10x1xf32>
    %12 = vector.broadcast %4 : vector<10x1xf32> to vector<10x32xf32>
    %13 = arith.subf %0, %12 : vector<10x32xf32>
    %cst_4 = arith.constant 9.99999997E-7 : f32
    %14 = vector.broadcast %cst_4 : f32 to vector<10x1xf32>
    %15 = arith.addf %11, %14 : vector<10x1xf32>
    %16 = math.rsqrt %15 : vector<10x1xf32>
    %17 = vector.broadcast %16 : vector<10x1xf32> to vector<10x32xf32>
    %18 = arith.mulf %13, %17 : vector<10x32xf32>
    %c0_5 = arith.constant 0 : index
    %c0_6 = arith.constant 0 : index
    %19 = vector.load %arg2[%c0_5, %c0_6] : memref<1x32xf32, #tpu.memory_space<vmem>>, vector<1x32xf32>
    %20 = vector.broadcast %19 : vector<1x32xf32> to vector<10x32xf32>
    %21 = arith.mulf %18, %20 : vector<10x32xf32>
    %c0_7 = arith.constant 0 : index
    %c0_8 = arith.constant 0 : index
    %22 = vector.load %arg3[%c0_7, %c0_8] : memref<1x32xf32, #tpu.memory_space<vmem>>, vector<1x32xf32>
    %23 = vector.broadcast %22 : vector<1x32xf32> to vector<10x32xf32>
    %24 = arith.addf %21, %23 : vector<10x32xf32>
    %c0_9 = arith.constant 0 : index
    %c0_10 = arith.constant 0 : index
    %25 = vector.load %arg4[%c0_9, %c0_10] : memref<10x32xf32, #tpu.memory_space<vmem>>, vector<10x32xf32>
    tpu.vector_store %arg4[%c0_9, %c0_10], %24 {strides = array<i32>} : memref<10x32xf32, #tpu.memory_space<vmem>>, vector<10x32xf32>,
    return
  }
  func.func @transform_0(%arg0: i32) -> (i32, i32) {
    %c0_i32 = arith.constant 0 : i32
    %c0_i32_0 = arith.constant 0 : i32
    return %arg0, %c0_i32 : i32, i32
  }
  func.func @transform_1(%arg0: i32) -> (i32, i32) {
    %c0_i32 = arith.constant 0 : i32
    %c0_i32_0 = arith.constant 0 : i32
    %c0_i32_1 = arith.constant 0 : i32
    return %c0_i32, %c0_i32_0 : i32, i32
  }
  func.func @transform_2(%arg0: i32) -> (i32, i32) {
    %c0_i32 = arith.constant 0 : i32
    %c0_i32_0 = arith.constant 0 : i32
    %c0_i32_1 = arith.constant 0 : i32
    return %c0_i32, %c0_i32_0 : i32, i32
  }
  func.func @transform_3(%arg0: i32) -> (i32, i32) {
    %c0_i32 = arith.constant 0 : i32
    %c0_i32_0 = arith.constant 0 : i32
    return %arg0, %c0_i32 : i32, i32
  }
}

module attributes {stable_mosaic.version = 11 : i64} {
  func.func @_ln_linear_kernel(%arg0: i32, %arg1: i32, %arg2: memref<10x32xf32, #tpu.memory_space<vmem>>, %arg3: memref<1x32xf32, #tpu.memory_space<vmem>>, %arg4: memref<1x32xf32, #tpu.memory_space<vmem>>, %arg5: memref<32x128xbf16, #tpu.memory_space<vmem>>, %arg6: memref<1x128xf32, #tpu.memory_space<vmem>>, %arg7: memref<10x128xf32, #tpu.memory_space<vmem>>) attributes {dimension_semantics = [#tpu.dimension_semantics<parallel>, #tpu.dimension_semantics<parallel>], iteration_bounds = array<i64: 1, 1>, scalar_prefetch = 0 : i64, scratch_operands = 0 : i64, tpu.core_type = #tpu.core_type<tc>, window_params = [{transform_indices = @transform_0, window_bounds = array<i64: 10, 32>}, {pipeline_mode = #tpu.pipeline_mode<synchronous>, transform_indices = @transform_1, window_bounds = array<i64: 1, 32>}, {pipeline_mode = #tpu.pipeline_mode<synchronous>, transform_indices = @transform_2, window_bounds = array<i64: 1, 32>}, {transform_indices = @transform_3, window_bounds = array<i64: 32, 128>}, {transform_indices = @transform_4, window_bounds = array<i64: 1, 128>}, {transform_indices = @transform_5, window_bounds = array<i64: 10, 128>}]} {
    %c0 = arith.constant 0 : index
    %c0_0 = arith.constant 0 : index
    %0 = vector.load %arg2[%c0, %c0_0] : memref<10x32xf32, #tpu.memory_space<vmem>>, vector<10x32xf32>
    %cst = arith.constant dense<0.000000e+00> : vector<10xf32>
    %1 = vector.multi_reduction <add>, %0, %cst [1] : vector<10x32xf32> to vector<10xf32>
    %2 = vector.shape_cast %1 : vector<10xf32> to vector<10x1xf32>
    %cst_1 = arith.constant 3.200000e+01 : f32
    %3 = vector.broadcast %cst_1 : f32 to vector<10x1xf32>
    %4 = arith.divf %2, %3 : vector<10x1xf32>
    %5 = vector.broadcast %4 : vector<10x1xf32> to vector<10x32xf32>
    %6 = arith.subf %0, %5 : vector<10x32xf32>
    %7 = arith.mulf %6, %6 : vector<10x32xf32>
    %cst_2 = arith.constant dense<0.000000e+00> : vector<10xf32>
    %8 = vector.multi_reduction <add>, %7, %cst_2 [1] : vector<10x32xf32> to vector<10xf32>
    %9 = vector.shape_cast %8 : vector<10xf32> to vector<10x1xf32>
    %cst_3 = arith.constant 3.200000e+01 : f32
    %10 = vector.broadcast %cst_3 : f32 to vector<10x1xf32>
    %11 = arith.divf %9, %10 : vector<10x1xf32>
    %12 = vector.broadcast %4 : vector<10x1xf32> to vector<10x32xf32>
    %13 = arith.subf %0, %12 : vector<10x32xf32>
    %cst_4 = arith.constant 9.99999997E-7 : f32
    %14 = vector.broadcast %cst_4 : f32 to vector<10x1xf32>
    %15 = arith.addf %11, %14 : vector<10x1xf32>
    %16 = math.rsqrt %15 : vector<10x1xf32>
    %17 = vector.broadcast %16 : vector<10x1xf32> to vector<10x32xf32>
    %18 = arith.mulf %13, %17 : vector<10x32xf32>
    %c0_5 = arith.constant 0 : index
    %c0_6 = arith.constant 0 : index
    %19 = vector.load %arg3[%c0_5, %c0_6] : memref<1x32xf32, #tpu.memory_space<vmem>>, vector<1x32xf32>
    %20 = vector.broadcast %19 : vector<1x32xf32> to vector<10x32xf32>
    %21 = arith.mulf %18, %20 : vector<10x32xf32>
    %c0_7 = arith.constant 0 : index
    %c0_8 = arith.constant 0 : index
    %22 = vector.load %arg4[%c0_7, %c0_8] : memref<1x32xf32, #tpu.memory_space<vmem>>, vector<1x32xf32>
    %23 = vector.broadcast %22 : vector<1x32xf32> to vector<10x32xf32>
    %24 = arith.addf %21, %23 : vector<10x32xf32>
    %25 = arith.truncf %24 : vector<10x32xf32> to vector<10x32xbf16>
    %c0_9 = arith.constant 0 : index
    %c0_10 = arith.constant 0 : index
    %26 = vector.load %arg5[%c0_9, %c0_10] : memref<32x128xbf16, #tpu.memory_space<vmem>>, vector<32x128xbf16>
    %cst_11 = arith.constant dense<0.000000e+00> : vector<10x128xf32>
    %27 = tpu.matmul %25, %26, %cst_11 {dimension_numbers = #tpu.dot_dimension_numbers<[1], [0], [0], [1], [0, 0, 1, 1], [], []>} : vector<10x32xbf16>, vector<32x128xbf16>, vector<10x128xf32> -> vector<10x128xf32>
    %c0_12 = arith.constant 0 : index
    %c0_13 = arith.constant 0 : index
    %28 = vector.load %arg6[%c0_12, %c0_13] : memref<1x128xf32, #tpu.memory_space<vmem>>, vector<1x128xf32>
    %29 = vector.broadcast %28 : vector<1x128xf32> to vector<10x128xf32>
    %30 = arith.addf %27, %29 : vector<10x128xf32>
    %31 = arith.mulf %30, %30 : vector<10x128xf32>
    %32 = arith.mulf %30, %31 : vector<10x128xf32>
    %cst_14 = arith.constant 4.471500e-02 : f32
    %33 = vector.broadcast %cst_14 : f32 to vector<10x128xf32>
    %34 = arith.mulf %33, %32 : vector<10x128xf32>
    %35 = arith.addf %30, %34 : vector<10x128xf32>
    %cst_15 = arith.constant 0.797884583 : f32
    %36 = vector.broadcast %cst_15 : f32 to vector<10x128xf32>
    %37 = arith.mulf %36, %35 : vector<10x128xf32>
    %38 = math.tanh %37 : vector<10x128xf32>
    %cst_16 = arith.constant 1.000000e+00 : f32
    %39 = vector.broadcast %cst_16 : f32 to vector<10x128xf32>
    %40 = arith.addf %39, %38 : vector<10x128xf32>
    %cst_17 = arith.constant 5.000000e-01 : f32
    %41 = vector.broadcast %cst_17 : f32 to vector<10x128xf32>
    %42 = arith.mulf %41, %40 : vector<10x128xf32>
    %43 = arith.mulf %30, %42 : vector<10x128xf32>
    %c0_18 = arith.constant 0 : index
    %c0_19 = arith.constant 0 : index
    %44 = vector.load %arg7[%c0_18, %c0_19] : memref<10x128xf32, #tpu.memory_space<vmem>>, vector<10x128xf32>
    tpu.vector_store %arg7[%c0_18, %c0_19], %43 {strides = array<i32>} : memref<10x128xf32, #tpu.memory_space<vmem>>, vector<10x128xf32>,
    return
  }
  func.func @transform_0(%arg0: i32, %arg1: i32) -> (i32, i32) {
    %c0_i32 = arith.constant 0 : i32
    %c0_i32_0 = arith.constant 0 : i32
    return %arg0, %c0_i32 : i32, i32
  }
  func.func @transform_1(%arg0: i32, %arg1: i32) -> (i32, i32) {
    %c0_i32 = arith.constant 0 : i32
    %c0_i32_0 = arith.constant 0 : i32
    %c0_i32_1 = arith.constant 0 : i32
    return %c0_i32, %c0_i32_0 : i32, i32
  }
  func.func @transform_2(%arg0: i32, %arg1: i32) -> (i32, i32) {
    %c0_i32 = arith.constant 0 : i32
    %c0_i32_0 = arith.constant 0 : i32
    %c0_i32_1 = arith.constant 0 : i32
    return %c0_i32, %c0_i32_0 : i32, i32
  }
  func.func @transform_3(%arg0: i32, %arg1: i32) -> (i32, i32) {
    %c0_i32 = arith.constant 0 : i32
    %c0_i32_0 = arith.constant 0 : i32
    return %c0_i32, %arg1 : i32, i32
  }
  func.func @transform_4(%arg0: i32, %arg1: i32) -> (i32, i32) {
    %c0_i32 = arith.constant 0 : i32
    %c0_i32_0 = arith.constant 0 : i32
    return %c0_i32, %arg1 : i32, i32
  }
  func.func @transform_5(%arg0: i32, %arg1: i32) -> (i32, i32) {
    %c0_i32 = arith.constant 0 : i32
    return %arg0, %arg1 : i32, i32
  }
}

module attributes {stable_mosaic.version = 11 : i64} {
  func.func @_linear_kernel(%arg0: i32, %arg1: i32, %arg2: i32, %arg3: memref<8x32xf32, #tpu.memory_space<vmem>>, %arg4: memref<32x64xbf16, #tpu.memory_space<vmem>>, %arg5: memref<1x64xf32, #tpu.memory_space<vmem>>, %arg6: memref<8x64xf32, #tpu.memory_space<vmem>>, %arg7: memref<8x64xf32, #tpu.memory_space<vmem>>) attributes {dimension_semantics = [#tpu.dimension_semantics<parallel>, #tpu.dimension_semantics<parallel>, #tpu.dimension_semantics<arbitrary>], iteration_bounds = array<i64: 1, 1, 1>, scalar_prefetch = 0 : i64, scratch_operands = 1 : i64, tpu.core_type = #tpu.core_type<tc>, window_params = [{transform_indices = @transform_0, window_bounds = array<i64: 8, 32>}, {transform_indices = @transform_1, window_bounds = array<i64: 32, 64>}, {transform_indices = @transform_2, window_bounds = array<i64: 1, 64>}, {transform_indices = @transform_3, window_bounds = array<i64: 8, 64>}]} {
    %c0_i32 = arith.constant 0 : i32
    %0 = arith.cmpi eq, %arg2, %c0_i32 : i32
    %1 = arith.extui %0 : i1 to i32
    %c0_i32_0 = arith.constant 0 : i32
    %2 = arith.cmpi ne, %1, %c0_i32_0 : i32
    scf.if %2 {
      %cst_10 = arith.constant 0.000000e+00 : f32
      %13 = vector.broadcast %cst_10 : f32 to vector<8x64xf32>
      %c0_11 = arith.constant 0 : index
      %c0_12 = arith.constant 0 : index
      %14 = vector.load %arg7[%c0_11, %c0_12] : memref<8x64xf32, #tpu.memory_space<vmem>>, vector<8x64xf32>
      tpu.vector_store %arg7[%c0_11, %c0_12], %13 {strides = array<i32>} : memref<8x64xf32, #tpu.memory_space<vmem>>, vector<8x64xf32>,
    } else {
    }
    %c0 = arith.constant 0 : index
    %c0_1 = arith.constant 0 : index
    %3 = vector.load %arg7[%c0, %c0_1] : memref<8x64xf32, #tpu.memory_space<vmem>>, vector<8x64xf32>
    %c0_2 = arith.constant 0 : index
    %c0_3 = arith.constant 0 : index
    %4 = vector.load %arg3[%c0_2, %c0_3] : memref<8x32xf32, #tpu.memory_space<vmem>>, vector<8x32xf32>
    %5 = arith.truncf %4 : vector<8x32xf32> to vector<8x32xbf16>
    %c0_4 = arith.constant 0 : index
    %c0_5 = arith.constant 0 : index
    %6 = vector.load %arg4[%c0_4, %c0_5] : memref<32x64xbf16, #tpu.memory_space<vmem>>, vector<32x64xbf16>
    %cst = arith.constant dense<0.000000e+00> : vector<8x64xf32>
    %7 = tpu.matmul %5, %6, %cst {dimension_numbers = #tpu.dot_dimension_numbers<[1], [0], [0], [1], [0, 0, 1, 1], [], []>} : vector<8x32xbf16>, vector<32x64xbf16>, vector<8x64xf32> -> vector<8x64xf32>
    %8 = arith.addf %3, %7 : vector<8x64xf32>
    %c0_6 = arith.constant 0 : index
    %c0_7 = arith.constant 0 : index
    %9 = vector.load %arg7[%c0_6, %c0_7] : memref<8x64xf32, #tpu.memory_space<vmem>>, vector<8x64xf32>
    tpu.vector_store %arg7[%c0_6, %c0_7], %8 {strides = array<i32>} : memref<8x64xf32, #tpu.memory_space<vmem>>, vector<8x64xf32>,
    %c0_i32_8 = arith.constant 0 : i32
    %10 = arith.cmpi eq, %arg2, %c0_i32_8 : i32
    %11 = arith.extui %10 : i1 to i32
    %c0_i32_9 = arith.constant 0 : i32
    %12 = arith.cmpi ne, %11, %c0_i32_9 : i32
    scf.if %12 {
      %c0_10 = arith.constant 0 : index
      %c0_11 = arith.constant 0 : index
      %13 = vector.load %arg7[%c0_10, %c0_11] : memref<8x64xf32, #tpu.memory_space<vmem>>, vector<8x64xf32>
      %c0_12 = arith.constant 0 : index
      %c0_13 = arith.constant 0 : index
      %14 = vector.load %arg5[%c0_12, %c0_13] : memref<1x64xf32, #tpu.memory_space<vmem>>, vector<1x64xf32>
      %15 = vector.broadcast %14 : vector<1x64xf32> to vector<8x64xf32>
      %16 = arith.addf %13, %15 : vector<8x64xf32>
      %c0_14 = arith.constant 0 : index
      %c0_15 = arith.constant 0 : index
      %17 = vector.load %arg6[%c0_14, %c0_15] : memref<8x64xf32, #tpu.memory_space<vmem>>, vector<8x64xf32>
      tpu.vector_store %arg6[%c0_14, %c0_15], %16 {strides = array<i32>} : memref<8x64xf32, #tpu.memory_space<vmem>>, vector<8x64xf32>,
    } else {
    }
    return
  }
  func.func @transform_0(%arg0: i32, %arg1: i32, %arg2: i32) -> (i32, i32) {
    %c0_i32 = arith.constant 0 : i32
    return %arg0, %arg2 : i32, i32
  }
  func.func @transform_1(%arg0: i32, %arg1: i32, %arg2: i32) -> (i32, i32) {
    %c0_i32 = arith.constant 0 : i32
    return %arg2, %arg1 : i32, i32
  }
  func.func @transform_2(%arg0: i32, %arg1: i32, %arg2: i32) -> (i32, i32) {
    %c0_i32 = arith.constant 0 : i32
    %c0_i32_0 = arith.constant 0 : i32
    return %c0_i32, %arg1 : i32, i32
  }
  func.func @transform_3(%arg0: i32, %arg1: i32, %arg2: i32) -> (i32, i32) {
    %c0_i32 = arith.constant 0 : i32
    return %arg0, %arg1 : i32, i32
  }
}

module attributes {stable_mosaic.version = 11 : i64} {
  func.func @_layernorm_kernel(%arg0: i32, %arg1: memref<16x32xf32, #tpu.memory_space<vmem>>, %arg2: memref<1x32xf32, #tpu.memory_space<vmem>>, %arg3: memref<1x32xf32, #tpu.memory_space<vmem>>, %arg4: memref<16x32xf32, #tpu.memory_space<vmem>>) attributes {dimension_semantics = [#tpu.dimension_semantics<parallel>], iteration_bounds = array<i64: 1>, scalar_prefetch = 0 : i64, scratch_operands = 0 : i64, tpu.core_type = #tpu.core_type<tc>, window_params = [{transform_indices = @transform_0, window_bounds = array<i64: 16, 32>}, {pipeline_mode = #tpu.pipeline_mode<synchronous>, transform_indices = @transform_1, window_bounds = array<i64: 1, 32>}, {pipeline_mode = #tpu.pipeline_mode<synchronous>, transform_indices = @transform_2, window_bounds = array<i64: 1, 32>}, {transform_indices = @transform_3, window_bounds = array<i64: 16, 32>}]} {
    %c0 = arith.constant 0 : index
    %c0_0 = arith.constant 0 : index
    %0 = vector.load %arg1[%c0, %c0_0] : memref<16x32xf32, #tpu.memory_space<vmem>>, vector<16x32xf32>
    %cst = arith.constant dense<0.000000e+00> : vector<16xf32>
    %1 = vector.multi_reduction <add>, %0, %cst [1] : vector<16x32xf32> to vector<16xf32>
    %2 = vector.shape_cast %1 : vector<16xf32> to vector<16x1xf32>
    %cst_1 = arith.constant 3.200000e+01 : f32
    %3 = vector.broadcast %cst_1 : f32 to vector<16x1xf32>
    %4 = arith.divf %2, %3 : vector<16x1xf32>
    %5 = vector.broadcast %4 : vector<16x1xf32> to vector<16x32xf32>
    %6 = arith.subf %0, %5 : vector<16x32xf32>
    %7 = arith.mulf %6, %6 : vector<16x32xf32>
    %cst_2 = arith.constant dense<0.000000e+00> : vector<16xf32>
    %8 = vector.multi_reduction <add>, %7, %cst_2 [1] : vector<16x32xf32> to vector<16xf32>
    %9 = vector.shape_cast %8 : vector<16xf32> to vector<16x1xf32>
    %cst_3 = arith.constant 3.200000e+01 : f32
    %10 = vector.broadcast %cst_3 : f32 to vector<16x1xf32>
    %11 = arith.divf %9, %10 : vector<16x1xf32>
    %12 = vector.broadcast %4 : vector<16x1xf32> to vector<16x32xf32>
    %13 = arith.subf %0, %12 : vector<16x32xf32>
    %cst_4 = arith.constant 9.99999996E-13 : f32
    %14 = vector.broadcast %cst_4 : f32 to vector<16x1xf32>
    %15 = arith.addf %11, %14 : vector<16x1xf32>
    %16 = math.rsqrt %15 : vector<16x1xf32>
    %17 = vector.broadcast %16 : vector<16x1xf32> to vector<16x32xf32>
    %18 = arith.mulf %13, %17 : vector<16x32xf32>
    %c0_5 = arith.constant 0 : index
    %c0_6 = arith.constant 0 : index
    %19 = vector.load %arg2[%c0_5, %c0_6] : memref<1x32xf32, #tpu.memory_space<vmem>>, vector<1x32xf32>
    %20 = vector.broadcast %19 : vector<1x32xf32> to vector<16x32xf32>
    %21 = arith.mulf %18, %20 : vector<16x32xf32>
    %c0_7 = arith.constant 0 : index
    %c0_8 = arith.constant 0 : index
    %22 = vector.load %arg3[%c0_7, %c0_8] : memref<1x32xf32, #tpu.memory_space<vmem>>, vector<1x32xf32>
    %23 = vector.broadcast %22 : vector<1x32xf32> to vector<16x32xf32>
    %24 = arith.addf %21, %23 : vector<16x32xf32>
    %c0_9 = arith.constant 0 : index
    %c0_10 = arith.constant 0 : index
    %25 = vector.load %arg4[%c0_9, %c0_10] : memref<16x32xf32, #tpu.memory_space<vmem>>, vector<16x32xf32>
    tpu.vector_store %arg4[%c0_9, %c0_10], %24 {strides = array<i32>} : memref<16x32xf32, #tpu.memory_space<vmem>>, vector<16x32xf32>,
    return
  }
  func.func @transform_0(%arg0: i32) -> (i32, i32) {
    %c0_i32 = arith.constant 0 : i32
    %c0_i32_0 = arith.constant 0 : i32
    return %arg0, %c0_i32 : i32, i32
  }
  func.func @transform_1(%arg0: i32) -> (i32, i32) {
    %c0_i32 = arith.constant 0 : i32
    %c0_i32_0 = arith.constant 0 : i32
    %c0_i32_1 = arith.constant 0 : i32
    return %c0_i32, %c0_i32_0 : i32, i32
  }
  func.func @transform_2(%arg0: i32) -> (i32, i32) {
    %c0_i32 = arith.constant 0 : i32
    %c0_i32_0 = arith.constant 0 : i32
    %c0_i32_1 = arith.constant 0 : i32
    return %c0_i32, %c0_i32_0 : i32, i32
  }
  func.func @transform_3(%arg0: i32) -> (i32, i32) {
    %c0_i32 = arith.constant 0 : i32
    %c0_i32_0 = arith.constant 0 : i32
    return %arg0, %c0_i32 : i32, i32
  }
}

module attributes {stable_mosaic.version = 11 : i64} {
  func.func @_linear_kernel(%arg0: i32, %arg1: i32, %arg2: i32, %arg3: memref<16x32xf32, #tpu.memory_space<vmem>>, %arg4: memref<32x96xbf16, #tpu.memory_space<vmem>>, %arg5: memref<1x96xf32, #tpu.memory_space<vmem>>, %arg6: memref<16x96xf32, #tpu.memory_space<vmem>>, %arg7: memref<16x96xf32, #tpu.memory_space<vmem>>) attributes {dimension_semantics = [#tpu.dimension_semantics<parallel>, #tpu.dimension_semantics<parallel>, #tpu.dimension_semantics<arbitrary>], iteration_bounds = array<i64: 1, 1, 1>, scalar_prefetch = 0 : i64, scratch_operands = 1 : i64, tpu.core_type = #tpu.core_type<tc>, window_params = [{transform_indices = @transform_0, window_bounds = array<i64: 16, 32>}, {transform_indices = @transform_1, window_bounds = array<i64: 32, 96>}, {transform_indices = @transform_2, window_bounds = array<i64: 1, 96>}, {transform_indices = @transform_3, window_bounds = array<i64: 16, 96>}]} {
    %c0_i32 = arith.constant 0 : i32
    %0 = arith.cmpi eq, %arg2, %c0_i32 : i32
    %1 = arith.extui %0 : i1 to i32
    %c0_i32_0 = arith.constant 0 : i32
    %2 = arith.cmpi ne, %1, %c0_i32_0 : i32
    scf.if %2 {
      %cst_10 = arith.constant 0.000000e+00 : f32
      %13 = vector.broadcast %cst_10 : f32 to vector<16x96xf32>
      %c0_11 = arith.constant 0 : index
      %c0_12 = arith.constant 0 : index
      %14 = vector.load %arg7[%c0_11, %c0_12] : memref<16x96xf32, #tpu.memory_space<vmem>>, vector<16x96xf32>
      tpu.vector_store %arg7[%c0_11, %c0_12], %13 {strides = array<i32>} : memref<16x96xf32, #tpu.memory_space<vmem>>, vector<16x96xf32>,
    } else {
    }
    %c0 = arith.constant 0 : index
    %c0_1 = arith.constant 0 : index
    %3 = vector.load %arg7[%c0, %c0_1] : memref<16x96xf32, #tpu.memory_space<vmem>>, vector<16x96xf32>
    %c0_2 = arith.constant 0 : index
    %c0_3 = arith.constant 0 : index
    %4 = vector.load %arg3[%c0_2, %c0_3] : memref<16x32xf32, #tpu.memory_space<vmem>>, vector<16x32xf32>
    %5 = arith.truncf %4 : vector<16x32xf32> to vector<16x32xbf16>
    %c0_4 = arith.constant 0 : index
    %c0_5 = arith.constant 0 : index
    %6 = vector.load %arg4[%c0_4, %c0_5] : memref<32x96xbf16, #tpu.memory_space<vmem>>, vector<32x96xbf16>
    %cst = arith.constant dense<0.000000e+00> : vector<16x96xf32>
    %7 = tpu.matmul %5, %6, %cst {dimension_numbers = #tpu.dot_dimension_numbers<[1], [0], [0], [1], [0, 0, 1, 1], [], []>} : vector<16x32xbf16>, vector<32x96xbf16>, vector<16x96xf32> -> vector<16x96xf32>
    %8 = arith.addf %3, %7 : vector<16x96xf32>
    %c0_6 = arith.constant 0 : index
    %c0_7 = arith.constant 0 : index
    %9 = vector.load %arg7[%c0_6, %c0_7] : memref<16x96xf32, #tpu.memory_space<vmem>>, vector<16x96xf32>
    tpu.vector_store %arg7[%c0_6, %c0_7], %8 {strides = array<i32>} : memref<16x96xf32, #tpu.memory_space<vmem>>, vector<16x96xf32>,
    %c0_i32_8 = arith.constant 0 : i32
    %10 = arith.cmpi eq, %arg2, %c0_i32_8 : i32
    %11 = arith.extui %10 : i1 to i32
    %c0_i32_9 = arith.constant 0 : i32
    %12 = arith.cmpi ne, %11, %c0_i32_9 : i32
    scf.if %12 {
      %c0_10 = arith.constant 0 : index
      %c0_11 = arith.constant 0 : index
      %13 = vector.load %arg7[%c0_10, %c0_11] : memref<16x96xf32, #tpu.memory_space<vmem>>, vector<16x96xf32>
      %c0_12 = arith.constant 0 : index
      %c0_13 = arith.constant 0 : index
      %14 = vector.load %arg5[%c0_12, %c0_13] : memref<1x96xf32, #tpu.memory_space<vmem>>, vector<1x96xf32>
      %15 = vector.broadcast %14 : vector<1x96xf32> to vector<16x96xf32>
      %16 = arith.addf %13, %15 : vector<16x96xf32>
      %c0_14 = arith.constant 0 : index
      %c0_15 = arith.constant 0 : index
      %17 = vector.load %arg6[%c0_14, %c0_15] : memref<16x96xf32, #tpu.memory_space<vmem>>, vector<16x96xf32>
      tpu.vector_store %arg6[%c0_14, %c0_15], %16 {strides = array<i32>} : memref<16x96xf32, #tpu.memory_space<vmem>>, vector<16x96xf32>,
    } else {
    }
    return
  }
  func.func @transform_0(%arg0: i32, %arg1: i32, %arg2: i32) -> (i32, i32) {
    %c0_i32 = arith.constant 0 : i32
    return %arg0, %arg2 : i32, i32
  }
  func.func @transform_1(%arg0: i32, %arg1: i32, %arg2: i32) -> (i32, i32) {
    %c0_i32 = arith.constant 0 : i32
    return %arg2, %arg1 : i32, i32
  }
  func.func @transform_2(%arg0: i32, %arg1: i32, %arg2: i32) -> (i32, i32) {
    %c0_i32 = arith.constant 0 : i32
    %c0_i32_0 = arith.constant 0 : i32
    return %c0_i32, %arg1 : i32, i32
  }
  func.func @transform_3(%arg0: i32, %arg1: i32, %arg2: i32) -> (i32, i32) {
    %c0_i32 = arith.constant 0 : i32
    return %arg0, %arg1 : i32, i32
  }
}

module attributes {stable_mosaic.version = 11 : i64} {
  func.func @_linear_kernel(%arg0: i32, %arg1: i32, %arg2: i32, %arg3: memref<16x32xf32, #tpu.memory_space<vmem>>, %arg4: memref<32x32xbf16, #tpu.memory_space<vmem>>, %arg5: memref<1x32xf32, #tpu.memory_space<vmem>>, %arg6: memref<16x32xf32, #tpu.memory_space<vmem>>, %arg7: memref<16x32xf32, #tpu.memory_space<vmem>>) attributes {dimension_semantics = [#tpu.dimension_semantics<parallel>, #tpu.dimension_semantics<parallel>, #tpu.dimension_semantics<arbitrary>], iteration_bounds = array<i64: 1, 1, 1>, scalar_prefetch = 0 : i64, scratch_operands = 1 : i64, tpu.core_type = #tpu.core_type<tc>, window_params = [{transform_indices = @transform_0, window_bounds = array<i64: 16, 32>}, {transform_indices = @transform_1, window_bounds = array<i64: 32, 32>}, {transform_indices = @transform_2, window_bounds = array<i64: 1, 32>}, {transform_indices = @transform_3, window_bounds = array<i64: 16, 32>}]} {
    %c0_i32 = arith.constant 0 : i32
    %0 = arith.cmpi eq, %arg2, %c0_i32 : i32
    %1 = arith.extui %0 : i1 to i32
    %c0_i32_0 = arith.constant 0 : i32
    %2 = arith.cmpi ne, %1, %c0_i32_0 : i32
    scf.if %2 {
      %cst_10 = arith.constant 0.000000e+00 : f32
      %13 = vector.broadcast %cst_10 : f32 to vector<16x32xf32>
      %c0_11 = arith.constant 0 : index
      %c0_12 = arith.constant 0 : index
      %14 = vector.load %arg7[%c0_11, %c0_12] : memref<16x32xf32, #tpu.memory_space<vmem>>, vector<16x32xf32>
      tpu.vector_store %arg7[%c0_11, %c0_12], %13 {strides = array<i32>} : memref<16x32xf32, #tpu.memory_space<vmem>>, vector<16x32xf32>,
    } else {
    }
    %c0 = arith.constant 0 : index
    %c0_1 = arith.constant 0 : index
    %3 = vector.load %arg7[%c0, %c0_1] : memref<16x32xf32, #tpu.memory_space<vmem>>, vector<16x32xf32>
    %c0_2 = arith.constant 0 : index
    %c0_3 = arith.constant 0 : index
    %4 = vector.load %arg3[%c0_2, %c0_3] : memref<16x32xf32, #tpu.memory_space<vmem>>, vector<16x32xf32>
    %5 = arith.truncf %4 : vector<16x32xf32> to vector<16x32xbf16>
    %c0_4 = arith.constant 0 : index
    %c0_5 = arith.constant 0 : index
    %6 = vector.load %arg4[%c0_4, %c0_5] : memref<32x32xbf16, #tpu.memory_space<vmem>>, vector<32x32xbf16>
    %cst = arith.constant dense<0.000000e+00> : vector<16x32xf32>
    %7 = tpu.matmul %5, %6, %cst {dimension_numbers = #tpu.dot_dimension_numbers<[1], [0], [0], [1], [0, 0, 1, 1], [], []>} : vector<16x32xbf16>, vector<32x32xbf16>, vector<16x32xf32> -> vector<16x32xf32>
    %8 = arith.addf %3, %7 : vector<16x32xf32>
    %c0_6 = arith.constant 0 : index
    %c0_7 = arith.constant 0 : index
    %9 = vector.load %arg7[%c0_6, %c0_7] : memref<16x32xf32, #tpu.memory_space<vmem>>, vector<16x32xf32>
    tpu.vector_store %arg7[%c0_6, %c0_7], %8 {strides = array<i32>} : memref<16x32xf32, #tpu.memory_space<vmem>>, vector<16x32xf32>,
    %c0_i32_8 = arith.constant 0 : i32
    %10 = arith.cmpi eq, %arg2, %c0_i32_8 : i32
    %11 = arith.extui %10 : i1 to i32
    %c0_i32_9 = arith.constant 0 : i32
    %12 = arith.cmpi ne, %11, %c0_i32_9 : i32
    scf.if %12 {
      %c0_10 = arith.constant 0 : index
      %c0_11 = arith.constant 0 : index
      %13 = vector.load %arg7[%c0_10, %c0_11] : memref<16x32xf32, #tpu.memory_space<vmem>>, vector<16x32xf32>
      %c0_12 = arith.constant 0 : index
      %c0_13 = arith.constant 0 : index
      %14 = vector.load %arg5[%c0_12, %c0_13] : memref<1x32xf32, #tpu.memory_space<vmem>>, vector<1x32xf32>
      %15 = vector.broadcast %14 : vector<1x32xf32> to vector<16x32xf32>
      %16 = arith.addf %13, %15 : vector<16x32xf32>
      %c0_14 = arith.constant 0 : index
      %c0_15 = arith.constant 0 : index
      %17 = vector.load %arg6[%c0_14, %c0_15] : memref<16x32xf32, #tpu.memory_space<vmem>>, vector<16x32xf32>
      tpu.vector_store %arg6[%c0_14, %c0_15], %16 {strides = array<i32>} : memref<16x32xf32, #tpu.memory_space<vmem>>, vector<16x32xf32>,
    } else {
    }
    return
  }
  func.func @transform_0(%arg0: i32, %arg1: i32, %arg2: i32) -> (i32, i32) {
    %c0_i32 = arith.constant 0 : i32
    return %arg0, %arg2 : i32, i32
  }
  func.func @transform_1(%arg0: i32, %arg1: i32, %arg2: i32) -> (i32, i32) {
    %c0_i32 = arith.constant 0 : i32
    return %arg2, %arg1 : i32, i32
  }
  func.func @transform_2(%arg0: i32, %arg1: i32, %arg2: i32) -> (i32, i32) {
    %c0_i32 = arith.constant 0 : i32
    %c0_i32_0 = arith.constant 0 : i32
    return %c0_i32, %arg1 : i32, i32
  }
  func.func @transform_3(%arg0: i32, %arg1: i32, %arg2: i32) -> (i32, i32) {
    %c0_i32 = arith.constant 0 : i32
    return %arg0, %arg1 : i32, i32
  }
}

module attributes {stable_mosaic.version = 11 : i64} {
  func.func @_mha_kernel(%arg0: i32, %arg1: memref<1x8x32xf32, #tpu.memory_space<vmem>>, %arg2: memref<1x8x32xf32, #tpu.memory_space<vmem>>, %arg3: memref<1x8x32xf32, #tpu.memory_space<vmem>>, %arg4: memref<1x8x32xf32, #tpu.memory_space<vmem>>) attributes {dimension_semantics = [#tpu.dimension_semantics<parallel>], iteration_bounds = array<i64: 2>, scalar_prefetch = 0 : i64, scratch_operands = 0 : i64, tpu.core_type = #tpu.core_type<tc>, window_params = [{transform_indices = @transform_0, window_bounds = array<i64: 1, 8, 32>}, {transform_indices = @transform_1, window_bounds = array<i64: 1, 8, 32>}, {transform_indices = @transform_2, window_bounds = array<i64: 1, 8, 32>}, {transform_indices = @transform_3, window_bounds = array<i64: 1, 8, 32>}]} {
    %c0 = arith.constant 0 : index
    %c0_0 = arith.constant 0 : index
    %c0_1 = arith.constant 0 : index
    %0 = vector.load %arg1[%c0, %c0_0, %c0_1] : memref<1x8x32xf32, #tpu.memory_space<vmem>>, vector<1x8x32xf32>
    %1 = vector.shape_cast %0 : vector<1x8x32xf32> to vector<8x32xf32>
    %c0_2 = arith.constant 0 : index
    %c0_3 = arith.constant 0 : index
    %c0_4 = arith.constant 0 : index
    %2 = vector.load %arg2[%c0_2, %c0_3, %c0_4] : memref<1x8x32xf32, #tpu.memory_space<vmem>>, vector<1x8x32xf32>
    %3 = vector.shape_cast %2 : vector<1x8x32xf32> to vector<8x32xf32>
    %c0_5 = arith.constant 0 : index
    %c0_6 = arith.constant 0 : index
    %c0_7 = arith.constant 0 : index
    %4 = vector.load %arg3[%c0_5, %c0_6, %c0_7] : memref<1x8x32xf32, #tpu.memory_space<vmem>>, vector<1x8x32xf32>
    %5 = vector.shape_cast %4 : vector<1x8x32xf32> to vector<8x32xf32>
    %6 = vector.extract_strided_slice %1 {offsets = [0, 0], sizes = [8, 16], strides = [1, 1]} : vector<8x32xf32> to vector<8x16xf32>
    %7 = arith.truncf %6 : vector<8x16xf32> to vector<8x16xbf16>
    %8 = vector.extract_strided_slice %3 {offsets = [0, 0], sizes = [8, 16], strides = [1, 1]} : vector<8x32xf32> to vector<8x16xf32>
    %9 = arith.truncf %8 : vector<8x16xf32> to vector<8x16xbf16>
    %10 = vector.extract_strided_slice %5 {offsets = [0, 0], sizes = [8, 16], strides = [1, 1]} : vector<8x32xf32> to vector<8x16xf32>
    %11 = arith.truncf %10 : vector<8x16xf32> to vector<8x16xbf16>
    %cst = arith.constant dense<0.000000e+00> : vector<8x8xf32>
    %12 = tpu.matmul %7, %9, %cst {dimension_numbers = #tpu.dot_dimension_numbers<[1], [1], [0], [0], [0, 0, 1, 0], [], []>} : vector<8x16xbf16>, vector<8x16xbf16>, vector<8x8xf32> -> vector<8x8xf32>
    %cst_8 = arith.constant 2.500000e-01 : f32
    %13 = vector.broadcast %cst_8 : f32 to vector<8x8xf32>
    %14 = arith.mulf %12, %13 : vector<8x8xf32>
    %cst_9 = arith.constant dense<0xFF800000> : vector<8xf32>
    %15 = vector.multi_reduction <maximumf>, %14, %cst_9 [1] : vector<8x8xf32> to vector<8xf32>
    %16 = vector.shape_cast %15 : vector<8xf32> to vector<8x1xf32>
    %17 = vector.broadcast %16 : vector<8x1xf32> to vector<8x8xf32>
    %18 = arith.subf %14, %17 : vector<8x8xf32>
    %19 = math.exp %18 : vector<8x8xf32>
    %cst_10 = arith.constant dense<0.000000e+00> : vector<8xf32>
    %20 = vector.multi_reduction <add>, %19, %cst_10 [1] : vector<8x8xf32> to vector<8xf32>
    %21 = vector.shape_cast %20 : vector<8xf32> to vector<8x1xf32>
    %22 = tpu.reciprocal %21 {approx = true} : vector<8x1xf32> -> vector<8x1xf32>
    %23 = vector.broadcast %22 : vector<8x1xf32> to vector<8x8xf32>
    %24 = arith.mulf %19, %23 : vector<8x8xf32>
    %25 = arith.truncf %24 : vector<8x8xf32> to vector<8x8xbf16>
    %cst_11 = arith.constant dense<0.000000e+00> : vector<8x16xf32>
    %26 = tpu.matmul %25, %11, %cst_11 {dimension_numbers = #tpu.dot_dimension_numbers<[1], [0], [0], [1], [0, 0, 1, 1], [], []>} : vector<8x8xbf16>, vector<8x16xbf16>, vector<8x16xf32> -> vector<8x16xf32>
    %27 = vector.extract_strided_slice %1 {offsets = [0, 16], sizes = [8, 16], strides = [1, 1]} : vector<8x32xf32> to vector<8x16xf32>
    %28 = arith.truncf %27 : vector<8x16xf32> to vector<8x16xbf16>
    %29 = vector.extract_strided_slice %3 {offsets = [0, 16], sizes = [8, 16], strides = [1, 1]} : vector<8x32xf32> to vector<8x16xf32>
    %30 = arith.truncf %29 : vector<8x16xf32> to vector<8x16xbf16>
    %31 = vector.extract_strided_slice %5 {offsets = [0, 16], sizes = [8, 16], strides = [1, 1]} : vector<8x32xf32> to vector<8x16xf32>
    %32 = arith.truncf %31 : vector<8x16xf32> to vector<8x16xbf16>
    %cst_12 = arith.constant dense<0.000000e+00> : vector<8x8xf32>
    %33 = tpu.matmul %28, %30, %cst_12 {dimension_numbers = #tpu.dot_dimension_numbers<[1], [1], [0], [0], [0, 0, 1, 0], [], []>} : vector<8x16xbf16>, vector<8x16xbf16>, vector<8x8xf32> -> vector<8x8xf32>
    %cst_13 = arith.constant 2.500000e-01 : f32
    %34 = vector.broadcast %cst_13 : f32 to vector<8x8xf32>
    %35 = arith.mulf %33, %34 : vector<8x8xf32>
    %cst_14 = arith.constant dense<0xFF800000> : vector<8xf32>
    %36 = vector.multi_reduction <maximumf>, %35, %cst_14 [1] : vector<8x8xf32> to vector<8xf32>
    %37 = vector.shape_cast %36 : vector<8xf32> to vector<8x1xf32>
    %38 = vector.broadcast %37 : vector<8x1xf32> to vector<8x8xf32>
    %39 = arith.subf %35, %38 : vector<8x8xf32>
    %40 = math.exp %39 : vector<8x8xf32>
    %cst_15 = arith.constant dense<0.000000e+00> : vector<8xf32>
    %41 = vector.multi_reduction <add>, %40, %cst_15 [1] : vector<8x8xf32> to vector<8xf32>
    %42 = vector.shape_cast %41 : vector<8xf32> to vector<8x1xf32>
    %43 = tpu.reciprocal %42 {approx = true} : vector<8x1xf32> -> vector<8x1xf32>
    %44 = vector.broadcast %43 : vector<8x1xf32> to vector<8x8xf32>
    %45 = arith.mulf %40, %44 : vector<8x8xf32>
    %46 = arith.truncf %45 : vector<8x8xf32> to vector<8x8xbf16>
    %cst_16 = arith.constant dense<0.000000e+00> : vector<8x16xf32>
    %47 = tpu.matmul %46, %32, %cst_16 {dimension_numbers = #tpu.dot_dimension_numbers<[1], [0], [0], [1], [0, 0, 1, 1], [], []>} : vector<8x8xbf16>, vector<8x16xbf16>, vector<8x16xf32> -> vector<8x16xf32>
    %48 = tpu.concatenate %26, %47 in 1 : vector<8x16xf32>, vector<8x16xf32> -> vector<8x32xf32>
    %c0_17 = arith.constant 0 : index
    %c0_18 = arith.constant 0 : index
    %c0_19 = arith.constant 0 : index
    %49 = vector.load %arg4[%c0_17, %c0_18, %c0_19] : memref<1x8x32xf32, #tpu.memory_space<vmem>>, vector<1x8x32xf32>
    %50 = vector.shape_cast %49 : vector<1x8x32xf32> to vector<8x32xf32>
    %51 = vector.shape_cast %48 : vector<8x32xf32> to vector<1x8x32xf32>
    tpu.vector_store %arg4[%c0_17, %c0_18, %c0_19], %51 {strides = array<i32>} : memref<1x8x32xf32, #tpu.memory_space<vmem>>, vector<1x8x32xf32>,
    return
  }
  func.func @transform_0(%arg0: i32) -> (i32, i32, i32) {
    %c0_i32 = arith.constant 0 : i32
    %c0_i32_0 = arith.constant 0 : i32
    %c0_i32_1 = arith.constant 0 : i32
    return %arg0, %c0_i32, %c0_i32_0 : i32, i32, i32
  }
  func.func @transform_1(%arg0: i32) -> (i32, i32, i32) {
    %c0_i32 = arith.constant 0 : i32
    %c0_i32_0 = arith.constant 0 : i32
    %c0_i32_1 = arith.constant 0 : i32
    return %arg0, %c0_i32, %c0_i32_0 : i32, i32, i32
  }
  func.func @transform_2(%arg0: i32) -> (i32, i32, i32) {
    %c0_i32 = arith.constant 0 : i32
    %c0_i32_0 = arith.constant 0 : i32
    %c0_i32_1 = arith.constant 0 : i32
    return %arg0, %c0_i32, %c0_i32_0 : i32, i32, i32
  }
  func.func @transform_3(%arg0: i32) -> (i32, i32, i32) {
    %c0_i32 = arith.constant 0 : i32
    %c0_i32_0 = arith.constant 0 : i32
    %c0_i32_1 = arith.constant 0 : i32
    return %arg0, %c0_i32, %c0_i32_0 : i32, i32, i32
  }
}

module attributes {stable_mosaic.version = 11 : i64} {
  func.func @_add_layernorm_kernel(%arg0: i32, %arg1: memref<16x32xf32, #tpu.memory_space<vmem>>, %arg2: memref<16x32xf32, #tpu.memory_space<vmem>>, %arg3: memref<1x32xf32, #tpu.memory_space<vmem>>, %arg4: memref<1x32xf32, #tpu.memory_space<vmem>>, %arg5: memref<16x32xf32, #tpu.memory_space<vmem>>) attributes {dimension_semantics = [#tpu.dimension_semantics<parallel>], iteration_bounds = array<i64: 1>, scalar_prefetch = 0 : i64, scratch_operands = 0 : i64, tpu.core_type = #tpu.core_type<tc>, window_params = [{transform_indices = @transform_0, window_bounds = array<i64: 16, 32>}, {transform_indices = @transform_1, window_bounds = array<i64: 16, 32>}, {pipeline_mode = #tpu.pipeline_mode<synchronous>, transform_indices = @transform_2, window_bounds = array<i64: 1, 32>}, {pipeline_mode = #tpu.pipeline_mode<synchronous>, transform_indices = @transform_3, window_bounds = array<i64: 1, 32>}, {transform_indices = @transform_4, window_bounds = array<i64: 16, 32>}]} {
    %c0 = arith.constant 0 : index
    %c0_0 = arith.constant 0 : index
    %0 = vector.load %arg1[%c0, %c0_0] : memref<16x32xf32, #tpu.memory_space<vmem>>, vector<16x32xf32>
    %c0_1 = arith.constant 0 : index
    %c0_2 = arith.constant 0 : index
    %1 = vector.load %arg2[%c0_1, %c0_2] : memref<16x32xf32, #tpu.memory_space<vmem>>, vector<16x32xf32>
    %2 = arith.addf %0, %1 : vector<16x32xf32>
    %cst = arith.constant dense<0.000000e+00> : vector<16xf32>
    %3 = vector.multi_reduction <add>, %2, %cst [1] : vector<16x32xf32> to vector<16xf32>
    %4 = vector.shape_cast %3 : vector<16xf32> to vector<16x1xf32>
    %cst_3 = arith.constant 3.200000e+01 : f32
    %5 = vector.broadcast %cst_3 : f32 to vector<16x1xf32>
    %6 = arith.divf %4, %5 : vector<16x1xf32>
    %7 = vector.broadcast %6 : vector<16x1xf32> to vector<16x32xf32>
    %8 = arith.subf %2, %7 : vector<16x32xf32>
    %9 = arith.mulf %8, %8 : vector<16x32xf32>
    %cst_4 = arith.constant dense<0.000000e+00> : vector<16xf32>
    %10 = vector.multi_reduction <add>, %9, %cst_4 [1] : vector<16x32xf32> to vector<16xf32>
    %11 = vector.shape_cast %10 : vector<16xf32> to vector<16x1xf32>
    %cst_5 = arith.constant 3.200000e+01 : f32
    %12 = vector.broadcast %cst_5 : f32 to vector<16x1xf32>
    %13 = arith.divf %11, %12 : vector<16x1xf32>
    %14 = vector.broadcast %6 : vector<16x1xf32> to vector<16x32xf32>
    %15 = arith.subf %2, %14 : vector<16x32xf32>
    %cst_6 = arith.constant 9.99999996E-13 : f32
    %16 = vector.broadcast %cst_6 : f32 to vector<16x1xf32>
    %17 = arith.addf %13, %16 : vector<16x1xf32>
    %18 = math.rsqrt %17 : vector<16x1xf32>
    %19 = vector.broadcast %18 : vector<16x1xf32> to vector<16x32xf32>
    %20 = arith.mulf %15, %19 : vector<16x32xf32>
    %c0_7 = arith.constant 0 : index
    %c0_8 = arith.constant 0 : index
    %21 = vector.load %arg3[%c0_7, %c0_8] : memref<1x32xf32, #tpu.memory_space<vmem>>, vector<1x32xf32>
    %22 = vector.broadcast %21 : vector<1x32xf32> to vector<16x32xf32>
    %23 = arith.mulf %20, %22 : vector<16x32xf32>
    %c0_9 = arith.constant 0 : index
    %c0_10 = arith.constant 0 : index
    %24 = vector.load %arg4[%c0_9, %c0_10] : memref<1x32xf32, #tpu.memory_space<vmem>>, vector<1x32xf32>
    %25 = vector.broadcast %24 : vector<1x32xf32> to vector<16x32xf32>
    %26 = arith.addf %23, %25 : vector<16x32xf32>
    %c0_11 = arith.constant 0 : index
    %c0_12 = arith.constant 0 : index
    %27 = vector.load %arg5[%c0_11, %c0_12] : memref<16x32xf32, #tpu.memory_space<vmem>>, vector<16x32xf32>
    tpu.vector_store %arg5[%c0_11, %c0_12], %26 {strides = array<i32>} : memref<16x32xf32, #tpu.memory_space<vmem>>, vector<16x32xf32>,
    return
  }
  func.func @transform_0(%arg0: i32) -> (i32, i32) {
    %c0_i32 = arith.constant 0 : i32
    %c0_i32_0 = arith.constant 0 : i32
    return %arg0, %c0_i32 : i32, i32
  }
  func.func @transform_1(%arg0: i32) -> (i32, i32) {
    %c0_i32 = arith.constant 0 : i32
    %c0_i32_0 = arith.constant 0 : i32
    return %arg0, %c0_i32 : i32, i32
  }
  func.func @transform_2(%arg0: i32) -> (i32, i32) {
    %c0_i32 = arith.constant 0 : i32
    %c0_i32_0 = arith.constant 0 : i32
    %c0_i32_1 = arith.constant 0 : i32
    return %c0_i32, %c0_i32_0 : i32, i32
  }
  func.func @transform_3(%arg0: i32) -> (i32, i32) {
    %c0_i32 = arith.constant 0 : i32
    %c0_i32_0 = arith.constant 0 : i32
    %c0_i32_1 = arith.constant 0 : i32
    return %c0_i32, %c0_i32_0 : i32, i32
  }
  func.func @transform_4(%arg0: i32) -> (i32, i32) {
    %c0_i32 = arith.constant 0 : i32
    %c0_i32_0 = arith.constant 0 : i32
    return %arg0, %c0_i32 : i32, i32
  }
}

module attributes {stable_mosaic.version = 11 : i64} {
  func.func @_linear_kernel(%arg0: i32, %arg1: i32, %arg2: i32, %arg3: memref<16x32xf32, #tpu.memory_space<vmem>>, %arg4: memref<32x128xbf16, #tpu.memory_space<vmem>>, %arg5: memref<1x128xf32, #tpu.memory_space<vmem>>, %arg6: memref<16x128xf32, #tpu.memory_space<vmem>>, %arg7: memref<16x128xf32, #tpu.memory_space<vmem>>) attributes {dimension_semantics = [#tpu.dimension_semantics<parallel>, #tpu.dimension_semantics<parallel>, #tpu.dimension_semantics<arbitrary>], iteration_bounds = array<i64: 1, 1, 1>, scalar_prefetch = 0 : i64, scratch_operands = 1 : i64, tpu.core_type = #tpu.core_type<tc>, window_params = [{transform_indices = @transform_0, window_bounds = array<i64: 16, 32>}, {transform_indices = @transform_1, window_bounds = array<i64: 32, 128>}, {transform_indices = @transform_2, window_bounds = array<i64: 1, 128>}, {transform_indices = @transform_3, window_bounds = array<i64: 16, 128>}]} {
    %c0_i32 = arith.constant 0 : i32
    %0 = arith.cmpi eq, %arg2, %c0_i32 : i32
    %1 = arith.extui %0 : i1 to i32
    %c0_i32_0 = arith.constant 0 : i32
    %2 = arith.cmpi ne, %1, %c0_i32_0 : i32
    scf.if %2 {
      %cst_10 = arith.constant 0.000000e+00 : f32
      %13 = vector.broadcast %cst_10 : f32 to vector<16x128xf32>
      %c0_11 = arith.constant 0 : index
      %c0_12 = arith.constant 0 : index
      %14 = vector.load %arg7[%c0_11, %c0_12] : memref<16x128xf32, #tpu.memory_space<vmem>>, vector<16x128xf32>
      tpu.vector_store %arg7[%c0_11, %c0_12], %13 {strides = array<i32>} : memref<16x128xf32, #tpu.memory_space<vmem>>, vector<16x128xf32>,
    } else {
    }
    %c0 = arith.constant 0 : index
    %c0_1 = arith.constant 0 : index
    %3 = vector.load %arg7[%c0, %c0_1] : memref<16x128xf32, #tpu.memory_space<vmem>>, vector<16x128xf32>
    %c0_2 = arith.constant 0 : index
    %c0_3 = arith.constant 0 : index
    %4 = vector.load %arg3[%c0_2, %c0_3] : memref<16x32xf32, #tpu.memory_space<vmem>>, vector<16x32xf32>
    %5 = arith.truncf %4 : vector<16x32xf32> to vector<16x32xbf16>
    %c0_4 = arith.constant 0 : index
    %c0_5 = arith.constant 0 : index
    %6 = vector.load %arg4[%c0_4, %c0_5] : memref<32x128xbf16, #tpu.memory_space<vmem>>, vector<32x128xbf16>
    %cst = arith.constant dense<0.000000e+00> : vector<16x128xf32>
    %7 = tpu.matmul %5, %6, %cst {dimension_numbers = #tpu.dot_dimension_numbers<[1], [0], [0], [1], [0, 0, 1, 1], [], []>} : vector<16x32xbf16>, vector<32x128xbf16>, vector<16x128xf32> -> vector<16x128xf32>
    %8 = arith.addf %3, %7 : vector<16x128xf32>
    %c0_6 = arith.constant 0 : index
    %c0_7 = arith.constant 0 : index
    %9 = vector.load %arg7[%c0_6, %c0_7] : memref<16x128xf32, #tpu.memory_space<vmem>>, vector<16x128xf32>
    tpu.vector_store %arg7[%c0_6, %c0_7], %8 {strides = array<i32>} : memref<16x128xf32, #tpu.memory_space<vmem>>, vector<16x128xf32>,
    %c0_i32_8 = arith.constant 0 : i32
    %10 = arith.cmpi eq, %arg2, %c0_i32_8 : i32
    %11 = arith.extui %10 : i1 to i32
    %c0_i32_9 = arith.constant 0 : i32
    %12 = arith.cmpi ne, %11, %c0_i32_9 : i32
    scf.if %12 {
      %c0_10 = arith.constant 0 : index
      %c0_11 = arith.constant 0 : index
      %13 = vector.load %arg7[%c0_10, %c0_11] : memref<16x128xf32, #tpu.memory_space<vmem>>, vector<16x128xf32>
      %c0_12 = arith.constant 0 : index
      %c0_13 = arith.constant 0 : index
      %14 = vector.load %arg5[%c0_12, %c0_13] : memref<1x128xf32, #tpu.memory_space<vmem>>, vector<1x128xf32>
      %15 = vector.broadcast %14 : vector<1x128xf32> to vector<16x128xf32>
      %16 = arith.addf %13, %15 : vector<16x128xf32>
      %17 = arith.mulf %16, %16 : vector<16x128xf32>
      %18 = arith.mulf %16, %17 : vector<16x128xf32>
      %cst_14 = arith.constant 4.471500e-02 : f32
      %19 = vector.broadcast %cst_14 : f32 to vector<16x128xf32>
      %20 = arith.mulf %19, %18 : vector<16x128xf32>
      %21 = arith.addf %16, %20 : vector<16x128xf32>
      %cst_15 = arith.constant 0.797884583 : f32
      %22 = vector.broadcast %cst_15 : f32 to vector<16x128xf32>
      %23 = arith.mulf %22, %21 : vector<16x128xf32>
      %24 = math.tanh %23 : vector<16x128xf32>
      %cst_16 = arith.constant 1.000000e+00 : f32
      %25 = vector.broadcast %cst_16 : f32 to vector<16x128xf32>
      %26 = arith.addf %25, %24 : vector<16x128xf32>
      %cst_17 = arith.constant 5.000000e-01 : f32
      %27 = vector.broadcast %cst_17 : f32 to vector<16x128xf32>
      %28 = arith.mulf %27, %26 : vector<16x128xf32>
      %29 = arith.mulf %16, %28 : vector<16x128xf32>
      %c0_18 = arith.constant 0 : index
      %c0_19 = arith.constant 0 : index
      %30 = vector.load %arg6[%c0_18, %c0_19] : memref<16x128xf32, #tpu.memory_space<vmem>>, vector<16x128xf32>
      tpu.vector_store %arg6[%c0_18, %c0_19], %29 {strides = array<i32>} : memref<16x128xf32, #tpu.memory_space<vmem>>, vector<16x128xf32>,
    } else {
    }
    return
  }
  func.func @transform_0(%arg0: i32, %arg1: i32, %arg2: i32) -> (i32, i32) {
    %c0_i32 = arith.constant 0 : i32
    return %arg0, %arg2 : i32, i32
  }
  func.func @transform_1(%arg0: i32, %arg1: i32, %arg2: i32) -> (i32, i32) {
    %c0_i32 = arith.constant 0 : i32
    return %arg2, %arg1 : i32, i32
  }
  func.func @transform_2(%arg0: i32, %arg1: i32, %arg2: i32) -> (i32, i32) {
    %c0_i32 = arith.constant 0 : i32
    %c0_i32_0 = arith.constant 0 : i32
    return %c0_i32, %arg1 : i32, i32
  }
  func.func @transform_3(%arg0: i32, %arg1: i32, %arg2: i32) -> (i32, i32) {
    %c0_i32 = arith.constant 0 : i32
    return %arg0, %arg1 : i32, i32
  }
}

module attributes {stable_mosaic.version = 11 : i64} {
  func.func @_linear_kernel(%arg0: i32, %arg1: i32, %arg2: i32, %arg3: memref<16x128xf32, #tpu.memory_space<vmem>>, %arg4: memref<128x32xbf16, #tpu.memory_space<vmem>>, %arg5: memref<1x32xf32, #tpu.memory_space<vmem>>, %arg6: memref<16x32xf32, #tpu.memory_space<vmem>>, %arg7: memref<16x32xf32, #tpu.memory_space<vmem>>) attributes {dimension_semantics = [#tpu.dimension_semantics<parallel>, #tpu.dimension_semantics<parallel>, #tpu.dimension_semantics<arbitrary>], iteration_bounds = array<i64: 1, 1, 1>, scalar_prefetch = 0 : i64, scratch_operands = 1 : i64, tpu.core_type = #tpu.core_type<tc>, window_params = [{transform_indices = @transform_0, window_bounds = array<i64: 16, 128>}, {transform_indices = @transform_1, window_bounds = array<i64: 128, 32>}, {transform_indices = @transform_2, window_bounds = array<i64: 1, 32>}, {transform_indices = @transform_3, window_bounds = array<i64: 16, 32>}]} {
    %c0_i32 = arith.constant 0 : i32
    %0 = arith.cmpi eq, %arg2, %c0_i32 : i32
    %1 = arith.extui %0 : i1 to i32
    %c0_i32_0 = arith.constant 0 : i32
    %2 = arith.cmpi ne, %1, %c0_i32_0 : i32
    scf.if %2 {
      %cst_10 = arith.constant 0.000000e+00 : f32
      %13 = vector.broadcast %cst_10 : f32 to vector<16x32xf32>
      %c0_11 = arith.constant 0 : index
      %c0_12 = arith.constant 0 : index
      %14 = vector.load %arg7[%c0_11, %c0_12] : memref<16x32xf32, #tpu.memory_space<vmem>>, vector<16x32xf32>
      tpu.vector_store %arg7[%c0_11, %c0_12], %13 {strides = array<i32>} : memref<16x32xf32, #tpu.memory_space<vmem>>, vector<16x32xf32>,
    } else {
    }
    %c0 = arith.constant 0 : index
    %c0_1 = arith.constant 0 : index
    %3 = vector.load %arg7[%c0, %c0_1] : memref<16x32xf32, #tpu.memory_space<vmem>>, vector<16x32xf32>
    %c0_2 = arith.constant 0 : index
    %c0_3 = arith.constant 0 : index
    %4 = vector.load %arg3[%c0_2, %c0_3] : memref<16x128xf32, #tpu.memory_space<vmem>>, vector<16x128xf32>
    %5 = arith.truncf %4 : vector<16x128xf32> to vector<16x128xbf16>
    %c0_4 = arith.constant 0 : index
    %c0_5 = arith.constant 0 : index
    %6 = vector.load %arg4[%c0_4, %c0_5] : memref<128x32xbf16, #tpu.memory_space<vmem>>, vector<128x32xbf16>
    %cst = arith.constant dense<0.000000e+00> : vector<16x32xf32>
    %7 = tpu.matmul %5, %6, %cst {dimension_numbers = #tpu.dot_dimension_numbers<[1], [0], [0], [1], [0, 0, 1, 1], [], []>} : vector<16x128xbf16>, vector<128x32xbf16>, vector<16x32xf32> -> vector<16x32xf32>
    %8 = arith.addf %3, %7 : vector<16x32xf32>
    %c0_6 = arith.constant 0 : index
    %c0_7 = arith.constant 0 : index
    %9 = vector.load %arg7[%c0_6, %c0_7] : memref<16x32xf32, #tpu.memory_space<vmem>>, vector<16x32xf32>
    tpu.vector_store %arg7[%c0_6, %c0_7], %8 {strides = array<i32>} : memref<16x32xf32, #tpu.memory_space<vmem>>, vector<16x32xf32>,
    %c0_i32_8 = arith.constant 0 : i32
    %10 = arith.cmpi eq, %arg2, %c0_i32_8 : i32
    %11 = arith.extui %10 : i1 to i32
    %c0_i32_9 = arith.constant 0 : i32
    %12 = arith.cmpi ne, %11, %c0_i32_9 : i32
    scf.if %12 {
      %c0_10 = arith.constant 0 : index
      %c0_11 = arith.constant 0 : index
      %13 = vector.load %arg7[%c0_10, %c0_11] : memref<16x32xf32, #tpu.memory_space<vmem>>, vector<16x32xf32>
      %c0_12 = arith.constant 0 : index
      %c0_13 = arith.constant 0 : index
      %14 = vector.load %arg5[%c0_12, %c0_13] : memref<1x32xf32, #tpu.memory_space<vmem>>, vector<1x32xf32>
      %15 = vector.broadcast %14 : vector<1x32xf32> to vector<16x32xf32>
      %16 = arith.addf %13, %15 : vector<16x32xf32>
      %c0_14 = arith.constant 0 : index
      %c0_15 = arith.constant 0 : index
      %17 = vector.load %arg6[%c0_14, %c0_15] : memref<16x32xf32, #tpu.memory_space<vmem>>, vector<16x32xf32>
      tpu.vector_store %arg6[%c0_14, %c0_15], %16 {strides = array<i32>} : memref<16x32xf32, #tpu.memory_space<vmem>>, vector<16x32xf32>,
    } else {
    }
    return
  }
  func.func @transform_0(%arg0: i32, %arg1: i32, %arg2: i32) -> (i32, i32) {
    %c0_i32 = arith.constant 0 : i32
    return %arg0, %arg2 : i32, i32
  }
  func.func @transform_1(%arg0: i32, %arg1: i32, %arg2: i32) -> (i32, i32) {
    %c0_i32 = arith.constant 0 : i32
    return %arg2, %arg1 : i32, i32
  }
  func.func @transform_2(%arg0: i32, %arg1: i32, %arg2: i32) -> (i32, i32) {
    %c0_i32 = arith.constant 0 : i32
    %c0_i32_0 = arith.constant 0 : i32
    return %c0_i32, %arg1 : i32, i32
  }
  func.func @transform_3(%arg0: i32, %arg1: i32, %arg2: i32) -> (i32, i32) {
    %c0_i32 = arith.constant 0 : i32
    return %arg0, %arg1 : i32, i32
  }
}

module attributes {stable_mosaic.version = 11 : i64} {
  func.func @_linear_kernel(%arg0: i32, %arg1: i32, %arg2: i32, %arg3: memref<2x32xf32, #tpu.memory_space<vmem>>, %arg4: memref<32x32xbf16, #tpu.memory_space<vmem>>, %arg5: memref<1x32xf32, #tpu.memory_space<vmem>>, %arg6: memref<2x32xf32, #tpu.memory_space<vmem>>, %arg7: memref<2x32xf32, #tpu.memory_space<vmem>>) attributes {dimension_semantics = [#tpu.dimension_semantics<parallel>, #tpu.dimension_semantics<parallel>, #tpu.dimension_semantics<arbitrary>], iteration_bounds = array<i64: 1, 1, 1>, scalar_prefetch = 0 : i64, scratch_operands = 1 : i64, tpu.core_type = #tpu.core_type<tc>, window_params = [{transform_indices = @transform_0, window_bounds = array<i64: 2, 32>}, {transform_indices = @transform_1, window_bounds = array<i64: 32, 32>}, {transform_indices = @transform_2, window_bounds = array<i64: 1, 32>}, {transform_indices = @transform_3, window_bounds = array<i64: 2, 32>}]} {
    %c0_i32 = arith.constant 0 : i32
    %0 = arith.cmpi eq, %arg2, %c0_i32 : i32
    %1 = arith.extui %0 : i1 to i32
    %c0_i32_0 = arith.constant 0 : i32
    %2 = arith.cmpi ne, %1, %c0_i32_0 : i32
    scf.if %2 {
      %cst_10 = arith.constant 0.000000e+00 : f32
      %13 = vector.broadcast %cst_10 : f32 to vector<2x32xf32>
      %c0_11 = arith.constant 0 : index
      %c0_12 = arith.constant 0 : index
      %14 = vector.load %arg7[%c0_11, %c0_12] : memref<2x32xf32, #tpu.memory_space<vmem>>, vector<2x32xf32>
      tpu.vector_store %arg7[%c0_11, %c0_12], %13 {strides = array<i32>} : memref<2x32xf32, #tpu.memory_space<vmem>>, vector<2x32xf32>,
    } else {
    }
    %c0 = arith.constant 0 : index
    %c0_1 = arith.constant 0 : index
    %3 = vector.load %arg7[%c0, %c0_1] : memref<2x32xf32, #tpu.memory_space<vmem>>, vector<2x32xf32>
    %c0_2 = arith.constant 0 : index
    %c0_3 = arith.constant 0 : index
    %4 = vector.load %arg3[%c0_2, %c0_3] : memref<2x32xf32, #tpu.memory_space<vmem>>, vector<2x32xf32>
    %5 = arith.truncf %4 : vector<2x32xf32> to vector<2x32xbf16>
    %c0_4 = arith.constant 0 : index
    %c0_5 = arith.constant 0 : index
    %6 = vector.load %arg4[%c0_4, %c0_5] : memref<32x32xbf16, #tpu.memory_space<vmem>>, vector<32x32xbf16>
    %cst = arith.constant dense<0.000000e+00> : vector<2x32xf32>
    %7 = tpu.matmul %5, %6, %cst {dimension_numbers = #tpu.dot_dimension_numbers<[1], [0], [0], [1], [0, 0, 1, 1], [], []>} : vector<2x32xbf16>, vector<32x32xbf16>, vector<2x32xf32> -> vector<2x32xf32>
    %8 = arith.addf %3, %7 : vector<2x32xf32>
    %c0_6 = arith.constant 0 : index
    %c0_7 = arith.constant 0 : index
    %9 = vector.load %arg7[%c0_6, %c0_7] : memref<2x32xf32, #tpu.memory_space<vmem>>, vector<2x32xf32>
    tpu.vector_store %arg7[%c0_6, %c0_7], %8 {strides = array<i32>} : memref<2x32xf32, #tpu.memory_space<vmem>>, vector<2x32xf32>,
    %c0_i32_8 = arith.constant 0 : i32
    %10 = arith.cmpi eq, %arg2, %c0_i32_8 : i32
    %11 = arith.extui %10 : i1 to i32
    %c0_i32_9 = arith.constant 0 : i32
    %12 = arith.cmpi ne, %11, %c0_i32_9 : i32
    scf.if %12 {
      %c0_10 = arith.constant 0 : index
      %c0_11 = arith.constant 0 : index
      %13 = vector.load %arg7[%c0_10, %c0_11] : memref<2x32xf32, #tpu.memory_space<vmem>>, vector<2x32xf32>
      %c0_12 = arith.constant 0 : index
      %c0_13 = arith.constant 0 : index
      %14 = vector.load %arg5[%c0_12, %c0_13] : memref<1x32xf32, #tpu.memory_space<vmem>>, vector<1x32xf32>
      %15 = vector.broadcast %14 : vector<1x32xf32> to vector<2x32xf32>
      %16 = arith.addf %13, %15 : vector<2x32xf32>
      %c0_14 = arith.constant 0 : index
      %c0_15 = arith.constant 0 : index
      %17 = vector.load %arg6[%c0_14, %c0_15] : memref<2x32xf32, #tpu.memory_space<vmem>>, vector<2x32xf32>
      tpu.vector_store %arg6[%c0_14, %c0_15], %16 {strides = array<i32>} : memref<2x32xf32, #tpu.memory_space<vmem>>, vector<2x32xf32>,
    } else {
    }
    return
  }
  func.func @transform_0(%arg0: i32, %arg1: i32, %arg2: i32) -> (i32, i32) {
    %c0_i32 = arith.constant 0 : i32
    return %arg0, %arg2 : i32, i32
  }
  func.func @transform_1(%arg0: i32, %arg1: i32, %arg2: i32) -> (i32, i32) {
    %c0_i32 = arith.constant 0 : i32
    return %arg2, %arg1 : i32, i32
  }
  func.func @transform_2(%arg0: i32, %arg1: i32, %arg2: i32) -> (i32, i32) {
    %c0_i32 = arith.constant 0 : i32
    %c0_i32_0 = arith.constant 0 : i32
    return %c0_i32, %arg1 : i32, i32
  }
  func.func @transform_3(%arg0: i32, %arg1: i32, %arg2: i32) -> (i32, i32) {
    %c0_i32 = arith.constant 0 : i32
    return %arg0, %arg1 : i32, i32
  }
}

module attributes {stable_mosaic.version = 11 : i64} {
  func.func @_linear_kernel(%arg0: i32, %arg1: i32, %arg2: i32, %arg3: memref<2x32xf32, #tpu.memory_space<vmem>>, %arg4: memref<32x64xbf16, #tpu.memory_space<vmem>>, %arg5: memref<1x64xf32, #tpu.memory_space<vmem>>, %arg6: memref<2x64xf32, #tpu.memory_space<vmem>>, %arg7: memref<2x64xf32, #tpu.memory_space<vmem>>) attributes {dimension_semantics = [#tpu.dimension_semantics<parallel>, #tpu.dimension_semantics<parallel>, #tpu.dimension_semantics<arbitrary>], iteration_bounds = array<i64: 1, 1, 1>, scalar_prefetch = 0 : i64, scratch_operands = 1 : i64, tpu.core_type = #tpu.core_type<tc>, window_params = [{transform_indices = @transform_0, window_bounds = array<i64: 2, 32>}, {transform_indices = @transform_1, window_bounds = array<i64: 32, 64>}, {transform_indices = @transform_2, window_bounds = array<i64: 1, 64>}, {transform_indices = @transform_3, window_bounds = array<i64: 2, 64>}]} {
    %c0_i32 = arith.constant 0 : i32
    %0 = arith.cmpi eq, %arg2, %c0_i32 : i32
    %1 = arith.extui %0 : i1 to i32
    %c0_i32_0 = arith.constant 0 : i32
    %2 = arith.cmpi ne, %1, %c0_i32_0 : i32
    scf.if %2 {
      %cst_10 = arith.constant 0.000000e+00 : f32
      %13 = vector.broadcast %cst_10 : f32 to vector<2x64xf32>
      %c0_11 = arith.constant 0 : index
      %c0_12 = arith.constant 0 : index
      %14 = vector.load %arg7[%c0_11, %c0_12] : memref<2x64xf32, #tpu.memory_space<vmem>>, vector<2x64xf32>
      tpu.vector_store %arg7[%c0_11, %c0_12], %13 {strides = array<i32>} : memref<2x64xf32, #tpu.memory_space<vmem>>, vector<2x64xf32>,
    } else {
    }
    %c0 = arith.constant 0 : index
    %c0_1 = arith.constant 0 : index
    %3 = vector.load %arg7[%c0, %c0_1] : memref<2x64xf32, #tpu.memory_space<vmem>>, vector<2x64xf32>
    %c0_2 = arith.constant 0 : index
    %c0_3 = arith.constant 0 : index
    %4 = vector.load %arg3[%c0_2, %c0_3] : memref<2x32xf32, #tpu.memory_space<vmem>>, vector<2x32xf32>
    %5 = arith.truncf %4 : vector<2x32xf32> to vector<2x32xbf16>
    %c0_4 = arith.constant 0 : index
    %c0_5 = arith.constant 0 : index
    %6 = vector.load %arg4[%c0_4, %c0_5] : memref<32x64xbf16, #tpu.memory_space<vmem>>, vector<32x64xbf16>
    %cst = arith.constant dense<0.000000e+00> : vector<2x64xf32>
    %7 = tpu.matmul %5, %6, %cst {dimension_numbers = #tpu.dot_dimension_numbers<[1], [0], [0], [1], [0, 0, 1, 1], [], []>} : vector<2x32xbf16>, vector<32x64xbf16>, vector<2x64xf32> -> vector<2x64xf32>
    %8 = arith.addf %3, %7 : vector<2x64xf32>
    %c0_6 = arith.constant 0 : index
    %c0_7 = arith.constant 0 : index
    %9 = vector.load %arg7[%c0_6, %c0_7] : memref<2x64xf32, #tpu.memory_space<vmem>>, vector<2x64xf32>
    tpu.vector_store %arg7[%c0_6, %c0_7], %8 {strides = array<i32>} : memref<2x64xf32, #tpu.memory_space<vmem>>, vector<2x64xf32>,
    %c0_i32_8 = arith.constant 0 : i32
    %10 = arith.cmpi eq, %arg2, %c0_i32_8 : i32
    %11 = arith.extui %10 : i1 to i32
    %c0_i32_9 = arith.constant 0 : i32
    %12 = arith.cmpi ne, %11, %c0_i32_9 : i32
    scf.if %12 {
      %c0_10 = arith.constant 0 : index
      %c0_11 = arith.constant 0 : index
      %13 = vector.load %arg7[%c0_10, %c0_11] : memref<2x64xf32, #tpu.memory_space<vmem>>, vector<2x64xf32>
      %c0_12 = arith.constant 0 : index
      %c0_13 = arith.constant 0 : index
      %14 = vector.load %arg5[%c0_12, %c0_13] : memref<1x64xf32, #tpu.memory_space<vmem>>, vector<1x64xf32>
      %15 = vector.broadcast %14 : vector<1x64xf32> to vector<2x64xf32>
      %16 = arith.addf %13, %15 : vector<2x64xf32>
      %c0_14 = arith.constant 0 : index
      %c0_15 = arith.constant 0 : index
      %17 = vector.load %arg6[%c0_14, %c0_15] : memref<2x64xf32, #tpu.memory_space<vmem>>, vector<2x64xf32>
      tpu.vector_store %arg6[%c0_14, %c0_15], %16 {strides = array<i32>} : memref<2x64xf32, #tpu.memory_space<vmem>>, vector<2x64xf32>,
    } else {
    }
    return
  }
  func.func @transform_0(%arg0: i32, %arg1: i32, %arg2: i32) -> (i32, i32) {
    %c0_i32 = arith.constant 0 : i32
    return %arg0, %arg2 : i32, i32
  }
  func.func @transform_1(%arg0: i32, %arg1: i32, %arg2: i32) -> (i32, i32) {
    %c0_i32 = arith.constant 0 : i32
    return %arg2, %arg1 : i32, i32
  }
  func.func @transform_2(%arg0: i32, %arg1: i32, %arg2: i32) -> (i32, i32) {
    %c0_i32 = arith.constant 0 : i32
    %c0_i32_0 = arith.constant 0 : i32
    return %c0_i32, %arg1 : i32, i32
  }
  func.func @transform_3(%arg0: i32, %arg1: i32, %arg2: i32) -> (i32, i32) {
    %c0_i32 = arith.constant 0 : i32
    return %arg0, %arg1 : i32, i32
  }
}

module attributes {stable_mosaic.version = 11 : i64} {
  func.func @_mha_kernel(%arg0: i32, %arg1: memref<1x1x32xf32, #tpu.memory_space<vmem>>, %arg2: memref<1x4x32xf32, #tpu.memory_space<vmem>>, %arg3: memref<1x4x32xf32, #tpu.memory_space<vmem>>, %arg4: memref<1x1x32xf32, #tpu.memory_space<vmem>>) attributes {dimension_semantics = [#tpu.dimension_semantics<parallel>], iteration_bounds = array<i64: 2>, scalar_prefetch = 0 : i64, scratch_operands = 0 : i64, tpu.core_type = #tpu.core_type<tc>, window_params = [{transform_indices = @transform_0, window_bounds = array<i64: 1, 1, 32>}, {transform_indices = @transform_1, window_bounds = array<i64: 1, 4, 32>}, {transform_indices = @transform_2, window_bounds = array<i64: 1, 4, 32>}, {transform_indices = @transform_3, window_bounds = array<i64: 1, 1, 32>}]} {
    %c0 = arith.constant 0 : index
    %c0_0 = arith.constant 0 : index
    %c0_1 = arith.constant 0 : index
    %0 = vector.load %arg1[%c0, %c0_0, %c0_1] : memref<1x1x32xf32, #tpu.memory_space<vmem>>, vector<1x1x32xf32>
    %1 = vector.shape_cast %0 : vector<1x1x32xf32> to vector<1x32xf32>
    %c0_2 = arith.constant 0 : index
    %c0_3 = arith.constant 0 : index
    %c0_4 = arith.constant 0 : index
    %2 = vector.load %arg2[%c0_2, %c0_3, %c0_4] : memref<1x4x32xf32, #tpu.memory_space<vmem>>, vector<1x4x32xf32>
    %3 = vector.shape_cast %2 : vector<1x4x32xf32> to vector<4x32xf32>
    %c0_5 = arith.constant 0 : index
    %c0_6 = arith.constant 0 : index
    %c0_7 = arith.constant 0 : index
    %4 = vector.load %arg3[%c0_5, %c0_6, %c0_7] : memref<1x4x32xf32, #tpu.memory_space<vmem>>, vector<1x4x32xf32>
    %5 = vector.shape_cast %4 : vector<1x4x32xf32> to vector<4x32xf32>
    %6 = vector.extract_strided_slice %1 {offsets = [0, 0], sizes = [1, 16], strides = [1, 1]} : vector<1x32xf32> to vector<1x16xf32>
    %7 = arith.truncf %6 : vector<1x16xf32> to vector<1x16xbf16>
    %8 = vector.extract_strided_slice %3 {offsets = [0, 0], sizes = [4, 16], strides = [1, 1]} : vector<4x32xf32> to vector<4x16xf32>
    %9 = arith.truncf %8 : vector<4x16xf32> to vector<4x16xbf16>
    %10 = vector.extract_strided_slice %5 {offsets = [0, 0], sizes = [4, 16], strides = [1, 1]} : vector<4x32xf32> to vector<4x16xf32>
    %11 = arith.truncf %10 : vector<4x16xf32> to vector<4x16xbf16>
    %cst = arith.constant dense<0.000000e+00> : vector<1x4xf32>
    %12 = tpu.matmul %7, %9, %cst {dimension_numbers = #tpu.dot_dimension_numbers<[1], [1], [0], [0], [0, 0, 1, 0], [], []>} : vector<1x16xbf16>, vector<4x16xbf16>, vector<1x4xf32> -> vector<1x4xf32>
    %cst_8 = arith.constant 2.500000e-01 : f32
    %13 = vector.broadcast %cst_8 : f32 to vector<1x4xf32>
    %14 = arith.mulf %12, %13 : vector<1x4xf32>
    %cst_9 = arith.constant dense<0xFF800000> : vector<1xf32>
    %15 = vector.multi_reduction <maximumf>, %14, %cst_9 [1] : vector<1x4xf32> to vector<1xf32>
    %16 = vector.shape_cast %15 : vector<1xf32> to vector<1x1xf32>
    %17 = vector.broadcast %16 : vector<1x1xf32> to vector<1x4xf32>
    %18 = arith.subf %14, %17 : vector<1x4xf32>
    %19 = math.exp %18 : vector<1x4xf32>
    %cst_10 = arith.constant dense<0.000000e+00> : vector<1xf32>
    %20 = vector.multi_reduction <add>, %19, %cst_10 [1] : vector<1x4xf32> to vector<1xf32>
    %21 = vector.shape_cast %20 : vector<1xf32> to vector<1x1xf32>
    %22 = tpu.reciprocal %21 {approx = true} : vector<1x1xf32> -> vector<1x1xf32>
    %23 = vector.broadcast %22 : vector<1x1xf32> to vector<1x4xf32>
    %24 = arith.mulf %19, %23 : vector<1x4xf32>
    %25 = arith.truncf %24 : vector<1x4xf32> to vector<1x4xbf16>
    %cst_11 = arith.constant dense<0.000000e+00> : vector<1x16xf32>
    %26 = tpu.matmul %25, %11, %cst_11 {dimension_numbers = #tpu.dot_dimension_numbers<[1], [0], [0], [1], [0, 0, 1, 1], [], []>} : vector<1x4xbf16>, vector<4x16xbf16>, vector<1x16xf32> -> vector<1x16xf32>
    %27 = vector.extract_strided_slice %1 {offsets = [0, 16], sizes = [1, 16], strides = [1, 1]} : vector<1x32xf32> to vector<1x16xf32>
    %28 = arith.truncf %27 : vector<1x16xf32> to vector<1x16xbf16>
    %29 = vector.extract_strided_slice %3 {offsets = [0, 16], sizes = [4, 16], strides = [1, 1]} : vector<4x32xf32> to vector<4x16xf32>
    %30 = arith.truncf %29 : vector<4x16xf32> to vector<4x16xbf16>
    %31 = vector.extract_strided_slice %5 {offsets = [0, 16], sizes = [4, 16], strides = [1, 1]} : vector<4x32xf32> to vector<4x16xf32>
    %32 = arith.truncf %31 : vector<4x16xf32> to vector<4x16xbf16>
    %cst_12 = arith.constant dense<0.000000e+00> : vector<1x4xf32>
    %33 = tpu.matmul %28, %30, %cst_12 {dimension_numbers = #tpu.dot_dimension_numbers<[1], [1], [0], [0], [0, 0, 1, 0], [], []>} : vector<1x16xbf16>, vector<4x16xbf16>, vector<1x4xf32> -> vector<1x4xf32>
    %cst_13 = arith.constant 2.500000e-01 : f32
    %34 = vector.broadcast %cst_13 : f32 to vector<1x4xf32>
    %35 = arith.mulf %33, %34 : vector<1x4xf32>
    %cst_14 = arith.constant dense<0xFF800000> : vector<1xf32>
    %36 = vector.multi_reduction <maximumf>, %35, %cst_14 [1] : vector<1x4xf32> to vector<1xf32>
    %37 = vector.shape_cast %36 : vector<1xf32> to vector<1x1xf32>
    %38 = vector.broadcast %37 : vector<1x1xf32> to vector<1x4xf32>
    %39 = arith.subf %35, %38 : vector<1x4xf32>
    %40 = math.exp %39 : vector<1x4xf32>
    %cst_15 = arith.constant dense<0.000000e+00> : vector<1xf32>
    %41 = vector.multi_reduction <add>, %40, %cst_15 [1] : vector<1x4xf32> to vector<1xf32>
    %42 = vector.shape_cast %41 : vector<1xf32> to vector<1x1xf32>
    %43 = tpu.reciprocal %42 {approx = true} : vector<1x1xf32> -> vector<1x1xf32>
    %44 = vector.broadcast %43 : vector<1x1xf32> to vector<1x4xf32>
    %45 = arith.mulf %40, %44 : vector<1x4xf32>
    %46 = arith.truncf %45 : vector<1x4xf32> to vector<1x4xbf16>
    %cst_16 = arith.constant dense<0.000000e+00> : vector<1x16xf32>
    %47 = tpu.matmul %46, %32, %cst_16 {dimension_numbers = #tpu.dot_dimension_numbers<[1], [0], [0], [1], [0, 0, 1, 1], [], []>} : vector<1x4xbf16>, vector<4x16xbf16>, vector<1x16xf32> -> vector<1x16xf32>
    %48 = tpu.concatenate %26, %47 in 1 : vector<1x16xf32>, vector<1x16xf32> -> vector<1x32xf32>
    %c0_17 = arith.constant 0 : index
    %c0_18 = arith.constant 0 : index
    %c0_19 = arith.constant 0 : index
    %49 = vector.load %arg4[%c0_17, %c0_18, %c0_19] : memref<1x1x32xf32, #tpu.memory_space<vmem>>, vector<1x1x32xf32>
    %50 = vector.shape_cast %49 : vector<1x1x32xf32> to vector<1x32xf32>
    %51 = vector.shape_cast %48 : vector<1x32xf32> to vector<1x1x32xf32>
    tpu.vector_store %arg4[%c0_17, %c0_18, %c0_19], %51 {strides = array<i32>} : memref<1x1x32xf32, #tpu.memory_space<vmem>>, vector<1x1x32xf32>,
    return
  }
  func.func @transform_0(%arg0: i32) -> (i32, i32, i32) {
    %c0_i32 = arith.constant 0 : i32
    %c0_i32_0 = arith.constant 0 : i32
    %c0_i32_1 = arith.constant 0 : i32
    return %arg0, %c0_i32, %c0_i32_0 : i32, i32, i32
  }
  func.func @transform_1(%arg0: i32) -> (i32, i32, i32) {
    %c0_i32 = arith.constant 0 : i32
    %c0_i32_0 = arith.constant 0 : i32
    %c0_i32_1 = arith.constant 0 : i32
    return %arg0, %c0_i32, %c0_i32_0 : i32, i32, i32
  }
  func.func @transform_2(%arg0: i32) -> (i32, i32, i32) {
    %c0_i32 = arith.constant 0 : i32
    %c0_i32_0 = arith.constant 0 : i32
    %c0_i32_1 = arith.constant 0 : i32
    return %arg0, %c0_i32, %c0_i32_0 : i32, i32, i32
  }
  func.func @transform_3(%arg0: i32) -> (i32, i32, i32) {
    %c0_i32 = arith.constant 0 : i32
    %c0_i32_0 = arith.constant 0 : i32
    %c0_i32_1 = arith.constant 0 : i32
    return %arg0, %c0_i32, %c0_i32_0 : i32, i32, i32
  }
}

module attributes {stable_mosaic.version = 11 : i64} {
  func.func @_mha_kernel(%arg0: i32, %arg1: memref<1x1x32xf32, #tpu.memory_space<vmem>>, %arg2: memref<1x1x32xf32, #tpu.memory_space<vmem>>, %arg3: memref<1x1x32xf32, #tpu.memory_space<vmem>>, %arg4: memref<1x1x32xf32, #tpu.memory_space<vmem>>) attributes {dimension_semantics = [#tpu.dimension_semantics<parallel>], iteration_bounds = array<i64: 2>, scalar_prefetch = 0 : i64, scratch_operands = 0 : i64, tpu.core_type = #tpu.core_type<tc>, window_params = [{transform_indices = @transform_0, window_bounds = array<i64: 1, 1, 32>}, {transform_indices = @transform_1, window_bounds = array<i64: 1, 1, 32>}, {transform_indices = @transform_2, window_bounds = array<i64: 1, 1, 32>}, {transform_indices = @transform_3, window_bounds = array<i64: 1, 1, 32>}]} {
    %c0 = arith.constant 0 : index
    %c0_0 = arith.constant 0 : index
    %c0_1 = arith.constant 0 : index
    %0 = vector.load %arg1[%c0, %c0_0, %c0_1] : memref<1x1x32xf32, #tpu.memory_space<vmem>>, vector<1x1x32xf32>
    %1 = vector.shape_cast %0 : vector<1x1x32xf32> to vector<1x32xf32>
    %c0_2 = arith.constant 0 : index
    %c0_3 = arith.constant 0 : index
    %c0_4 = arith.constant 0 : index
    %2 = vector.load %arg2[%c0_2, %c0_3, %c0_4] : memref<1x1x32xf32, #tpu.memory_space<vmem>>, vector<1x1x32xf32>
    %3 = vector.shape_cast %2 : vector<1x1x32xf32> to vector<1x32xf32>
    %c0_5 = arith.constant 0 : index
    %c0_6 = arith.constant 0 : index
    %c0_7 = arith.constant 0 : index
    %4 = vector.load %arg3[%c0_5, %c0_6, %c0_7] : memref<1x1x32xf32, #tpu.memory_space<vmem>>, vector<1x1x32xf32>
    %5 = vector.shape_cast %4 : vector<1x1x32xf32> to vector<1x32xf32>
    %6 = vector.extract_strided_slice %1 {offsets = [0, 0], sizes = [1, 16], strides = [1, 1]} : vector<1x32xf32> to vector<1x16xf32>
    %7 = arith.truncf %6 : vector<1x16xf32> to vector<1x16xbf16>
    %8 = vector.extract_strided_slice %3 {offsets = [0, 0], sizes = [1, 16], strides = [1, 1]} : vector<1x32xf32> to vector<1x16xf32>
    %9 = arith.truncf %8 : vector<1x16xf32> to vector<1x16xbf16>
    %10 = vector.extract_strided_slice %5 {offsets = [0, 0], sizes = [1, 16], strides = [1, 1]} : vector<1x32xf32> to vector<1x16xf32>
    %11 = arith.truncf %10 : vector<1x16xf32> to vector<1x16xbf16>
    %12 = arith.extf %7 : vector<1x16xbf16> to vector<1x16xf32>
    %13 = arith.extf %9 : vector<1x16xbf16> to vector<1x16xf32>
    %cst = arith.constant dense<0.000000e+00> : vector<1xf32>
    %14 = arith.mulf %12, %13 : vector<1x16xf32>
    %15 = vector.multi_reduction <add>, %14, %cst [1] : vector<1x16xf32> to vector<1xf32>
    %16 = vector.shape_cast %15 : vector<1xf32> to vector<1x1xf32>
    %cst_8 = arith.constant 2.500000e-01 : f32
    %17 = vector.broadcast %cst_8 : f32 to vector<1x1xf32>
    %18 = arith.mulf %16, %17 : vector<1x1xf32>
    %cst_9 = arith.constant dense<0xFF800000> : vector<1xf32>
    %19 = vector.multi_reduction <maximumf>, %18, %cst_9 [1] : vector<1x1xf32> to vector<1xf32>
    %20 = vector.shape_cast %19 : vector<1xf32> to vector<1x1xf32>
    %21 = arith.subf %18, %20 : vector<1x1xf32>
    %22 = math.exp %21 : vector<1x1xf32>
    %cst_10 = arith.constant dense<0.000000e+00> : vector<1xf32>
    %23 = vector.multi_reduction <add>, %22, %cst_10 [1] : vector<1x1xf32> to vector<1xf32>
    %24 = vector.shape_cast %23 : vector<1xf32> to vector<1x1xf32>
    %25 = tpu.reciprocal %24 {approx = true} : vector<1x1xf32> -> vector<1x1xf32>
    %26 = arith.mulf %22, %25 : vector<1x1xf32>
    %27 = arith.truncf %26 : vector<1x1xf32> to vector<1x1xbf16>
    %cst_11 = arith.constant dense<0.000000e+00> : vector<1x16xf32>
    %28 = tpu.matmul %27, %11, %cst_11 {dimension_numbers = #tpu.dot_dimension_numbers<[1], [0], [0], [1], [0, 0, 1, 1], [], []>} : vector<1x1xbf16>, vector<1x16xbf16>, vector<1x16xf32> -> vector<1x16xf32>
    %29 = vector.extract_strided_slice %1 {offsets = [0, 16], sizes = [1, 16], strides = [1, 1]} : vector<1x32xf32> to vector<1x16xf32>
    %30 = arith.truncf %29 : vector<1x16xf32> to vector<1x16xbf16>
    %31 = vector.extract_strided_slice %3 {offsets = [0, 16], sizes = [1, 16], strides = [1, 1]} : vector<1x32xf32> to vector<1x16xf32>
    %32 = arith.truncf %31 : vector<1x16xf32> to vector<1x16xbf16>
    %33 = vector.extract_strided_slice %5 {offsets = [0, 16], sizes = [1, 16], strides = [1, 1]} : vector<1x32xf32> to vector<1x16xf32>
    %34 = arith.truncf %33 : vector<1x16xf32> to vector<1x16xbf16>
    %35 = arith.extf %30 : vector<1x16xbf16> to vector<1x16xf32>
    %36 = arith.extf %32 : vector<1x16xbf16> to vector<1x16xf32>
    %cst_12 = arith.constant dense<0.000000e+00> : vector<1xf32>
    %37 = arith.mulf %35, %36 : vector<1x16xf32>
    %38 = vector.multi_reduction <add>, %37, %cst_12 [1] : vector<1x16xf32> to vector<1xf32>
    %39 = vector.shape_cast %38 : vector<1xf32> to vector<1x1xf32>
    %cst_13 = arith.constant 2.500000e-01 : f32
    %40 = vector.broadcast %cst_13 : f32 to vector<1x1xf32>
    %41 = arith.mulf %39, %40 : vector<1x1xf32>
    %cst_14 = arith.constant dense<0xFF800000> : vector<1xf32>
    %42 = vector.multi_reduction <maximumf>, %41, %cst_14 [1] : vector<1x1xf32> to vector<1xf32>
    %43 = vector.shape_cast %42 : vector<1xf32> to vector<1x1xf32>
    %44 = arith.subf %41, %43 : vector<1x1xf32>
    %45 = math.exp %44 : vector<1x1xf32>
    %cst_15 = arith.constant dense<0.000000e+00> : vector<1xf32>
    %46 = vector.multi_reduction <add>, %45, %cst_15 [1] : vector<1x1xf32> to vector<1xf32>
    %47 = vector.shape_cast %46 : vector<1xf32> to vector<1x1xf32>
    %48 = tpu.reciprocal %47 {approx = true} : vector<1x1xf32> -> vector<1x1xf32>
    %49 = arith.mulf %45, %48 : vector<1x1xf32>
    %50 = arith.truncf %49 : vector<1x1xf32> to vector<1x1xbf16>
    %cst_16 = arith.constant dense<0.000000e+00> : vector<1x16xf32>
    %51 = tpu.matmul %50, %34, %cst_16 {dimension_numbers = #tpu.dot_dimension_numbers<[1], [0], [0], [1], [0, 0, 1, 1], [], []>} : vector<1x1xbf16>, vector<1x16xbf16>, vector<1x16xf32> -> vector<1x16xf32>
    %52 = tpu.concatenate %28, %51 in 1 : vector<1x16xf32>, vector<1x16xf32> -> vector<1x32xf32>
    %c0_17 = arith.constant 0 : index
    %c0_18 = arith.constant 0 : index
    %c0_19 = arith.constant 0 : index
    %53 = vector.load %arg4[%c0_17, %c0_18, %c0_19] : memref<1x1x32xf32, #tpu.memory_space<vmem>>, vector<1x1x32xf32>
    %54 = vector.shape_cast %53 : vector<1x1x32xf32> to vector<1x32xf32>
    %55 = vector.shape_cast %52 : vector<1x32xf32> to vector<1x1x32xf32>
    tpu.vector_store %arg4[%c0_17, %c0_18, %c0_19], %55 {strides = array<i32>} : memref<1x1x32xf32, #tpu.memory_space<vmem>>, vector<1x1x32xf32>,
    return
  }
  func.func @transform_0(%arg0: i32) -> (i32, i32, i32) {
    %c0_i32 = arith.constant 0 : i32
    %c0_i32_0 = arith.constant 0 : i32
    %c0_i32_1 = arith.constant 0 : i32
    return %arg0, %c0_i32, %c0_i32_0 : i32, i32, i32
  }
  func.func @transform_1(%arg0: i32) -> (i32, i32, i32) {
    %c0_i32 = arith.constant 0 : i32
    %c0_i32_0 = arith.constant 0 : i32
    %c0_i32_1 = arith.constant 0 : i32
    return %arg0, %c0_i32, %c0_i32_0 : i32, i32, i32
  }
  func.func @transform_2(%arg0: i32) -> (i32, i32, i32) {
    %c0_i32 = arith.constant 0 : i32
    %c0_i32_0 = arith.constant 0 : i32
    %c0_i32_1 = arith.constant 0 : i32
    return %arg0, %c0_i32, %c0_i32_0 : i32, i32, i32
  }
  func.func @transform_3(%arg0: i32) -> (i32, i32, i32) {
    %c0_i32 = arith.constant 0 : i32
    %c0_i32_0 = arith.constant 0 : i32
    %c0_i32_1 = arith.constant 0 : i32
    return %arg0, %c0_i32, %c0_i32_0 : i32, i32, i32
  }
}

module attributes {stable_mosaic.version = 11 : i64} {
  func.func @_fusion_head_kernel(%arg0: i32, %arg1: memref<2x64xf32, #tpu.memory_space<vmem>>, %arg2: memref<64x32xbf16, #tpu.memory_space<vmem>>, %arg3: memref<1x32xf32, #tpu.memory_space<vmem>>, %arg4: memref<32x16xbf16, #tpu.memory_space<vmem>>, %arg5: memref<1x16xf32, #tpu.memory_space<vmem>>, %arg6: memref<2x16xf32, #tpu.memory_space<vmem>>) attributes {dimension_semantics = [#tpu.dimension_semantics<parallel>], iteration_bounds = array<i64: 1>, scalar_prefetch = 0 : i64, scratch_operands = 0 : i64, tpu.core_type = #tpu.core_type<tc>, window_params = [{transform_indices = @transform_0, window_bounds = array<i64: 2, 64>}, {pipeline_mode = #tpu.pipeline_mode<synchronous>, transform_indices = @transform_1, window_bounds = array<i64: 64, 32>}, {pipeline_mode = #tpu.pipeline_mode<synchronous>, transform_indices = @transform_2, window_bounds = array<i64: 1, 32>}, {pipeline_mode = #tpu.pipeline_mode<synchronous>, transform_indices = @transform_3, window_bounds = array<i64: 32, 16>}, {pipeline_mode = #tpu.pipeline_mode<synchronous>, transform_indices = @transform_4, window_bounds = array<i64: 1, 16>}, {transform_indices = @transform_5, window_bounds = array<i64: 2, 16>}]} {
    %c0 = arith.constant 0 : index
    %c0_0 = arith.constant 0 : index
    %0 = vector.load %arg1[%c0, %c0_0] : memref<2x64xf32, #tpu.memory_space<vmem>>, vector<2x64xf32>
    %1 = arith.truncf %0 : vector<2x64xf32> to vector<2x64xbf16>
    %c0_1 = arith.constant 0 : index
    %c0_2 = arith.constant 0 : index
    %2 = vector.load %arg2[%c0_1, %c0_2] : memref<64x32xbf16, #tpu.memory_space<vmem>>, vector<64x32xbf16>
    %cst = arith.constant dense<0.000000e+00> : vector<2x32xf32>
    %3 = tpu.matmul %1, %2, %cst {dimension_numbers = #tpu.dot_dimension_numbers<[1], [0], [0], [1], [0, 0, 1, 1], [], []>} : vector<2x64xbf16>, vector<64x32xbf16>, vector<2x32xf32> -> vector<2x32xf32>
    %c0_3 = arith.constant 0 : index
    %c0_4 = arith.constant 0 : index
    %4 = vector.load %arg3[%c0_3, %c0_4] : memref<1x32xf32, #tpu.memory_space<vmem>>, vector<1x32xf32>
    %5 = vector.broadcast %4 : vector<1x32xf32> to vector<2x32xf32>
    %6 = arith.addf %3, %5 : vector<2x32xf32>
    %cst_5 = arith.constant 0.000000e+00 : f32
    %7 = vector.broadcast %cst_5 : f32 to vector<2x32xf32>
    %8 = arith.maximumf %6, %7 : vector<2x32xf32>
    %9 = arith.truncf %8 : vector<2x32xf32> to vector<2x32xbf16>
    %c0_6 = arith.constant 0 : index
    %c0_7 = arith.constant 0 : index
    %10 = vector.load %arg4[%c0_6, %c0_7] : memref<32x16xbf16, #tpu.memory_space<vmem>>, vector<32x16xbf16>
    %cst_8 = arith.constant dense<0.000000e+00> : vector<2x16xf32>
    %11 = tpu.matmul %9, %10, %cst_8 {dimension_numbers = #tpu.dot_dimension_numbers<[1], [0], [0], [1], [0, 0, 1, 1], [], []>} : vector<2x32xbf16>, vector<32x16xbf16>, vector<2x16xf32> -> vector<2x16xf32>
    %c0_9 = arith.constant 0 : index
    %c0_10 = arith.constant 0 : index
    %12 = vector.load %arg5[%c0_9, %c0_10] : memref<1x16xf32, #tpu.memory_space<vmem>>, vector<1x16xf32>
    %13 = vector.broadcast %12 : vector<1x16xf32> to vector<2x16xf32>
    %14 = arith.addf %11, %13 : vector<2x16xf32>
    %cst_11 = arith.constant dense<0xFF800000> : vector<2xf32>
    %15 = vector.multi_reduction <maximumf>, %14, %cst_11 [1] : vector<2x16xf32> to vector<2xf32>
    %16 = vector.shape_cast %15 : vector<2xf32> to vector<2x1xf32>
    %17 = vector.broadcast %16 : vector<2x1xf32> to vector<2x16xf32>
    %18 = arith.subf %14, %17 : vector<2x16xf32>
    %19 = math.exp %18 : vector<2x16xf32>
    %cst_12 = arith.constant dense<0.000000e+00> : vector<2xf32>
    %20 = vector.multi_reduction <add>, %19, %cst_12 [1] : vector<2x16xf32> to vector<2xf32>
    %21 = vector.shape_cast %20 : vector<2xf32> to vector<2x1xf32>
    %22 = tpu.reciprocal %21 {approx = true} : vector<2x1xf32> -> vector<2x1xf32>
    %23 = vector.broadcast %22 : vector<2x1xf32> to vector<2x16xf32>
    %24 = arith.mulf %19, %23 : vector<2x16xf32>
    %c0_13 = arith.constant 0 : index
    %c0_14 = arith.constant 0 : index
    %25 = vector.load %arg6[%c0_13, %c0_14] : memref<2x16xf32, #tpu.memory_space<vmem>>, vector<2x16xf32>
    tpu.vector_store %arg6[%c0_13, %c0_14], %24 {strides = array<i32>} : memref<2x16xf32, #tpu.memory_space<vmem>>, vector<2x16xf32>,
    return
  }
  func.func @transform_0(%arg0: i32) -> (i32, i32) {
    %c0_i32 = arith.constant 0 : i32
    %c0_i32_0 = arith.constant 0 : i32
    return %arg0, %c0_i32 : i32, i32
  }
  func.func @transform_1(%arg0: i32) -> (i32, i32) {
    %c0_i32 = arith.constant 0 : i32
    %c0_i32_0 = arith.constant 0 : i32
    %c0_i32_1 = arith.constant 0 : i32
    return %c0_i32, %c0_i32_0 : i32, i32
  }
  func.func @transform_2(%arg0: i32) -> (i32, i32) {
    %c0_i32 = arith.constant 0 : i32
    %c0_i32_0 = arith.constant 0 : i32
    %c0_i32_1 = arith.constant 0 : i32
    return %c0_i32, %c0_i32_0 : i32, i32
  }
  func.func @transform_3(%arg0: i32) -> (i32, i32) {
    %c0_i32 = arith.constant 0 : i32
    %c0_i32_0 = arith.constant 0 : i32
    %c0_i32_1 = arith.constant 0 : i32
    return %c0_i32, %c0_i32_0 : i32, i32
  }
  func.func @transform_4(%arg0: i32) -> (i32, i32) {
    %c0_i32 = arith.constant 0 : i32
    %c0_i32_0 = arith.constant 0 : i32
    %c0_i32_1 = arith.constant 0 : i32
    return %c0_i32, %c0_i32_0 : i32, i32
  }
  func.func @transform_5(%arg0: i32) -> (i32, i32) {
    %c0_i32 = arith.constant 0 : i32
    %c0_i32_0 = arith.constant 0 : i32
    return %arg0, %c0_i32 : i32, i32
  }
}

</mosaic_0001>

<bundles_post_ra>
// kernel: bivision_vqa_forward.36
= control target key start
LH: loop header
LB: loop body
LE: loop exit
PB: predicated region body
PF: predicated region fallthrough
CT: control target
= control target key end

     0   :  { %vm19_vm0 = vcmask 261120   ;;  %v214_v0 = vmov 0   ;;  %v215_v2 = vmov 0.0   ;;  %vm122_vm1 = vcmask 523264   ;;  %s287_s1 = inlined_call_operand.vmem [shape: bf16[192,32], index: 1, kind: input, shape index: {}]   ;;  %s288_s0 = inlined_call_operand.vmem [shape: f32[8,192], index: 0, kind: input, shape index: {}]   ;;  %s289_s2 = inlined_call_operand.vmem [shape: f32[1,32], index: 2, kind: input, shape index: {}]   ;;  %s290_s3 = inlined_call_operand.vmem [shape: f32[8,32], index: 3, kind: output, shape index: {}]  }
   0x1   :  { %126 = vmatprep.subr.bf16.mxu0 %v214_v0  ;;  %v202_v1 = vld [vmem:[%s287_s1] sm:$0xff]   ;;  %20 = vst.msk [vmem:[#allocation2] sm:$0xff] %vm19_vm0, %v215_v2  ;;  %v203_v3 = vld [vmem:[%s287_s1 + $0x8] sm:$0xff]   ;;  %v204_v4 = vld [vmem:[%s287_s1 + $0x10] sm:$0xff]  }
   0x2   :  { %127 = vmatpush1.bf16.msra.mxu0 %v202_v1  ;;  %v205_v5 = vld [vmem:[%s287_s1 + $0x18] sm:$0xff]   ;;  %v23_v6 = vld [vmem:[%s288_s0 + $0x8] sm:$0xff]  ;;  %v206_v8 = vld [vmem:[%s287_s1 + $0x20] sm:$0xff]  }
   0x3   :  { %128 = vmatprep.subr.bf16.mxu0 %v214_v0  ;;  %v25_v7 = vpack.c.bf16 %v23_v6, %v23_v6  ;;  %v207_v9 = vld [vmem:[%s287_s1 + $0x28] sm:$0xff]   ;;  %v208_v10 = vld [vmem:[%s287_s1 + $0x30] sm:$0xff]   ;;  %v209_v11 = vld [vmem:[%s287_s1 + $0x38] sm:$0xff]  }
   0x4   :  { %v210_v12 = vld [vmem:[%s287_s1 + $0x40] sm:$0xff]   ;;  %v211_v13 = vld [vmem:[%s287_s1 + $0x48] sm:$0xff]   ;;  %v212_v14 = vld [vmem:[%s287_s1 + $0x50] sm:$0xff]  }
   0x5   :  { %198 = vmatprep.mubr.msk.bf16.mxu0 %vm122_vm1, %v25_v7  ;;  %v213_v15 = vld [vmem:[%s287_s1 + $0x58] sm:$0xff]   ;;  %v22_v16 = vld [vmem:[%s288_s0] sm:$0xff] }
   0x6   :  { %129 = vmatpush1.bf16.msra.mxu0 %v203_v3  ;;  %v24_v17 = vpack.c.bf16 %v22_v16, %v22_v16  ;;  %v199_v24 = vld [vmem:[%s289_s2] ss:$0 sm:$0xff] }
   0x7   :  { %130 = vmatprep.subr.bf16.mxu0 %v214_v0 }
   0x8   :  { %v21_v18 = vld [vmem:[#allocation2] sm:$0xff] }
   0xa   :  { %131 = vmatpush1.bf16.msra.mxu0 %v204_v4 }
   0xb   :  { %132 = vmatprep.subr.bf16.mxu0 %v214_v0 }
   0xe   :  { %133 = vmatpush1.bf16.msra.mxu0 %v205_v5 }
   0xf   :  { %134 = vmatprep.subr.bf16.mxu0 %v214_v0 }
  0x12   :  { %135 = vmatpush1.bf16.msra.mxu0 %v206_v8 }
  0x13   :  { %136 = vmatprep.subr.bf16.mxu0 %v214_v0 }
  0x16   :  { %137 = vmatpush1.bf16.msra.mxu0 %v207_v9 }
  0x17   :  { %138 = vmatprep.subr.bf16.mxu0 %v214_v0 }
  0x1a   :  { %139 = vmatpush1.bf16.msra.mxu0 %v208_v10 }
  0x1b   :  { %140 = vmatprep.subr.bf16.mxu0 %v214_v0 }
  0x1e   :  { %141 = vmatpush1.bf16.msra.mxu0 %v209_v11 }
  0x1f   :  { %142 = vmatprep.subr.bf16.mxu0 %v214_v0 }
  0x22   :  { %143 = vmatpush1.bf16.msra.mxu0 %v210_v12 }
  0x23   :  { %144 = vmatprep.subr.bf16.mxu0 %v214_v0 }
  0x26   :  { %145 = vmatpush1.bf16.msra.mxu0 %v211_v13 }
  0x27   :  { %146 = vmatprep.subr.bf16.mxu0 %v214_v0 }
  0x2a   :  { %147 = vmatpush1.bf16.msra.mxu0 %v212_v14 }
  0x2b   :  { %148 = vmatprep.subr.bf16.mxu0 %v214_v0 }
  0x2e   :  { %149 = vmatpush1.bf16.msra.mxu0 %v213_v15 }
  0x31   :  { %159 = vmatmul.mubr.bf16.vlgmr.msra.gmra.mrb[0].mxu0 %v24_v17 }
 0x104   :  { %v160_v19 = vpop.f32.mrb[0].mxu0 }
 0x105   :  { %v166_v20 = vadd.f32 %v160_v19, %v21_v18  ;;  %v162_v21 = vpop.f32.mrb[1].mxu0 }
 0x106   :  { %v163_v22 = vpop.f32.mrb[2].mxu0 }
 0x107   :  { %168 = vst.msk [vmem:[#allocation2] sm:$0xff] %vm19_vm0, %v166_v20  ;;  %v164_v23 = vpop.f32.mrb[3].mxu0 }
 0x10e   :  { %v172_v25 = vld [vmem:[#allocation2] sm:$0xff] }
 0x10f   :  { %v180_v26 = vadd.f32 %v199_v24, %v172_v25 }
 0x111   :  { %181 = vst.msk [vmem:[%s290_s3] sm:$0xff] %vm19_vm0, %v180_v26 }

// kernel: bivision_vqa_forward.37
= control target key start
LH: loop header
LB: loop body
LE: loop exit
PB: predicated region body
PF: predicated region fallthrough
CT: control target
= control target key end

     0   :  { %vm23_vm0 = vcmask 261120   ;;  %vm27_vm1 = vcmask 254976   ;;  %v171_v15 = vmov 0.0   ;;  %vm172_vm2 = vmmov 0   ;;  %s233_s0 = inlined_call_operand.vmem [shape: f32[10,32], index: 0, kind: input, shape index: {}]   ;;  %s234_s3 = inlined_call_operand.vmem [shape: bf16[32,96], index: 3, kind: input, shape index: {}]   ;;  %s235_s1 = inlined_call_operand.vmem [shape: f32[1,32], index: 1, kind: input, shape index: {}]   ;;  %s236_s2 = inlined_call_operand.vmem [shape: f32[1,32], index: 2, kind: input, shape index: {}]   ;;  %s237_s4 = inlined_call_operand.vmem [shape: f32[1,96], index: 4, kind: input, shape index: {}]   ;;  %s238_s5 = inlined_call_operand.vmem [shape: f32[10,96], index: 5, kind: output, shape index: {}]  }
   0x1   :  { %v21_v0 = vld [vmem:[%s233_s0] sm:$0xff]  ;;  %v22_v1 = vld [vmem:[%s233_s0 + $0x8] sm:$0x3]  ;;  %155 = vmatprep.subr.bf16.mxu0 %v171_v15  ;;  %159 = vmatprep.mubr.msk.bf16.mxu0 %vm172_vm2, %v171_v15  ;;  %vm138_vm3 = vcmask 785408   ;;  %vm140_vm4 = vcmask 779264  }
   0x2   :  { %v24_v2 = vsel %vm23_vm0, %v21_v0, 0.0  ;;  %v28_v3 = vsel %vm27_vm1, %v22_v1, 0.0  ;;  %v165_v14 = vld [vmem:[%s234_s3] sm:$0xff]   ;;  %v166_v16 = vld [vmem:[%s234_s3 + $0x8] sm:$0xff]  }
   0x3   :  { %25 = vadd.xlane.f32.xlu0 %v24_v2  ;;  %156 = vmatpush3.bf16.msra.mxu0 %v165_v14  ;;  %v146_v25 = vld [vmem:[%s235_s1] ss:$0 sm:$0xff] }
   0x4   :  { %157 = vmatprep.subr.bf16.mxu0 %v171_v15  ;;  %v147_v29 = vld [vmem:[%s236_s2] ss:$0 sm:$0xff] }
   0x5   :  { %v148_v34 = vld [vmem:[%s237_s4] ss:$0 sm:$0xff] }
   0x7   :  { %29 = vadd.xlane.f32.xlu0 %v28_v3  ;;  %158 = vmatpush3.bf16.msra.mxu0 %v166_v16 }
  0x90   :  { %v26_v4 = vpop.xlane.xlu0 %25 }
  0x91   :  { %v32_v5 = vmul.f32 0.03125, %v26_v4 }
  0x93   :  { %v34_v6 = vsub.f32 %v21_v0, %v32_v5 }
  0x94   :  { %v30_v7 = vpop.xlane.xlu0 %29 }
  0x95   :  { %v33_v8 = vmul.f32 0.03125, %v30_v7  ;;  %v36_v9 = vmul.f32 %v34_v6, %v34_v6 }
  0x97   :  { %v35_v10 = vsub.f32 %v22_v1, %v33_v8  ;;  %v38_v11 = vsel %vm23_vm0, %v36_v9, 0.0 }
  0x98   :  { %39 = vadd.xlane.f32.xlu1 %v38_v11 }
  0x99   :  { %v37_v12 = vmul.f32 %v35_v10, %v35_v10 }
  0x9b   :  { %v41_v13 = vsel %vm27_vm1, %v37_v12, 0.0 }
  0x9c   :  { %42 = vadd.xlane.f32.xlu1 %v41_v13 }
 0x125   :  { %v40_v17 = vpop.xlane.xlu1 %39 }
 0x126   :  { %v44_v18 = vmul.f32 0.03125, %v40_v17 }
 0x128   :  { %v46_v19 = vadd.f32 1e-06, %v44_v18 }
 0x129   :  { %v43_v20 = vpop.xlane.xlu1 %42 }
 0x12a   :  { %167 = vrsqrt.f32 %v46_v19  ;;  %v45_v21 = vmul.f32 0.03125, %v43_v20 }
 0x12c   :  { %v47_v22 = vadd.f32 1e-06, %v45_v21 }
 0x12e   :  { %169 = vrsqrt.f32 %v47_v22 }
 0x134   :  { %v168_v23 = vpop.eup %167 }
 0x135   :  { %v50_v24 = vmul.f32 %v168_v23, %v34_v6 }
 0x137   :  { %v59_v28 = vmul.f32 %v146_v25, %v50_v24 }
 0x138   :  { %v170_v26 = vpop.eup %169 }
 0x139   :  { %v51_v27 = vmul.f32 %v170_v26, %v35_v10  ;;  %v68_v31 = vadd.f32 %v147_v29, %v59_v28 }
 0x13b   :  { %v60_v30 = vmul.f32 %v146_v25, %v51_v27 }
 0x13d   :  { %v69_v32 = vadd.f32 %v147_v29, %v60_v30 }
 0x13f   :  { %v70_v33 = vpack.c.bf16 %v69_v32, %v68_v31 }
 0x141   :  { %160 = vmatmul.mubr.msk.bf16.vlgmr.msra.gmra.mrb[0].mxu0 %vm23_vm0, %v70_v33 }
 0x214   :  { %v131_v35 = vpop.f32.mrb[0].mxu0 }
 0x215   :  { %v132_v36 = vadd.f32 %v148_v34, %v131_v35  ;;  %v161_v37 = vpop.f32.mrb[1].mxu0 }
 0x216   :  { %v134_v38 = vpop.f32.mrb[2].mxu0 }
 0x217   :  { %139 = vst.msk [vmem:[%s238_s5] sm:$0xff] %vm138_vm3, %v132_v36  ;;  %v135_v39 = vadd.f32 %v148_v34, %v134_v38  ;;  %v162_v40 = vpop.f32.mrb[3].mxu0 }
 0x219   :  { %141 = vst.msk [vmem:[%s238_s5 + $0x8] sm:$0x3] %vm140_vm4, %v135_v39 }

// kernel: bivision_vqa_forward.38
= control target key start
LH: loop header
LB: loop body
LE: loop exit
PB: predicated region body
PF: predicated region fallthrough
CT: control target
= control target key end

     0   :  { %s618_s12 = smov 0   ;;  %s665_s0 = inlined_call_operand.vmem [shape: f32[2,5,32], index: 0, kind: input, shape index: {}]   ;;  %s666_s1 = inlined_call_operand.vmem [shape: f32[2,5,32], index: 1, kind: input, shape index: {}]   ;;  %s667_s2 = inlined_call_operand.vmem [shape: f32[2,5,32], index: 2, kind: input, shape index: {}]   ;;  %s668_s3 = inlined_call_operand.vmem [shape: f32[2,5,32], index: 3, kind: output, shape index: {}]  }
   0x1 LB: > { %s517_s13 = sadd.s32 4294967295, %s591_s12   ;;  %p521_p0 = scmp.ge.s32.totalorder %s591_s12, 1  ;;  %s591_s12 = sphi %s618_s12, %s13_s12  }
   0x2   : > { %p154_p1 = scmp.lt.s32.totalorder %s591_s12, 3 }
   0x4   : > { %p155_p2 = pnand %p521_p0, %p154_p1 }
   0x5   : > { %p184_p3 = scmp.lt.s32.totalorder (!%p155_p2), %s517_s13, 1  ;;  %v593_v0 = vmov (!%p155_p2), 0.0   ;;  %vm594_vm0 = vmmov (!%p155_p2), 0   ;;  %vm207_vm1 = vcmask (!%p155_p2), 130048   ;;  %vm255_vm2 = vcmask (!%p155_p2), 36864   ;;  %s595_s21 = smov (!%p155_p2), 112  }
   0x6   : > { %158 = sbr.rel (%p155_p2) target bundleno = 1424 (0x590), region = 32  ;;  %540 = vmatprep.subr.bf16.mxu0 (!%p155_p2), %v593_v0  ;;  %542 = vmatprep.mubr.msk.bf16.mxu0 (!%p155_p2), %vm594_vm0, %v593_v0  ;;  %vm272_vm3 = vcmask (!%p155_p2), 1041408   ;;  %vm273_vm4 = vcmask (!%p155_p2), 1042432   ;;  %v596_v18 = vmov (!%p155_p2), 65535   ;;  %vm268_vm5 = vcmask (!%p155_p2), 39936   ;;  %s597_s25 = smov (!%p155_p2), 16  }
   0x7   : > { %546 = vmatprep.subr.bf16.mxu1 (!%p155_p2), %v593_v0  ;;  %548 = vmatprep.mubr.msk.bf16.mxu1 (!%p155_p2), %vm594_vm0, %v593_v0  ;;  %v274_v19 = vsel (!%p155_p2), %vm272_vm3, 4294967295, %v596_v18  ;;  %vm438_vm6 = vcmask (!%p155_p2), 258048  }
   0x8   : > { %v275_v21 = vsel (!%p155_p2), %vm273_vm4, %v274_v19, 0 }
   0xd   : > { %s670_s13 = smov (!%p184_p3, %s517_s13), 1 }
   0xe   : > { %s628_s14 = sshll.u32 %s670_s13, 3 }
   0xf   : > { %s191_s17 = scalar_lea.vmem %s666_s1, %s628_s14  ;;  %s187_s20 = scalar_lea.vmem %s665_s0, %s628_s14 }
  0x10   : > { %v202_v1 = vld [vmem:[%s191_s17] sm:$0x1f]  ;;  %s195_s24 = scalar_lea.vmem %s667_s2, %s628_s14  ;;  %s199_s28 = scalar_lea.vmem %s668_s3, %s628_s14 }
  0x11   : > { %v205_v2 = vpack.c.bf16 %v202_v1, %v202_v1  ;;  %v201_v4 = vld [vmem:[%s187_s20] sm:$0x1f] }
  0x12   : > { %v204_v5 = vpack.c.bf16 %v201_v4, %v201_v4  ;;  %v203_v17 = vld [vmem:[%s195_s24] sm:$0x1f] }
  0x13   : > { %v212_v3 = vsel %vm207_vm1, %v205_v2, 0  ;;  %323 = vrot.lane.b32.xlu1 %v205_v2, %s595_s21  ;;  %v206_v20 = vpack.c.bf16 %v203_v17, %v203_v17 }
  0x14   : > { %541 = vmatpush3.bf16.xpose.msra.mxu0 %v212_v3 }
  0x15   : > { %558 = vmatprep.subr.bf16.mxu0 %v593_v0  ;;  %v277_v22 = vand.u32 %v275_v21, %v206_v20 }
  0x17   : > { %320 = vrot.lane.b32.xlu1 %v204_v5, %s595_s21  ;;  %547 = vmatpush3.bf16.msra.mxu1 %v277_v22 }
  0x18   : > { %552 = vmatprep.subr.bf16.mxu1 %v593_v0 }
  0x1b   : > { %543 = vmatmul.mubr.msk.bf16.vlgmr.msra.gmra.mrb[0].mxu0 %vm207_vm1, %v204_v5 }
  0x1c   : > { %560 = vmatprep.mubr.msk.bf16.mxu0 %vm594_vm0, %v593_v0 }
  0x85   : > { %v324_v25 = vpop.permute.xlu1 %323 }
  0x86   : > { %v329_v27 = vsel %vm207_vm1, %v324_v25, 0 }
  0x89   : > { %v321_v29 = vpop.permute.xlu1 %320 }
  0xee   : > { %v248_v6 = vpop.f32.mrb[0].mxu0 }
  0xef   : > { %v254_v7 = vmul.f32 0.25, %v248_v6  ;;  %v544_v8 = vpop.f32.mrb[1].mxu0 }
  0xf0   : > { %v251_v9 = vpop.f32.mrb[2].mxu0 }
  0xf1   : > { %v545_v10 = vpop.f32.mrb[3].mxu0  ;;  %v256_v11 = vsel %vm255_vm2, %v254_v7, -inf }
  0xf2   : > { %257 = vmax.xlane.f32.xlu0 %v256_v11 }
 0x17f   : > { %v258_v12 = vpop.xlane.xlu0 %257 }
 0x180   : > { %v259_v13 = vsub.f32 %v254_v7, %v258_v12 }
 0x182   : > { %v260_v14 = vmul.f32 1.442695, %v259_v13 }
 0x184   : > { %577 = vpow2.f32 %v260_v14 }
 0x18e   : > { %v578_v15 = vpop.eup %577 }
 0x18f   : > { %v262_v16 = vsel %vm255_vm2, %v578_v15, 0.0 }
 0x190   : > { %263 = vadd.xlane.f32.xlu0 %v262_v16 }
 0x21d   : > { %v264_v23 = vpop.xlane.xlu0 %263 }
 0x21e   : > { %579 = vrcp.f32 %v264_v23 }
 0x228   : > { %v580_v24 = vpop.eup %579 }
 0x229   : > { %v266_v26 = vmul.f32 %v580_v24, %v578_v15 }
 0x22b   : > { %v267_v28 = vpack.c.bf16 %v266_v26, %v266_v26 }
 0x22d   : > { %549 = vmatmul.mubr.msk.bf16.vlgmr.msra.gmra.mrb[0].mxu1 %vm268_vm5, %v267_v28 }
 0x22e   : > { %553 = vmatpush3.bf16.xpose.msra.mxu1 %v329_v27  ;;  %554 = vmatprep.mubr.msk.bf16.mxu1 %vm594_vm0, %v593_v0 }
 0x235   : > { %555 = vmatmul.mubr.msk.bf16.vlgmr.msra.gmra.mrb[4].mxu1 %vm207_vm1, %v321_v29 }
 0x300   : > { %v313_v30 = vpop.f32.mrb[0].mxu1 }
 0x301   : > { %v550_v31 = vpop.f32.mrb[1].mxu1 }
 0x302   : > { %v316_v32 = vpop.f32.mrb[2].mxu1 }
 0x303   : > { %v551_v33 = vpop.f32.mrb[3].mxu1 }
 0x308   : > { %v365_v34 = vpop.f32.mrb[4].mxu1 }
 0x309   : > { %v371_v35 = vmul.f32 0.25, %v365_v34  ;;  %v556_v36 = vpop.f32.mrb[5].mxu1 }
 0x30a   : > { %v368_v37 = vpop.f32.mrb[6].mxu1 }
 0x30b   : > { %v557_v38 = vpop.f32.mrb[7].mxu1  ;;  %v372_v39 = vsel %vm255_vm2, %v371_v35, -inf }
 0x30c   : > { %373 = vmax.xlane.f32.xlu0 %v372_v39 }
 0x322   : > { %385 = vrot.lane.b32.xlu0 %v206_v20, %s595_s21 }
 0x399   : > { %v374_v40 = vpop.xlane.xlu0 %373 }
 0x39a   : > { %v375_v41 = vsub.f32 %v371_v35, %v374_v40 }
 0x39c   : > { %v376_v42 = vmul.f32 1.442695, %v375_v41 }
 0x39d   : > { %v386_v45 = vpop.permute.xlu0 %385 }
 0x39e   : > { %581 = vpow2.f32 %v376_v42  ;;  %v391_v46 = vand.u32 %v386_v45, %v275_v21 }
 0x3a0   : > { %559 = vmatpush3.bf16.msra.mxu0 %v391_v46 }
 0x3a8   : > { %v582_v43 = vpop.eup %581 }
 0x3a9   : > { %v378_v44 = vsel %vm255_vm2, %v582_v43, 0.0 }
 0x3aa   : > { %379 = vadd.xlane.f32.xlu1 %v378_v44 }
 0x437   : > { %v380_v47 = vpop.xlane.xlu1 %379 }
 0x438   : > { %583 = vrcp.f32 %v380_v47 }
 0x442   : > { %v584_v48 = vpop.eup %583 }
 0x443   : > { %v382_v49 = vmul.f32 %v584_v48, %v582_v43 }
 0x445   : > { %v383_v50 = vpack.c.bf16 %v382_v49, %v382_v49 }
 0x447   : > { %561 = vmatmul.mubr.msk.bf16.vlgmr.msra.gmra.mrb[4].mxu0 %vm268_vm5, %v383_v50 }
 0x51a   : > { %v427_v51 = vpop.f32.mrb[4].mxu0 }
 0x51b   : > { %434 = vrot.lane.b32.xlu0 %v427_v51, %s597_s25  ;;  %v562_v52 = vpop.f32.mrb[5].mxu0 }
 0x51c   : > { %v430_v53 = vpop.f32.mrb[6].mxu0 }
 0x51d   : > { %v563_v54 = vpop.f32.mrb[7].mxu0 }
 0x58d   : > { %v435_v55 = vpop.permute.xlu0 %434 }
 0x58e   : > { %v437_v56 = vsel %vm207_vm1, %v313_v30, %v435_v55 }
 0x58f   : > { %439 = vst.msk [vmem:[%s199_s28] sm:$0x1f] %vm438_vm6, %v437_v56 }
 0x590 PF: > { %s13_s12 = sadd.s32 1, %s591_s12  }
 0x591   : > { %p10_p4 = scmp.ge.s32.totalorder %s13_s12, 4  }
 0x593   :  { %12 = sbr.rel (!%p10_p4) target bundleno = 1 (0x1), region = 68 }

// kernel: bivision_vqa_forward.39
= control target key start
LH: loop header
LB: loop body
LE: loop exit
PB: predicated region body
PF: predicated region fallthrough
CT: control target
= control target key end

     0   :  { %vm19_vm0 = vcmask 261120   ;;  %v133_v0 = vmov 0.0   ;;  %vm134_vm1 = vmmov 0   ;;  %vm21_vm2 = vcmask 254976   ;;  %s183_s1 = inlined_call_operand.vmem [shape: bf16[32,32], index: 1, kind: input, shape index: {}]   ;;  %s184_s0 = inlined_call_operand.vmem [shape: f32[10,32], index: 0, kind: input, shape index: {}]   ;;  %s185_s2 = inlined_call_operand.vmem [shape: f32[1,32], index: 2, kind: input, shape index: {}]   ;;  %s186_s3 = inlined_call_operand.vmem [shape: f32[10,32], index: 3, kind: output, shape index: {}]  }
   0x1   :  { %121 = vmatprep.subr.bf16.mxu0 %v133_v0  ;;  %v131_v1 = vld [vmem:[%s183_s1] sm:$0xff]   ;;  %125 = vmatprep.mubr.msk.bf16.mxu0 %vm134_vm1, %v133_v0  ;;  %20 = vst.msk [vmem:[#allocation2] sm:$0xff] %vm19_vm0, %v133_v0  ;;  %v132_v2 = vld [vmem:[%s183_s1 + $0x8] sm:$0xff]  }
   0x2   :  { %122 = vmatpush3.bf16.msra.mxu0 %v131_v1  ;;  %v25_v3 = vld [vmem:[%s184_s0] sm:$0xff]  ;;  %v26_v4 = vld [vmem:[%s184_s0 + $0x8] sm:$0x3]  ;;  %22 = vst.msk [vmem:[#allocation2 + $0x8] sm:$0x3] %vm21_vm2, %v133_v0 }
   0x3   :  { %123 = vmatprep.subr.bf16.mxu0 %v133_v0  ;;  %v27_v5 = vpack.c.bf16 %v26_v4, %v25_v3  ;;  %v117_v14 = vld [vmem:[%s185_s2] ss:$0 sm:$0xff] }
   0x6   :  { %124 = vmatpush3.bf16.msra.mxu0 %v132_v2 }
   0x8   :  { %v23_v6 = vld [vmem:[#allocation2] sm:$0xff] }
   0x9   :  { %126 = vmatmul.mubr.msk.bf16.vlgmr.msra.gmra.mrb[0].mxu0 %vm19_vm0, %v27_v5  ;;  %v24_v8 = vld [vmem:[#allocation2 + $0x8] sm:$0x3] }
  0xdc   :  { %v82_v7 = vpop.f32.mrb[0].mxu0 }
  0xdd   :  { %v89_v9 = vadd.f32 %v82_v7, %v23_v6  ;;  %v127_v10 = vpop.f32.mrb[1].mxu0 }
  0xde   :  { %v85_v11 = vpop.f32.mrb[2].mxu0 }
  0xdf   :  { %91 = vst.msk [vmem:[#allocation2] sm:$0xff] %vm19_vm0, %v89_v9  ;;  %v90_v12 = vadd.f32 %v85_v11, %v24_v8  ;;  %v128_v13 = vpop.f32.mrb[3].mxu0 }
  0xe1   :  { %93 = vst.msk [vmem:[#allocation2 + $0x8] sm:$0x3] %vm21_vm2, %v90_v12 }
  0xe6   :  { %v97_v15 = vld [vmem:[#allocation2] sm:$0xff] }
  0xe7   :  { %v106_v16 = vadd.f32 %v117_v14, %v97_v15 }
  0xe8   :  { %v98_v17 = vld [vmem:[#allocation2 + $0x8] sm:$0x3] }
  0xe9   :  { %v107_v18 = vadd.f32 %v117_v14, %v98_v17  ;;  %108 = vst.msk [vmem:[%s186_s3] sm:$0xff] %vm19_vm0, %v106_v16 }
  0xeb   :  { %109 = vst.msk [vmem:[%s186_s3 + $0x8] sm:$0x3] %vm21_vm2, %v107_v18 }

// kernel: bivision_vqa_forward.41
= control target key start
LH: loop header
LB: loop body
LE: loop exit
PB: predicated region body
PF: predicated region fallthrough
CT: control target
= control target key end

     0   :  { %vm19_vm0 = vcmask 261120   ;;  %v207_v0 = vmov 0.0   ;;  %vm208_vm1 = vmmov 0   ;;  %vm21_vm2 = vcmask 254976   ;;  %s274_s1 = inlined_call_operand.vmem [shape: bf16[128,32], index: 1, kind: input, shape index: {}]   ;;  %s275_s0 = inlined_call_operand.vmem [shape: f32[10,128], index: 0, kind: input, shape index: {}]   ;;  %s276_s2 = inlined_call_operand.vmem [shape: f32[1,32], index: 2, kind: input, shape index: {}]   ;;  %s277_s3 = inlined_call_operand.vmem [shape: f32[10,32], index: 3, kind: output, shape index: {}]  }
   0x1   :  { %177 = vmatprep.subr.bf16.mxu0 %v207_v0  ;;  %v199_v1 = vld [vmem:[%s274_s1] sm:$0xff]   ;;  %193 = vmatprep.mubr.msk.bf16.mxu0 %vm208_vm1, %v207_v0  ;;  %20 = vst.msk [vmem:[#allocation2] sm:$0xff] %vm19_vm0, %v207_v0  ;;  %v200_v2 = vld [vmem:[%s274_s1 + $0x8] sm:$0xff]   ;;  %v201_v3 = vld [vmem:[%s274_s1 + $0x10] sm:$0xff]  }
   0x2   :  { %178 = vmatpush3.bf16.msra.mxu0 %v199_v1  ;;  %v202_v4 = vld [vmem:[%s274_s1 + $0x18] sm:$0xff]   ;;  %v203_v5 = vld [vmem:[%s274_s1 + $0x20] sm:$0xff]   ;;  %v204_v6 = vld [vmem:[%s274_s1 + $0x28] sm:$0xff]   ;;  %22 = vst.msk [vmem:[#allocation2 + $0x8] sm:$0x3] %vm21_vm2, %v207_v0 }
   0x3   :  { %179 = vmatprep.subr.bf16.mxu0 %v207_v0  ;;  %v205_v7 = vld [vmem:[%s274_s1 + $0x30] sm:$0xff]   ;;  %v206_v8 = vld [vmem:[%s274_s1 + $0x38] sm:$0xff]   ;;  %v25_v9 = vld [vmem:[%s275_s0] sm:$0xff] }
   0x4   :  { %v26_v10 = vld [vmem:[%s275_s0 + $0x8] sm:$0x3]  ;;  %v167_v20 = vld [vmem:[%s276_s2] ss:$0 sm:$0xff] }
   0x5   :  { %v27_v11 = vpack.c.bf16 %v26_v10, %v25_v9 }
   0x6   :  { %180 = vmatpush3.bf16.msra.mxu0 %v200_v2 }
   0x7   :  { %181 = vmatprep.subr.bf16.mxu0 %v207_v0 }
   0x8   :  { %v23_v12 = vld [vmem:[#allocation2] sm:$0xff] }
   0x9   :  { %v24_v14 = vld [vmem:[#allocation2 + $0x8] sm:$0x3] }
   0xa   :  { %182 = vmatpush3.bf16.msra.mxu0 %v201_v3 }
   0xb   :  { %183 = vmatprep.subr.bf16.mxu0 %v207_v0 }
   0xe   :  { %184 = vmatpush3.bf16.msra.mxu0 %v202_v4 }
   0xf   :  { %185 = vmatprep.subr.bf16.mxu0 %v207_v0 }
  0x12   :  { %186 = vmatpush3.bf16.msra.mxu0 %v203_v5 }
  0x13   :  { %187 = vmatprep.subr.bf16.mxu0 %v207_v0 }
  0x16   :  { %188 = vmatpush3.bf16.msra.mxu0 %v204_v6 }
  0x17   :  { %189 = vmatprep.subr.bf16.mxu0 %v207_v0 }
  0x1a   :  { %190 = vmatpush3.bf16.msra.mxu0 %v205_v7 }
  0x1b   :  { %191 = vmatprep.subr.bf16.mxu0 %v207_v0 }
  0x1e   :  { %192 = vmatpush3.bf16.msra.mxu0 %v206_v8 }
  0x21   :  { %194 = vmatmul.mubr.bf16.vlgmr.msra.gmra.mrb[0].mxu0 %v27_v11 }
  0xf4   :  { %v126_v13 = vpop.f32.mrb[0].mxu0 }
  0xf5   :  { %v133_v15 = vadd.f32 %v126_v13, %v23_v12  ;;  %v195_v16 = vpop.f32.mrb[1].mxu0 }
  0xf6   :  { %v129_v17 = vpop.f32.mrb[2].mxu0 }
  0xf7   :  { %136 = vst.msk [vmem:[#allocation2] sm:$0xff] %vm19_vm0, %v133_v15  ;;  %v134_v18 = vadd.f32 %v129_v17, %v24_v14  ;;  %v196_v19 = vpop.f32.mrb[3].mxu0 }
  0xf9   :  { %138 = vst.msk [vmem:[#allocation2 + $0x8] sm:$0x3] %vm21_vm2, %v134_v18 }
  0xfe   :  { %v142_v21 = vld [vmem:[#allocation2] sm:$0xff] }
  0xff   :  { %v151_v22 = vadd.f32 %v167_v20, %v142_v21 }
 0x100   :  { %v143_v23 = vld [vmem:[#allocation2 + $0x8] sm:$0x3] }
 0x101   :  { %153 = vst.msk [vmem:[%s277_s3] sm:$0xff] %vm19_vm0, %v151_v22  ;;  %v152_v24 = vadd.f32 %v167_v20, %v143_v23 }
 0x103   :  { %154 = vst.msk [vmem:[%s277_s3 + $0x8] sm:$0x3] %vm21_vm2, %v152_v24 }

// kernel: bivision_vqa_forward.47
= control target key start
LH: loop header
LB: loop body
LE: loop exit
PB: predicated region body
PF: predicated region fallthrough
CT: control target
= control target key end

     0   :  { %vm16_vm0 = vcmask 261120   ;;  %vm20_vm1 = vcmask 254976   ;;  %s119_s0 = inlined_call_operand.vmem [shape: f32[10,32], index: 0, kind: input, shape index: {}]   ;;  %s120_s1 = inlined_call_operand.vmem [shape: f32[1,32], index: 1, kind: input, shape index: {}]   ;;  %s121_s2 = inlined_call_operand.vmem [shape: f32[1,32], index: 2, kind: input, shape index: {}]   ;;  %s122_s3 = inlined_call_operand.vmem [shape: f32[10,32], index: 3, kind: output, shape index: {}]  }
   0x1   :  { %v14_v0 = vld [vmem:[%s119_s0] sm:$0xff]  ;;  %v15_v1 = vld [vmem:[%s119_s0 + $0x8] sm:$0x3] }
   0x2   :  { %v17_v2 = vsel %vm16_vm0, %v14_v0, 0.0  ;;  %v21_v3 = vsel %vm20_vm1, %v15_v1, 0.0  ;;  %v69_v21 = vld [vmem:[%s120_s1] ss:$0 sm:$0xff] }
   0x3   :  { %18 = vadd.xlane.f32.xlu0 %v17_v2  ;;  %v70_v23 = vld [vmem:[%s121_s2] ss:$0 sm:$0xff] }
   0x7   :  { %22 = vadd.xlane.f32.xlu0 %v21_v3 }
  0x90   :  { %v19_v4 = vpop.xlane.xlu0 %18 }
  0x91   :  { %v25_v5 = vmul.f32 0.03125, %v19_v4 }
  0x93   :  { %v27_v6 = vsub.f32 %v14_v0, %v25_v5 }
  0x94   :  { %v23_v7 = vpop.xlane.xlu0 %22 }
  0x95   :  { %v26_v8 = vmul.f32 0.03125, %v23_v7  ;;  %v29_v9 = vmul.f32 %v27_v6, %v27_v6 }
  0x97   :  { %v28_v10 = vsub.f32 %v15_v1, %v26_v8  ;;  %v31_v11 = vsel %vm16_vm0, %v29_v9, 0.0 }
  0x98   :  { %32 = vadd.xlane.f32.xlu1 %v31_v11 }
  0x99   :  { %v30_v12 = vmul.f32 %v28_v10, %v28_v10 }
  0x9b   :  { %v34_v13 = vsel %vm20_vm1, %v30_v12, 0.0 }
  0x9c   :  { %35 = vadd.xlane.f32.xlu1 %v34_v13 }
 0x125   :  { %v33_v14 = vpop.xlane.xlu1 %32 }
 0x126   :  { %v37_v15 = vmul.f32 0.03125, %v33_v14 }
 0x128   :  { %v39_v16 = vadd.f32 1e-06, %v37_v15 }
 0x129   :  { %v36_v17 = vpop.xlane.xlu1 %35 }
 0x12a   :  { %71 = vrsqrt.f32 %v39_v16  ;;  %v38_v18 = vmul.f32 0.03125, %v36_v17 }
 0x12c   :  { %v40_v19 = vadd.f32 1e-06, %v38_v18 }
 0x12e   :  { %73 = vrsqrt.f32 %v40_v19 }
 0x134   :  { %v72_v20 = vpop.eup %71 }
 0x135   :  { %v43_v22 = vmul.f32 %v72_v20, %v27_v6 }
 0x137   :  { %v52_v24 = vmul.f32 %v69_v21, %v43_v22 }
 0x138   :  { %v74_v25 = vpop.eup %73 }
 0x139   :  { %v61_v26 = vadd.f32 %v70_v23, %v52_v24  ;;  %v44_v27 = vmul.f32 %v74_v25, %v28_v10 }
 0x13b   :  { %63 = vst.msk [vmem:[%s122_s3] sm:$0xff] %vm16_vm0, %v61_v26  ;;  %v53_v28 = vmul.f32 %v69_v21, %v44_v27 }
 0x13d   :  { %v62_v29 = vadd.f32 %v70_v23, %v53_v28 }
 0x13f   :  { %64 = vst.msk [vmem:[%s122_s3 + $0x8] sm:$0x3] %vm20_vm1, %v62_v29 }

// kernel: bivision_vqa_forward.40
= control target key start
LH: loop header
LB: loop body
LE: loop exit
PB: predicated region body
PF: predicated region fallthrough
CT: control target
= control target key end

     0   :  { %vm23_vm0 = vcmask 261120   ;;  %vm27_vm1 = vcmask 254976   ;;  %v191_v15 = vmov 0.0   ;;  %vm192_vm2 = vmmov 0   ;;  %s253_s0 = inlined_call_operand.vmem [shape: f32[10,32], index: 0, kind: input, shape index: {}]   ;;  %s254_s3 = inlined_call_operand.vmem [shape: bf16[32,128], index: 3, kind: input, shape index: {}]   ;;  %s255_s1 = inlined_call_operand.vmem [shape: f32[1,32], index: 1, kind: input, shape index: {}]   ;;  %s256_s2 = inlined_call_operand.vmem [shape: f32[1,32], index: 2, kind: input, shape index: {}]   ;;  %s257_s4 = inlined_call_operand.vmem [shape: f32[1,128], index: 4, kind: input, shape index: {}]   ;;  %s258_s5 = inlined_call_operand.vmem [shape: f32[10,128], index: 5, kind: output, shape index: {}]  }
   0x1   :  { %v21_v0 = vld [vmem:[%s253_s0] sm:$0xff]  ;;  %v22_v1 = vld [vmem:[%s253_s0 + $0x8] sm:$0x3]  ;;  %171 = vmatprep.subr.bf16.mxu0 %v191_v15  ;;  %175 = vmatprep.mubr.msk.bf16.mxu0 %vm192_vm2, %v191_v15 }
   0x2   :  { %v24_v2 = vsel %vm23_vm0, %v21_v0, 0.0  ;;  %v28_v3 = vsel %vm27_vm1, %v22_v1, 0.0  ;;  %v181_v14 = vld [vmem:[%s254_s3] sm:$0xff]   ;;  %v182_v16 = vld [vmem:[%s254_s3 + $0x8] sm:$0xff]  }
   0x3   :  { %25 = vadd.xlane.f32.xlu0 %v24_v2  ;;  %172 = vmatpush3.bf16.msra.mxu0 %v181_v14  ;;  %v162_v25 = vld [vmem:[%s255_s1] ss:$0 sm:$0xff] }
   0x4   :  { %173 = vmatprep.subr.bf16.mxu0 %v191_v15  ;;  %v163_v29 = vld [vmem:[%s256_s2] ss:$0 sm:$0xff] }
   0x5   :  { %v164_v34 = vld [vmem:[%s257_s4] ss:$0 sm:$0xff] }
   0x7   :  { %29 = vadd.xlane.f32.xlu0 %v28_v3  ;;  %174 = vmatpush3.bf16.msra.mxu0 %v182_v16 }
  0x90   :  { %v26_v4 = vpop.xlane.xlu0 %25 }
  0x91   :  { %v32_v5 = vmul.f32 0.03125, %v26_v4 }
  0x93   :  { %v34_v6 = vsub.f32 %v21_v0, %v32_v5 }
  0x94   :  { %v30_v7 = vpop.xlane.xlu0 %29 }
  0x95   :  { %v33_v8 = vmul.f32 0.03125, %v30_v7  ;;  %v36_v9 = vmul.f32 %v34_v6, %v34_v6 }
  0x97   :  { %v35_v10 = vsub.f32 %v22_v1, %v33_v8  ;;  %v38_v11 = vsel %vm23_vm0, %v36_v9, 0.0 }
  0x98   :  { %39 = vadd.xlane.f32.xlu1 %v38_v11 }
  0x99   :  { %v37_v12 = vmul.f32 %v35_v10, %v35_v10 }
  0x9b   :  { %v41_v13 = vsel %vm27_vm1, %v37_v12, 0.0 }
  0x9c   :  { %42 = vadd.xlane.f32.xlu1 %v41_v13 }
 0x125   :  { %v40_v17 = vpop.xlane.xlu1 %39 }
 0x126   :  { %v44_v18 = vmul.f32 0.03125, %v40_v17 }
 0x128   :  { %v46_v19 = vadd.f32 1e-06, %v44_v18 }
 0x129   :  { %v43_v20 = vpop.xlane.xlu1 %42 }
 0x12a   :  { %183 = vrsqrt.f32 %v46_v19  ;;  %v45_v21 = vmul.f32 0.03125, %v43_v20 }
 0x12c   :  { %v47_v22 = vadd.f32 1e-06, %v45_v21 }
 0x12e   :  { %185 = vrsqrt.f32 %v47_v22 }
 0x134   :  { %v184_v23 = vpop.eup %183 }
 0x135   :  { %v50_v24 = vmul.f32 %v184_v23, %v34_v6 }
 0x137   :  { %v59_v28 = vmul.f32 %v162_v25, %v50_v24 }
 0x138   :  { %v186_v26 = vpop.eup %185 }
 0x139   :  { %v51_v27 = vmul.f32 %v186_v26, %v35_v10  ;;  %v68_v31 = vadd.f32 %v163_v29, %v59_v28 }
 0x13b   :  { %v60_v30 = vmul.f32 %v162_v25, %v51_v27 }
 0x13d   :  { %v69_v32 = vadd.f32 %v163_v29, %v60_v30 }
 0x13f   :  { %v70_v33 = vpack.c.bf16 %v69_v32, %v68_v31 }
 0x141   :  { %176 = vmatmul.mubr.msk.bf16.vlgmr.msra.gmra.mrb[0].mxu0 %vm23_vm0, %v70_v33 }
 0x214   :  { %v131_v35 = vpop.f32.mrb[0].mxu0 }
 0x215   :  { %v132_v36 = vadd.f32 %v164_v34, %v131_v35  ;;  %v177_v37 = vpop.f32.mrb[1].mxu0 }
 0x216   :  { %v134_v38 = vpop.f32.mrb[2].mxu0 }
 0x217   :  { %v138_v39 = vmul.f32 %v132_v36, %v132_v36  ;;  %v135_v40 = vadd.f32 %v164_v34, %v134_v38  ;;  %v178_v41 = vpop.f32.mrb[3].mxu0 }
 0x219   :  { %v140_v42 = vmul.f32 %v138_v39, %v132_v36  ;;  %v139_v43 = vmul.f32 %v135_v40, %v135_v40 }
 0x21b   :  { %v142_v44 = vmul.f32 0.044715, %v140_v42  ;;  %v141_v45 = vmul.f32 %v139_v43, %v135_v40 }
 0x21d   :  { %v144_v46 = vadd.f32 %v142_v44, %v132_v36  ;;  %v143_v47 = vmul.f32 0.044715, %v141_v45 }
 0x21f   :  { %v146_v48 = vmul.f32 0.7978846, %v144_v46  ;;  %v145_v49 = vadd.f32 %v143_v47, %v135_v40 }
 0x221   :  { %187 = vtanh.f32 %v146_v48  ;;  %v147_v50 = vmul.f32 0.7978846, %v145_v49 }
 0x223   :  { %189 = vtanh.f32 %v147_v50 }
 0x22b   :  { %v188_v51 = vpop.eup %187 }
 0x22c   :  { %v150_v52 = vadd.f32 1.0, %v188_v51 }
 0x22d   :  { %v190_v53 = vpop.eup %189 }
 0x22e   :  { %v152_v54 = vmul.f32 0.5, %v150_v52  ;;  %v151_v55 = vadd.f32 1.0, %v190_v53 }
 0x230   :  { %v154_v56 = vmul.f32 %v152_v54, %v132_v36  ;;  %v153_v57 = vmul.f32 0.5, %v151_v55 }
 0x232   :  { %156 = vst [vmem:[%s258_s5] sm:$0xff] %v154_v56  ;;  %v155_v58 = vmul.f32 %v153_v57, %v135_v40 }
 0x234   :  { %157 = vst [vmem:[%s258_s5 + $0x8] sm:$0x3] %v155_v58 }

// kernel: bivision_vqa_forward.64
= control target key start
LH: loop header
LB: loop body
LE: loop exit
PB: predicated region body
PF: predicated region fallthrough
CT: control target
= control target key end

     0   :  { %vm19_vm0 = vcmask 523264   ;;  %v123_v0 = vmov 0.0   ;;  %vm124_vm1 = vmmov 0   ;;  %vm40_vm2 = vcmask 261120   ;;  %s163_s1 = inlined_call_operand.vmem [shape: bf16[32,64], index: 1, kind: input, shape index: {}]   ;;  %s164_s0 = inlined_call_operand.vmem [shape: f32[8,32], index: 0, kind: input, shape index: {}]   ;;  %s165_s2 = inlined_call_operand.vmem [shape: f32[1,64], index: 2, kind: input, shape index: {}]   ;;  %s166_s3 = inlined_call_operand.vmem [shape: f32[8,64], index: 3, kind: output, shape index: {}]  }
   0x1   :  { %20 = vst.msk [vmem:[#allocation2] sm:$0xff] %vm19_vm0, %v123_v0  ;;  %111 = vmatprep.subr.bf16.mxu0 %v123_v0  ;;  %v121_v1 = vld [vmem:[%s163_s1] sm:$0xff]   ;;  %115 = vmatprep.mubr.msk.bf16.mxu0 %vm124_vm1, %v123_v0  ;;  %v122_v2 = vld [vmem:[%s163_s1 + $0x8] sm:$0xff]  }
   0x2   :  { %112 = vmatpush3.bf16.msra.mxu0 %v121_v1  ;;  %v22_v3 = vld [vmem:[%s164_s0] sm:$0xff] }
   0x3   :  { %113 = vmatprep.subr.bf16.mxu0 %v123_v0  ;;  %v23_v4 = vpack.c.bf16 %v22_v3, %v22_v3  ;;  %v107_v11 = vld [vmem:[%s165_s2] ss:$0 sm:$0xff] }
   0x6   :  { %114 = vmatpush3.bf16.msra.mxu0 %v122_v2 }
   0x8   :  { %v21_v5 = vld [vmem:[#allocation2] sm:$0xff] }
   0x9   :  { %116 = vmatmul.mubr.msk.bf16.vlgmr.msra.gmra.mrb[0].mxu0 %vm40_vm2, %v23_v4 }
  0xdc   :  { %v78_v6 = vpop.f32.mrb[0].mxu0 }
  0xdd   :  { %v84_v7 = vadd.f32 %v78_v6, %v21_v5  ;;  %v117_v8 = vpop.f32.mrb[1].mxu0 }
  0xde   :  { %v81_v9 = vpop.f32.mrb[2].mxu0 }
  0xdf   :  { %86 = vst.msk [vmem:[#allocation2] sm:$0xff] %vm19_vm0, %v84_v7  ;;  %v118_v10 = vpop.f32.mrb[3].mxu0 }
  0xe6   :  { %v90_v12 = vld [vmem:[#allocation2] sm:$0xff] }
  0xe7   :  { %v98_v13 = vadd.f32 %v107_v11, %v90_v12 }
  0xe9   :  { %99 = vst.msk [vmem:[%s166_s3] sm:$0xff] %vm19_vm0, %v98_v13 }

// kernel: bivision_vqa_forward.48
= control target key start
LH: loop header
LB: loop body
LE: loop exit
PB: predicated region body
PF: predicated region fallthrough
CT: control target
= control target key end

     0   :  { %vm16_vm0 = vcmask 261120   ;;  %s118_s0 = inlined_call_operand.vmem [shape: f32[16,32], index: 0, kind: input, shape index: {}]   ;;  %s119_s1 = inlined_call_operand.vmem [shape: f32[1,32], index: 1, kind: input, shape index: {}]   ;;  %s120_s2 = inlined_call_operand.vmem [shape: f32[1,32], index: 2, kind: input, shape index: {}]   ;;  %s121_s3 = inlined_call_operand.vmem [shape: f32[16,32], index: 3, kind: output, shape index: {}]  }
   0x1   :  { %v14_v0 = vld [vmem:[%s118_s0] sm:$0xff]  ;;  %v15_v1 = vld [vmem:[%s118_s0 + $0x8] sm:$0xff] }
   0x2   :  { %v17_v2 = vsel %vm16_vm0, %v14_v0, 0.0  ;;  %v20_v3 = vsel %vm16_vm0, %v15_v1, 0.0  ;;  %v68_v21 = vld [vmem:[%s119_s1] ss:$0 sm:$0xff] }
   0x3   :  { %18 = vadd.xlane.f32.xlu0 %v17_v2  ;;  %v69_v23 = vld [vmem:[%s120_s2] ss:$0 sm:$0xff] }
   0x7   :  { %21 = vadd.xlane.f32.xlu0 %v20_v3 }
  0x90   :  { %v19_v4 = vpop.xlane.xlu0 %18 }
  0x91   :  { %v24_v5 = vmul.f32 0.03125, %v19_v4 }
  0x93   :  { %v26_v6 = vsub.f32 %v14_v0, %v24_v5 }
  0x94   :  { %v22_v7 = vpop.xlane.xlu0 %21 }
  0x95   :  { %v25_v8 = vmul.f32 0.03125, %v22_v7  ;;  %v28_v9 = vmul.f32 %v26_v6, %v26_v6 }
  0x97   :  { %v27_v10 = vsub.f32 %v15_v1, %v25_v8  ;;  %v30_v11 = vsel %vm16_vm0, %v28_v9, 0.0 }
  0x98   :  { %31 = vadd.xlane.f32.xlu1 %v30_v11 }
  0x99   :  { %v29_v12 = vmul.f32 %v27_v10, %v27_v10 }
  0x9b   :  { %v33_v13 = vsel %vm16_vm0, %v29_v12, 0.0 }
  0x9c   :  { %34 = vadd.xlane.f32.xlu1 %v33_v13 }
 0x125   :  { %v32_v14 = vpop.xlane.xlu1 %31 }
 0x126   :  { %v36_v15 = vmul.f32 0.03125, %v32_v14 }
 0x128   :  { %v38_v16 = vadd.f32 1e-12, %v36_v15 }
 0x129   :  { %v35_v17 = vpop.xlane.xlu1 %34 }
 0x12a   :  { %70 = vrsqrt.f32 %v38_v16  ;;  %v37_v18 = vmul.f32 0.03125, %v35_v17 }
 0x12c   :  { %v39_v19 = vadd.f32 1e-12, %v37_v18 }
 0x12e   :  { %72 = vrsqrt.f32 %v39_v19 }
 0x134   :  { %v71_v20 = vpop.eup %70 }
 0x135   :  { %v42_v22 = vmul.f32 %v71_v20, %v26_v6 }
 0x137   :  { %v51_v24 = vmul.f32 %v68_v21, %v42_v22 }
 0x138   :  { %v73_v25 = vpop.eup %72 }
 0x139   :  { %v60_v26 = vadd.f32 %v69_v23, %v51_v24  ;;  %v43_v27 = vmul.f32 %v73_v25, %v27_v10 }
 0x13b   :  { %62 = vst.msk [vmem:[%s121_s3] sm:$0xff] %vm16_vm0, %v60_v26  ;;  %v52_v28 = vmul.f32 %v68_v21, %v43_v27 }
 0x13d   :  { %v61_v29 = vadd.f32 %v69_v23, %v52_v28 }
 0x13f   :  { %63 = vst.msk [vmem:[%s121_s3 + $0x8] sm:$0xff] %vm16_vm0, %v61_v29 }

// kernel: bivision_vqa_forward.49
= control target key start
LH: loop header
LB: loop body
LE: loop exit
PB: predicated region body
PF: predicated region fallthrough
CT: control target
= control target key end

     0   :  { %vm19_vm0 = vcmask 785408   ;;  %v132_v0 = vmov 0.0   ;;  %vm133_vm1 = vmmov 0   ;;  %vm43_vm2 = vcmask 261120   ;;  %s181_s1 = inlined_call_operand.vmem [shape: bf16[32,96], index: 1, kind: input, shape index: {}]   ;;  %s182_s0 = inlined_call_operand.vmem [shape: f32[16,32], index: 0, kind: input, shape index: {}]   ;;  %s183_s2 = inlined_call_operand.vmem [shape: f32[1,96], index: 2, kind: input, shape index: {}]   ;;  %s184_s3 = inlined_call_operand.vmem [shape: f32[16,96], index: 3, kind: output, shape index: {}]  }
   0x1   :  { %120 = vmatprep.subr.bf16.mxu0 %v132_v0  ;;  %v130_v1 = vld [vmem:[%s181_s1] sm:$0xff]   ;;  %124 = vmatprep.mubr.msk.bf16.mxu0 %vm133_vm1, %v132_v0  ;;  %20 = vst.msk [vmem:[#allocation2] sm:$0xff] %vm19_vm0, %v132_v0  ;;  %21 = vst.msk [vmem:[#allocation2 + $0x8] sm:$0xff] %vm19_vm0, %v132_v0  ;;  %v131_v2 = vld [vmem:[%s181_s1 + $0x8] sm:$0xff]  }
   0x2   :  { %121 = vmatpush3.bf16.msra.mxu0 %v130_v1  ;;  %v24_v3 = vld [vmem:[%s182_s0] sm:$0xff]  ;;  %v25_v4 = vld [vmem:[%s182_s0 + $0x8] sm:$0xff] }
   0x3   :  { %122 = vmatprep.subr.bf16.mxu0 %v132_v0  ;;  %v26_v5 = vpack.c.bf16 %v25_v4, %v24_v3  ;;  %v116_v14 = vld [vmem:[%s183_s2] ss:$0 sm:$0xff] }
   0x6   :  { %123 = vmatpush3.bf16.msra.mxu0 %v131_v2 }
   0x8   :  { %v22_v6 = vld [vmem:[#allocation2] sm:$0xff]  ;;  %v23_v8 = vld [vmem:[#allocation2 + $0x8] sm:$0xff] }
   0x9   :  { %125 = vmatmul.mubr.msk.bf16.vlgmr.msra.gmra.mrb[0].mxu0 %vm43_vm2, %v26_v5 }
  0xdc   :  { %v81_v7 = vpop.f32.mrb[0].mxu0 }
  0xdd   :  { %v88_v9 = vadd.f32 %v81_v7, %v22_v6  ;;  %v126_v10 = vpop.f32.mrb[1].mxu0 }
  0xde   :  { %v84_v11 = vpop.f32.mrb[2].mxu0 }
  0xdf   :  { %91 = vst.msk [vmem:[#allocation2] sm:$0xff] %vm19_vm0, %v88_v9  ;;  %v89_v12 = vadd.f32 %v84_v11, %v23_v8  ;;  %v127_v13 = vpop.f32.mrb[3].mxu0 }
  0xe1   :  { %92 = vst.msk [vmem:[#allocation2 + $0x8] sm:$0xff] %vm19_vm0, %v89_v12 }
  0xe6   :  { %v96_v15 = vld [vmem:[#allocation2] sm:$0xff] }
  0xe7   :  { %v105_v16 = vadd.f32 %v116_v14, %v96_v15 }
  0xe8   :  { %v97_v17 = vld [vmem:[#allocation2 + $0x8] sm:$0xff] }
  0xe9   :  { %107 = vst.msk [vmem:[%s184_s3] sm:$0xff] %vm19_vm0, %v105_v16  ;;  %v106_v18 = vadd.f32 %v116_v14, %v97_v17 }
  0xeb   :  { %108 = vst.msk [vmem:[%s184_s3 + $0x8] sm:$0xff] %vm19_vm0, %v106_v18 }

// kernel: bivision_vqa_forward.51
= control target key start
LH: loop header
LB: loop body
LE: loop exit
PB: predicated region body
PF: predicated region fallthrough
CT: control target
= control target key end

     0   :  { %vm19_vm0 = vcmask 261120   ;;  %v131_v0 = vmov 0.0   ;;  %vm132_vm1 = vmmov 0   ;;  %s181_s1 = inlined_call_operand.vmem [shape: bf16[32,32], index: 1, kind: input, shape index: {}]   ;;  %s182_s0 = inlined_call_operand.vmem [shape: f32[16,32], index: 0, kind: input, shape index: {}]   ;;  %s183_s2 = inlined_call_operand.vmem [shape: f32[1,32], index: 2, kind: input, shape index: {}]   ;;  %s184_s3 = inlined_call_operand.vmem [shape: f32[16,32], index: 3, kind: output, shape index: {}]  }
   0x1   :  { %119 = vmatprep.subr.bf16.mxu0 %v131_v0  ;;  %v129_v1 = vld [vmem:[%s181_s1] sm:$0xff]   ;;  %123 = vmatprep.mubr.msk.bf16.mxu0 %vm132_vm1, %v131_v0  ;;  %20 = vst.msk [vmem:[#allocation2] sm:$0xff] %vm19_vm0, %v131_v0  ;;  %21 = vst.msk [vmem:[#allocation2 + $0x8] sm:$0xff] %vm19_vm0, %v131_v0  ;;  %v130_v2 = vld [vmem:[%s181_s1 + $0x8] sm:$0xff]  }
   0x2   :  { %120 = vmatpush3.bf16.msra.mxu0 %v129_v1  ;;  %v24_v3 = vld [vmem:[%s182_s0] sm:$0xff]  ;;  %v25_v4 = vld [vmem:[%s182_s0 + $0x8] sm:$0xff] }
   0x3   :  { %121 = vmatprep.subr.bf16.mxu0 %v131_v0  ;;  %v26_v5 = vpack.c.bf16 %v25_v4, %v24_v3  ;;  %v115_v14 = vld [vmem:[%s183_s2] ss:$0 sm:$0xff] }
   0x6   :  { %122 = vmatpush3.bf16.msra.mxu0 %v130_v2 }
   0x8   :  { %v22_v6 = vld [vmem:[#allocation2] sm:$0xff]  ;;  %v23_v8 = vld [vmem:[#allocation2 + $0x8] sm:$0xff] }
   0x9   :  { %124 = vmatmul.mubr.msk.bf16.vlgmr.msra.gmra.mrb[0].mxu0 %vm19_vm0, %v26_v5 }
  0xdc   :  { %v81_v7 = vpop.f32.mrb[0].mxu0 }
  0xdd   :  { %v88_v9 = vadd.f32 %v81_v7, %v22_v6  ;;  %v125_v10 = vpop.f32.mrb[1].mxu0 }
  0xde   :  { %v84_v11 = vpop.f32.mrb[2].mxu0 }
  0xdf   :  { %90 = vst.msk [vmem:[#allocation2] sm:$0xff] %vm19_vm0, %v88_v9  ;;  %v89_v12 = vadd.f32 %v84_v11, %v23_v8  ;;  %v126_v13 = vpop.f32.mrb[3].mxu0 }
  0xe1   :  { %91 = vst.msk [vmem:[#allocation2 + $0x8] sm:$0xff] %vm19_vm0, %v89_v12 }
  0xe6   :  { %v95_v15 = vld [vmem:[#allocation2] sm:$0xff] }
  0xe7   :  { %v104_v16 = vadd.f32 %v115_v14, %v95_v15 }
  0xe8   :  { %v96_v17 = vld [vmem:[#allocation2 + $0x8] sm:$0xff] }
  0xe9   :  { %106 = vst.msk [vmem:[%s184_s3] sm:$0xff] %vm19_vm0, %v104_v16  ;;  %v105_v18 = vadd.f32 %v115_v14, %v96_v17 }
  0xeb   :  { %107 = vst.msk [vmem:[%s184_s3 + $0x8] sm:$0xff] %vm19_vm0, %v105_v18 }

// kernel: bivision_vqa_forward.50
= control target key start
LH: loop header
LB: loop body
LE: loop exit
PB: predicated region body
PF: predicated region fallthrough
CT: control target
= control target key end

     0   :  { %s612_s12 = smov 0   ;;  %s661_s0 = inlined_call_operand.vmem [shape: f32[2,8,32], index: 0, kind: input, shape index: {}]   ;;  %s662_s1 = inlined_call_operand.vmem [shape: f32[2,8,32], index: 1, kind: input, shape index: {}]   ;;  %s663_s2 = inlined_call_operand.vmem [shape: f32[2,8,32], index: 2, kind: input, shape index: {}]   ;;  %s664_s3 = inlined_call_operand.vmem [shape: f32[2,8,32], index: 3, kind: output, shape index: {}]  }
   0x1 LB: > { %s513_s13 = sadd.s32 4294967295, %s586_s12   ;;  %p517_p0 = scmp.ge.s32.totalorder %s586_s12, 1  ;;  %s586_s12 = sphi %s612_s12, %s13_s12  }
   0x2   : > { %p154_p1 = scmp.lt.s32.totalorder %s586_s12, 3 }
   0x4   : > { %p155_p2 = pnand %p517_p0, %p154_p1 }
   0x5   : > { %p184_p3 = scmp.lt.s32.totalorder (!%p155_p2), %s513_s13, 1  ;;  %v588_v0 = vmov (!%p155_p2), 0.0   ;;  %vm589_vm0 = vmmov (!%p155_p2), 0   ;;  %vm207_vm1 = vcmask (!%p155_p2), 130048   ;;  %vm255_vm2 = vcmask (!%p155_p2), 64512   ;;  %s590_s21 = smov (!%p155_p2), 112  }
   0x6   : > { %158 = sbr.rel (%p155_p2) target bundleno = 1424 (0x590), region = 32  ;;  %536 = vmatprep.subr.bf16.mxu0 (!%p155_p2), %v588_v0  ;;  %538 = vmatprep.mubr.msk.bf16.mxu0 (!%p155_p2), %vm589_vm0, %v588_v0  ;;  %vm271_vm3 = vcmask (!%p155_p2), 1043456   ;;  %s591_s25 = smov (!%p155_p2), 16   ;;  %vm434_vm4 = vcmask (!%p155_p2), 261120  }
   0x7   : > { %542 = vmatprep.subr.bf16.mxu1 (!%p155_p2), %v588_v0  ;;  %544 = vmatprep.mubr.msk.bf16.mxu1 (!%p155_p2), %vm589_vm0, %v588_v0 }
   0xd   : > { %s666_s13 = smov (!%p184_p3, %s513_s13), 1 }
   0xe   : > { %s622_s14 = sshll.u32 %s666_s13, 3 }
   0xf   : > { %s191_s17 = scalar_lea.vmem %s662_s1, %s622_s14  ;;  %s187_s20 = scalar_lea.vmem %s661_s0, %s622_s14 }
  0x10   : > { %v202_v1 = vld [vmem:[%s191_s17] sm:$0xff]  ;;  %s195_s24 = scalar_lea.vmem %s663_s2, %s622_s14  ;;  %s199_s28 = scalar_lea.vmem %s664_s3, %s622_s14 }
  0x11   : > { %v205_v2 = vpack.c.bf16 %v202_v1, %v202_v1  ;;  %v201_v4 = vld [vmem:[%s187_s20] sm:$0xff] }
  0x12   : > { %v204_v5 = vpack.c.bf16 %v201_v4, %v201_v4  ;;  %v203_v17 = vld [vmem:[%s195_s24] sm:$0xff] }
  0x13   : > { %v212_v3 = vsel %vm207_vm1, %v205_v2, 0  ;;  %319 = vrot.lane.b32.xlu1 %v205_v2, %s590_s21  ;;  %v206_v18 = vpack.c.bf16 %v203_v17, %v203_v17 }
  0x14   : > { %537 = vmatpush3.bf16.xpose.msra.mxu0 %v212_v3 }
  0x15   : > { %554 = vmatprep.subr.bf16.mxu0 %v588_v0  ;;  %v273_v19 = vsel %vm271_vm3, %v206_v18, 0 }
  0x16   : > { %543 = vmatpush3.bf16.msra.mxu1 %v273_v19 }
  0x17   : > { %316 = vrot.lane.b32.xlu1 %v204_v5, %s590_s21  ;;  %548 = vmatprep.subr.bf16.mxu1 %v588_v0 }
  0x1b   : > { %539 = vmatmul.mubr.msk.bf16.vlgmr.msra.gmra.mrb[0].mxu0 %vm207_vm1, %v204_v5 }
  0x1c   : > { %556 = vmatprep.mubr.msk.bf16.mxu0 %vm589_vm0, %v588_v0 }
  0x85   : > { %v320_v22 = vpop.permute.xlu1 %319 }
  0x86   : > { %v325_v24 = vsel %vm207_vm1, %v320_v22, 0 }
  0x89   : > { %v317_v26 = vpop.permute.xlu1 %316 }
  0xee   : > { %v248_v6 = vpop.f32.mrb[0].mxu0 }
  0xef   : > { %v254_v7 = vmul.f32 0.25, %v248_v6  ;;  %v540_v8 = vpop.f32.mrb[1].mxu0 }
  0xf0   : > { %v251_v9 = vpop.f32.mrb[2].mxu0 }
  0xf1   : > { %v541_v10 = vpop.f32.mrb[3].mxu0  ;;  %v256_v11 = vsel %vm255_vm2, %v254_v7, -inf }
  0xf2   : > { %257 = vmax.xlane.f32.xlu0 %v256_v11 }
 0x17f   : > { %v258_v12 = vpop.xlane.xlu0 %257 }
 0x180   : > { %v259_v13 = vsub.f32 %v254_v7, %v258_v12 }
 0x182   : > { %v260_v14 = vmul.f32 1.442695, %v259_v13 }
 0x184   : > { %572 = vpow2.f32 %v260_v14 }
 0x18e   : > { %v573_v15 = vpop.eup %572 }
 0x18f   : > { %v262_v16 = vsel %vm255_vm2, %v573_v15, 0.0 }
 0x190   : > { %263 = vadd.xlane.f32.xlu0 %v262_v16 }
 0x21d   : > { %v264_v20 = vpop.xlane.xlu0 %263 }
 0x21e   : > { %574 = vrcp.f32 %v264_v20 }
 0x228   : > { %v575_v21 = vpop.eup %574 }
 0x229   : > { %v266_v23 = vmul.f32 %v575_v21, %v573_v15 }
 0x22b   : > { %v267_v25 = vpack.c.bf16 %v266_v23, %v266_v23 }
 0x22d   : > { %545 = vmatmul.mubr.msk.bf16.vlgmr.msra.gmra.mrb[0].mxu1 %vm255_vm2, %v267_v25 }
 0x22e   : > { %549 = vmatpush3.bf16.xpose.msra.mxu1 %v325_v24  ;;  %550 = vmatprep.mubr.msk.bf16.mxu1 %vm589_vm0, %v588_v0 }
 0x235   : > { %551 = vmatmul.mubr.msk.bf16.vlgmr.msra.gmra.mrb[4].mxu1 %vm207_vm1, %v317_v26 }
 0x300   : > { %v309_v27 = vpop.f32.mrb[0].mxu1 }
 0x301   : > { %v546_v28 = vpop.f32.mrb[1].mxu1 }
 0x302   : > { %v312_v29 = vpop.f32.mrb[2].mxu1 }
 0x303   : > { %v547_v30 = vpop.f32.mrb[3].mxu1 }
 0x308   : > { %v361_v31 = vpop.f32.mrb[4].mxu1 }
 0x309   : > { %v367_v32 = vmul.f32 0.25, %v361_v31  ;;  %v552_v33 = vpop.f32.mrb[5].mxu1 }
 0x30a   : > { %v364_v34 = vpop.f32.mrb[6].mxu1 }
 0x30b   : > { %v553_v35 = vpop.f32.mrb[7].mxu1  ;;  %v368_v36 = vsel %vm255_vm2, %v367_v32, -inf }
 0x30c   : > { %369 = vmax.xlane.f32.xlu0 %v368_v36 }
 0x322   : > { %381 = vrot.lane.b32.xlu0 %v206_v18, %s590_s21 }
 0x399   : > { %v370_v37 = vpop.xlane.xlu0 %369 }
 0x39a   : > { %v371_v38 = vsub.f32 %v367_v32, %v370_v37 }
 0x39c   : > { %v372_v39 = vmul.f32 1.442695, %v371_v38 }
 0x39d   : > { %v382_v42 = vpop.permute.xlu0 %381 }
 0x39e   : > { %576 = vpow2.f32 %v372_v39  ;;  %v387_v43 = vsel %vm271_vm3, %v382_v42, 0 }
 0x39f   : > { %555 = vmatpush3.bf16.msra.mxu0 %v387_v43 }
 0x3a8   : > { %v577_v40 = vpop.eup %576 }
 0x3a9   : > { %v374_v41 = vsel %vm255_vm2, %v577_v40, 0.0 }
 0x3aa   : > { %375 = vadd.xlane.f32.xlu1 %v374_v41 }
 0x437   : > { %v376_v44 = vpop.xlane.xlu1 %375 }
 0x438   : > { %578 = vrcp.f32 %v376_v44 }
 0x442   : > { %v579_v45 = vpop.eup %578 }
 0x443   : > { %v378_v46 = vmul.f32 %v579_v45, %v577_v40 }
 0x445   : > { %v379_v47 = vpack.c.bf16 %v378_v46, %v378_v46 }
 0x447   : > { %557 = vmatmul.mubr.msk.bf16.vlgmr.msra.gmra.mrb[4].mxu0 %vm255_vm2, %v379_v47 }
 0x51a   : > { %v423_v48 = vpop.f32.mrb[4].mxu0 }
 0x51b   : > { %430 = vrot.lane.b32.xlu0 %v423_v48, %s591_s25  ;;  %v558_v49 = vpop.f32.mrb[5].mxu0 }
 0x51c   : > { %v426_v50 = vpop.f32.mrb[6].mxu0 }
 0x51d   : > { %v559_v51 = vpop.f32.mrb[7].mxu0 }
 0x58d   : > { %v431_v52 = vpop.permute.xlu0 %430 }
 0x58e   : > { %v433_v53 = vsel %vm207_vm1, %v309_v27, %v431_v52 }
 0x58f   : > { %435 = vst.msk [vmem:[%s199_s28] sm:$0xff] %vm434_vm4, %v433_v53 }
 0x590 PF: > { %s13_s12 = sadd.s32 1, %s586_s12  }
 0x591   : > { %p10_p4 = scmp.ge.s32.totalorder %s13_s12, 4  }
 0x593   :  { %12 = sbr.rel (!%p10_p4) target bundleno = 1 (0x1), region = 68 }

// kernel: bivision_vqa_forward.52
= control target key start
LH: loop header
LB: loop body
LE: loop exit
PB: predicated region body
PF: predicated region fallthrough
CT: control target
= control target key end

     0   :  { %vm23_vm0 = vcmask 261120   ;;  %s136_s0 = inlined_call_operand.vmem [shape: f32[16,32], index: 0, kind: input, shape index: {}]   ;;  %s137_s1 = inlined_call_operand.vmem [shape: f32[16,32], index: 1, kind: input, shape index: {}]   ;;  %s138_s2 = inlined_call_operand.vmem [shape: f32[1,32], index: 2, kind: input, shape index: {}]   ;;  %s139_s3 = inlined_call_operand.vmem [shape: f32[1,32], index: 3, kind: input, shape index: {}]   ;;  %s140_s4 = inlined_call_operand.vmem [shape: f32[16,32], index: 4, kind: output, shape index: {}]  }
   0x1   :  { %v17_v0 = vld [vmem:[%s136_s0] sm:$0xff]  ;;  %v18_v2 = vld [vmem:[%s136_s0 + $0x8] sm:$0xff] }
   0x2   :  { %v19_v1 = vld [vmem:[%s137_s1] sm:$0xff]  ;;  %v20_v4 = vld [vmem:[%s137_s1 + $0x8] sm:$0xff] }
   0x3   :  { %v21_v3 = vadd.f32 %v19_v1, %v17_v0  ;;  %v22_v5 = vadd.f32 %v20_v4, %v18_v2  ;;  %v75_v25 = vld [vmem:[%s138_s2] ss:$0 sm:$0xff] }
   0x4   :  { %v76_v27 = vld [vmem:[%s139_s3] ss:$0 sm:$0xff] }
   0x5   :  { %v24_v6 = vsel %vm23_vm0, %v21_v3, 0.0  ;;  %v27_v7 = vsel %vm23_vm0, %v22_v5, 0.0 }
   0x6   :  { %25 = vadd.xlane.f32.xlu0 %v24_v6 }
   0xa   :  { %28 = vadd.xlane.f32.xlu0 %v27_v7 }
  0x93   :  { %v26_v8 = vpop.xlane.xlu0 %25 }
  0x94   :  { %v31_v9 = vmul.f32 0.03125, %v26_v8 }
  0x96   :  { %v33_v10 = vsub.f32 %v21_v3, %v31_v9 }
  0x97   :  { %v29_v11 = vpop.xlane.xlu0 %28 }
  0x98   :  { %v32_v12 = vmul.f32 0.03125, %v29_v11  ;;  %v35_v13 = vmul.f32 %v33_v10, %v33_v10 }
  0x9a   :  { %v34_v14 = vsub.f32 %v22_v5, %v32_v12  ;;  %v37_v15 = vsel %vm23_vm0, %v35_v13, 0.0 }
  0x9b   :  { %38 = vadd.xlane.f32.xlu1 %v37_v15 }
  0x9c   :  { %v36_v16 = vmul.f32 %v34_v14, %v34_v14 }
  0x9e   :  { %v40_v17 = vsel %vm23_vm0, %v36_v16, 0.0 }
  0x9f   :  { %41 = vadd.xlane.f32.xlu1 %v40_v17 }
 0x128   :  { %v39_v18 = vpop.xlane.xlu1 %38 }
 0x129   :  { %v43_v19 = vmul.f32 0.03125, %v39_v18 }
 0x12b   :  { %v45_v20 = vadd.f32 1e-12, %v43_v19 }
 0x12c   :  { %v42_v21 = vpop.xlane.xlu1 %41 }
 0x12d   :  { %77 = vrsqrt.f32 %v45_v20  ;;  %v44_v22 = vmul.f32 0.03125, %v42_v21 }
 0x12f   :  { %v46_v23 = vadd.f32 1e-12, %v44_v22 }
 0x131   :  { %79 = vrsqrt.f32 %v46_v23 }
 0x137   :  { %v78_v24 = vpop.eup %77 }
 0x138   :  { %v49_v26 = vmul.f32 %v78_v24, %v33_v10 }
 0x13a   :  { %v58_v28 = vmul.f32 %v75_v25, %v49_v26 }
 0x13b   :  { %v80_v29 = vpop.eup %79 }
 0x13c   :  { %v67_v30 = vadd.f32 %v76_v27, %v58_v28  ;;  %v50_v31 = vmul.f32 %v80_v29, %v34_v14 }
 0x13e   :  { %69 = vst.msk [vmem:[%s140_s4] sm:$0xff] %vm23_vm0, %v67_v30  ;;  %v59_v32 = vmul.f32 %v75_v25, %v50_v31 }
 0x140   :  { %v68_v33 = vadd.f32 %v76_v27, %v59_v32 }
 0x142   :  { %70 = vst.msk [vmem:[%s140_s4 + $0x8] sm:$0xff] %vm23_vm0, %v68_v33 }

// kernel: bivision_vqa_forward.53
= control target key start
LH: loop header
LB: loop body
LE: loop exit
PB: predicated region body
PF: predicated region fallthrough
CT: control target
= control target key end

     0   :  { %v152_v0 = vmov 0.0   ;;  %vm153_vm0 = vmmov 0   ;;  %vm42_vm1 = vcmask 261120   ;;  %s195_s1 = inlined_call_operand.vmem [shape: bf16[32,128], index: 1, kind: input, shape index: {}]   ;;  %s196_s0 = inlined_call_operand.vmem [shape: f32[16,32], index: 0, kind: input, shape index: {}]   ;;  %s197_s2 = inlined_call_operand.vmem [shape: f32[1,128], index: 2, kind: input, shape index: {}]   ;;  %s198_s3 = inlined_call_operand.vmem [shape: f32[16,128], index: 3, kind: output, shape index: {}]  }
   0x1   :  { %136 = vmatprep.subr.bf16.mxu0 %v152_v0  ;;  %v146_v1 = vld [vmem:[%s195_s1] sm:$0xff]   ;;  %140 = vmatprep.mubr.msk.bf16.mxu0 %vm153_vm0, %v152_v0  ;;  %v147_v2 = vld [vmem:[%s195_s1 + $0x8] sm:$0xff]  }
   0x2   :  { %137 = vmatpush3.bf16.msra.mxu0 %v146_v1  ;;  %v23_v3 = vld [vmem:[%s196_s0] sm:$0xff]  ;;  %v24_v4 = vld [vmem:[%s196_s0 + $0x8] sm:$0xff] }
   0x3   :  { %138 = vmatprep.subr.bf16.mxu0 %v152_v0  ;;  %v25_v5 = vpack.c.bf16 %v24_v4, %v23_v3  ;;  %v132_v6 = vld [vmem:[%s197_s2] ss:$0 sm:$0xff] }
   0x6   :  { %139 = vmatpush3.bf16.msra.mxu0 %v147_v2 }
   0x9   :  { %141 = vmatmul.mubr.msk.bf16.vlgmr.msra.gmra.mrb[0].mxu0 %vm42_vm1, %v25_v5 }
  0xdc   :  { %v80_v7 = vpop.f32.mrb[0].mxu0 }
  0xdd   :  { %v103_v8 = vadd.f32 %v132_v6, %v80_v7  ;;  %v142_v9 = vpop.f32.mrb[1].mxu0 }
  0xde   :  { %v83_v10 = vpop.f32.mrb[2].mxu0 }
  0xdf   :  { %v105_v11 = vmul.f32 %v103_v8, %v103_v8  ;;  %v104_v12 = vadd.f32 %v132_v6, %v83_v10  ;;  %v143_v13 = vpop.f32.mrb[3].mxu0 }
  0xe1   :  { %v107_v14 = vmul.f32 %v105_v11, %v103_v8  ;;  %v106_v15 = vmul.f32 %v104_v12, %v104_v12 }
  0xe3   :  { %v109_v16 = vmul.f32 0.044715, %v107_v14  ;;  %v108_v17 = vmul.f32 %v106_v15, %v104_v12 }
  0xe5   :  { %v111_v18 = vadd.f32 %v109_v16, %v103_v8  ;;  %v110_v19 = vmul.f32 0.044715, %v108_v17 }
  0xe7   :  { %v113_v20 = vmul.f32 0.7978846, %v111_v18  ;;  %v112_v21 = vadd.f32 %v110_v19, %v104_v12 }
  0xe9   :  { %148 = vtanh.f32 %v113_v20  ;;  %v114_v22 = vmul.f32 0.7978846, %v112_v21 }
  0xeb   :  { %150 = vtanh.f32 %v114_v22 }
  0xf3   :  { %v149_v23 = vpop.eup %148 }
  0xf4   :  { %v117_v24 = vadd.f32 1.0, %v149_v23 }
  0xf5   :  { %v151_v25 = vpop.eup %150 }
  0xf6   :  { %v119_v26 = vmul.f32 0.5, %v117_v24  ;;  %v118_v27 = vadd.f32 1.0, %v151_v25 }
  0xf8   :  { %v121_v28 = vmul.f32 %v119_v26, %v103_v8  ;;  %v120_v29 = vmul.f32 0.5, %v118_v27 }
  0xfa   :  { %123 = vst [vmem:[%s198_s3] sm:$0xff] %v121_v28  ;;  %v122_v30 = vmul.f32 %v120_v29, %v104_v12 }
  0xfc   :  { %124 = vst [vmem:[%s198_s3 + $0x8] sm:$0xff] %v122_v30 }

// kernel: bivision_vqa_forward.54
= control target key start
LH: loop header
LB: loop body
LE: loop exit
PB: predicated region body
PF: predicated region fallthrough
CT: control target
= control target key end

     0   :  { %vm19_vm0 = vcmask 261120   ;;  %v205_v0 = vmov 0.0   ;;  %vm206_vm1 = vmmov 0   ;;  %s272_s1 = inlined_call_operand.vmem [shape: bf16[128,32], index: 1, kind: input, shape index: {}]   ;;  %s273_s0 = inlined_call_operand.vmem [shape: f32[16,128], index: 0, kind: input, shape index: {}]   ;;  %s274_s2 = inlined_call_operand.vmem [shape: f32[1,32], index: 2, kind: input, shape index: {}]   ;;  %s275_s3 = inlined_call_operand.vmem [shape: f32[16,32], index: 3, kind: output, shape index: {}]  }
   0x1   :  { %175 = vmatprep.subr.bf16.mxu0 %v205_v0  ;;  %v197_v1 = vld [vmem:[%s272_s1] sm:$0xff]   ;;  %191 = vmatprep.mubr.msk.bf16.mxu0 %vm206_vm1, %v205_v0  ;;  %20 = vst.msk [vmem:[#allocation2] sm:$0xff] %vm19_vm0, %v205_v0  ;;  %21 = vst.msk [vmem:[#allocation2 + $0x8] sm:$0xff] %vm19_vm0, %v205_v0  ;;  %v198_v2 = vld [vmem:[%s272_s1 + $0x8] sm:$0xff]  }
   0x2   :  { %176 = vmatpush3.bf16.msra.mxu0 %v197_v1  ;;  %v199_v3 = vld [vmem:[%s272_s1 + $0x10] sm:$0xff]   ;;  %v200_v4 = vld [vmem:[%s272_s1 + $0x18] sm:$0xff]   ;;  %v201_v5 = vld [vmem:[%s272_s1 + $0x20] sm:$0xff]  }
   0x3   :  { %177 = vmatprep.subr.bf16.mxu0 %v205_v0  ;;  %v202_v6 = vld [vmem:[%s272_s1 + $0x28] sm:$0xff]   ;;  %v203_v7 = vld [vmem:[%s272_s1 + $0x30] sm:$0xff]   ;;  %v204_v8 = vld [vmem:[%s272_s1 + $0x38] sm:$0xff]  }
   0x4   :  { %v24_v9 = vld [vmem:[%s273_s0] sm:$0xff]  ;;  %v25_v10 = vld [vmem:[%s273_s0 + $0x8] sm:$0xff] }
   0x5   :  { %v26_v11 = vpack.c.bf16 %v25_v10, %v24_v9  ;;  %v165_v20 = vld [vmem:[%s274_s2] ss:$0 sm:$0xff] }
   0x6   :  { %178 = vmatpush3.bf16.msra.mxu0 %v198_v2 }
   0x7   :  { %179 = vmatprep.subr.bf16.mxu0 %v205_v0 }
   0x8   :  { %v22_v12 = vld [vmem:[#allocation2] sm:$0xff]  ;;  %v23_v14 = vld [vmem:[#allocation2 + $0x8] sm:$0xff] }
   0xa   :  { %180 = vmatpush3.bf16.msra.mxu0 %v199_v3 }
   0xb   :  { %181 = vmatprep.subr.bf16.mxu0 %v205_v0 }
   0xe   :  { %182 = vmatpush3.bf16.msra.mxu0 %v200_v4 }
   0xf   :  { %183 = vmatprep.subr.bf16.mxu0 %v205_v0 }
  0x12   :  { %184 = vmatpush3.bf16.msra.mxu0 %v201_v5 }
  0x13   :  { %185 = vmatprep.subr.bf16.mxu0 %v205_v0 }
  0x16   :  { %186 = vmatpush3.bf16.msra.mxu0 %v202_v6 }
  0x17   :  { %187 = vmatprep.subr.bf16.mxu0 %v205_v0 }
  0x1a   :  { %188 = vmatpush3.bf16.msra.mxu0 %v203_v7 }
  0x1b   :  { %189 = vmatprep.subr.bf16.mxu0 %v205_v0 }
  0x1e   :  { %190 = vmatpush3.bf16.msra.mxu0 %v204_v8 }
  0x21   :  { %192 = vmatmul.mubr.bf16.vlgmr.msra.gmra.mrb[0].mxu0 %v26_v11 }
  0xf4   :  { %v125_v13 = vpop.f32.mrb[0].mxu0 }
  0xf5   :  { %v132_v15 = vadd.f32 %v125_v13, %v22_v12  ;;  %v193_v16 = vpop.f32.mrb[1].mxu0 }
  0xf6   :  { %v128_v17 = vpop.f32.mrb[2].mxu0 }
  0xf7   :  { %135 = vst.msk [vmem:[#allocation2] sm:$0xff] %vm19_vm0, %v132_v15  ;;  %v133_v18 = vadd.f32 %v128_v17, %v23_v14  ;;  %v194_v19 = vpop.f32.mrb[3].mxu0 }
  0xf9   :  { %136 = vst.msk [vmem:[#allocation2 + $0x8] sm:$0xff] %vm19_vm0, %v133_v18 }
  0xfe   :  { %v140_v21 = vld [vmem:[#allocation2] sm:$0xff] }
  0xff   :  { %v149_v22 = vadd.f32 %v165_v20, %v140_v21 }
 0x100   :  { %v141_v23 = vld [vmem:[#allocation2 + $0x8] sm:$0xff] }
 0x101   :  { %151 = vst.msk [vmem:[%s275_s3] sm:$0xff] %vm19_vm0, %v149_v22  ;;  %v150_v24 = vadd.f32 %v165_v20, %v141_v23 }
 0x103   :  { %152 = vst.msk [vmem:[%s275_s3 + $0x8] sm:$0xff] %vm19_vm0, %v150_v24 }

// kernel: bivision_vqa_forward.63
= control target key start
LH: loop header
LB: loop body
LE: loop exit
PB: predicated region body
PF: predicated region fallthrough
CT: control target
= control target key end

     0   :  { %vm19_vm0 = vcmask 254976   ;;  %v123_v0 = vmov 0.0   ;;  %vm124_vm1 = vmmov 0   ;;  %vm40_vm2 = vcmask 261120   ;;  %s163_s1 = inlined_call_operand.vmem [shape: bf16[32,32], index: 1, kind: input, shape index: {}]   ;;  %s164_s0 = inlined_call_operand.vmem [shape: f32[2,32], index: 0, kind: input, shape index: {}]   ;;  %s165_s2 = inlined_call_operand.vmem [shape: f32[1,32], index: 2, kind: input, shape index: {}]   ;;  %s166_s3 = inlined_call_operand.vmem [shape: f32[2,32], index: 3, kind: output, shape index: {}]  }
   0x1   :  { %20 = vst.msk [vmem:[#allocation2] sm:$0x3] %vm19_vm0, %v123_v0  ;;  %111 = vmatprep.subr.bf16.mxu0 %v123_v0  ;;  %v121_v1 = vld [vmem:[%s163_s1] sm:$0xff]   ;;  %115 = vmatprep.mubr.msk.bf16.mxu0 %vm124_vm1, %v123_v0  ;;  %v122_v2 = vld [vmem:[%s163_s1 + $0x8] sm:$0xff]  }
   0x2   :  { %112 = vmatpush3.bf16.msra.mxu0 %v121_v1  ;;  %v22_v3 = vld [vmem:[%s164_s0] sm:$0x3] }
   0x3   :  { %113 = vmatprep.subr.bf16.mxu0 %v123_v0  ;;  %v23_v4 = vpack.c.bf16 %v22_v3, %v22_v3  ;;  %v107_v11 = vld [vmem:[%s165_s2] ss:$0 sm:$0xff] }
   0x6   :  { %114 = vmatpush3.bf16.msra.mxu0 %v122_v2 }
   0x8   :  { %v21_v5 = vld [vmem:[#allocation2] sm:$0x3] }
   0x9   :  { %116 = vmatmul.mubr.msk.bf16.vlgmr.msra.gmra.mrb[0].mxu0 %vm40_vm2, %v23_v4 }
  0xdc   :  { %v78_v6 = vpop.f32.mrb[0].mxu0 }
  0xdd   :  { %v84_v7 = vadd.f32 %v78_v6, %v21_v5  ;;  %v117_v8 = vpop.f32.mrb[1].mxu0 }
  0xde   :  { %v81_v9 = vpop.f32.mrb[2].mxu0 }
  0xdf   :  { %86 = vst.msk [vmem:[#allocation2] sm:$0x3] %vm19_vm0, %v84_v7  ;;  %v118_v10 = vpop.f32.mrb[3].mxu0 }
  0xe6   :  { %v90_v12 = vld [vmem:[#allocation2] sm:$0x3] }
  0xe7   :  { %v98_v13 = vadd.f32 %v107_v11, %v90_v12 }
  0xe9   :  { %99 = vst.msk [vmem:[%s166_s3] sm:$0x3] %vm19_vm0, %v98_v13 }

// kernel: bivision_vqa_forward.68
= control target key start
LH: loop header
LB: loop body
LE: loop exit
PB: predicated region body
PF: predicated region fallthrough
CT: control target
= control target key end

     0   :  { %vm19_vm0 = vcmask 517120   ;;  %v123_v0 = vmov 0.0   ;;  %vm124_vm1 = vmmov 0   ;;  %vm40_vm2 = vcmask 261120   ;;  %s163_s1 = inlined_call_operand.vmem [shape: bf16[32,64], index: 1, kind: input, shape index: {}]   ;;  %s164_s0 = inlined_call_operand.vmem [shape: f32[2,32], index: 0, kind: input, shape index: {}]   ;;  %s165_s2 = inlined_call_operand.vmem [shape: f32[1,64], index: 2, kind: input, shape index: {}]   ;;  %s166_s3 = inlined_call_operand.vmem [shape: f32[2,64], index: 3, kind: output, shape index: {}]  }
   0x1   :  { %20 = vst.msk [vmem:[#allocation2] sm:$0x3] %vm19_vm0, %v123_v0  ;;  %111 = vmatprep.subr.bf16.mxu0 %v123_v0  ;;  %v121_v1 = vld [vmem:[%s163_s1] sm:$0xff]   ;;  %115 = vmatprep.mubr.msk.bf16.mxu0 %vm124_vm1, %v123_v0  ;;  %v122_v2 = vld [vmem:[%s163_s1 + $0x8] sm:$0xff]  }
   0x2   :  { %112 = vmatpush3.bf16.msra.mxu0 %v121_v1  ;;  %v22_v3 = vld [vmem:[%s164_s0] sm:$0x3] }
   0x3   :  { %113 = vmatprep.subr.bf16.mxu0 %v123_v0  ;;  %v23_v4 = vpack.c.bf16 %v22_v3, %v22_v3  ;;  %v107_v11 = vld [vmem:[%s165_s2] ss:$0 sm:$0xff] }
   0x6   :  { %114 = vmatpush3.bf16.msra.mxu0 %v122_v2 }
   0x8   :  { %v21_v5 = vld [vmem:[#allocation2] sm:$0x3] }
   0x9   :  { %116 = vmatmul.mubr.msk.bf16.vlgmr.msra.gmra.mrb[0].mxu0 %vm40_vm2, %v23_v4 }
  0xdc   :  { %v78_v6 = vpop.f32.mrb[0].mxu0 }
  0xdd   :  { %v84_v7 = vadd.f32 %v78_v6, %v21_v5  ;;  %v117_v8 = vpop.f32.mrb[1].mxu0 }
  0xde   :  { %v81_v9 = vpop.f32.mrb[2].mxu0 }
  0xdf   :  { %86 = vst.msk [vmem:[#allocation2] sm:$0x3] %vm19_vm0, %v84_v7  ;;  %v118_v10 = vpop.f32.mrb[3].mxu0 }
  0xe6   :  { %v90_v12 = vld [vmem:[#allocation2] sm:$0x3] }
  0xe7   :  { %v98_v13 = vadd.f32 %v107_v11, %v90_v12 }
  0xe9   :  { %99 = vst.msk [vmem:[%s166_s3] sm:$0x3] %vm19_vm0, %v98_v13 }

// kernel: bivision_vqa_forward.65
= control target key start
LH: loop header
LB: loop body
LE: loop exit
PB: predicated region body
PF: predicated region fallthrough
CT: control target
= control target key end

     0   :  { %s597_s12 = smov 0   ;;  %s649_s0 = inlined_call_operand.vmem [shape: f32[2,1,32], index: 0, kind: input, shape index: {}]   ;;  %s650_s1 = inlined_call_operand.vmem [shape: f32[2,4,32], index: 1, kind: input, shape index: {}]   ;;  %s651_s2 = inlined_call_operand.vmem [shape: f32[2,4,32], index: 2, kind: input, shape index: {}]   ;;  %s652_s3 = inlined_call_operand.vmem [shape: f32[2,1,32], index: 3, kind: output, shape index: {}]  }
   0x1 LB: > { %s500_s13 = sadd.s32 4294967295, %s571_s12   ;;  %p504_p0 = scmp.ge.s32.totalorder %s571_s12, 1  ;;  %s571_s12 = sphi %s597_s12, %s13_s12  }
   0x2   : > { %p153_p1 = scmp.lt.s32.totalorder %s571_s12, 3 }
   0x4   : > { %p154_p2 = pnand %p504_p0, %p153_p1 }
   0x5   : > { %p181_p3 = scmp.lt.s32.totalorder (!%p154_p2), %s500_s13, 1  ;;  %v573_v0 = vmov (!%p154_p2), 0.0   ;;  %vm574_vm0 = vmmov (!%p154_p2), 0   ;;  %vm202_vm1 = vcmask (!%p154_p2), 130048   ;;  %vm250_vm2 = vcmask (!%p154_p2), 24576   ;;  %s575_s21 = smov (!%p154_p2), 112  }
   0x6   : > { %157 = sbr.rel (%p154_p2) target bundleno = 1424 (0x590), region = 32  ;;  %521 = vmatprep.subr.bf16.mxu0 (!%p154_p2), %v573_v0  ;;  %523 = vmatprep.mubr.msk.bf16.mxu0 (!%p154_p2), %vm574_vm0, %v573_v0  ;;  %vm267_vm3 = vcmask (!%p154_p2), 1041408   ;;  %vm263_vm4 = vcmask (!%p154_p2), 31744   ;;  %s576_s25 = smov (!%p154_p2), 16   ;;  %vm430_vm5 = vcmask (!%p154_p2), 253952  }
   0x7   : > { %527 = vmatprep.subr.bf16.mxu1 (!%p154_p2), %v573_v0  ;;  %529 = vmatprep.mubr.msk.bf16.mxu1 (!%p154_p2), %vm574_vm0, %v573_v0 }
   0xd   : > { %s654_s13 = smov (!%p181_p3, %s500_s13), 1 }
   0xe   : > { %s505_s14 = sshll.u32 %s654_s13, 2  ;;  %s183_s20 = scalar_lea.vmem %s649_s0, %s654_s13 }
   0xf   : > { %s187_s17 = scalar_lea.vmem %s650_s1, %s505_s14  ;;  %v196_v4 = vld [vmem:[%s183_s20] sm:$0x1]  ;;  %s191_s24 = scalar_lea.vmem %s651_s2, %s505_s14 }
  0x10   : > { %v197_v1 = vld [vmem:[%s187_s17] sm:$0xf]  ;;  %v199_v5 = vpack.c.bf16 %v196_v4, %v196_v4  ;;  %s194_s28 = scalar_lea.vmem %s652_s3, %s654_s13 }
  0x11   : > { %v200_v2 = vpack.c.bf16 %v197_v1, %v197_v1  ;;  %v198_v17 = vld [vmem:[%s191_s24] sm:$0xf] }
  0x12   : > { %v201_v18 = vpack.c.bf16 %v198_v17, %v198_v17 }
  0x13   : > { %v207_v3 = vsel %vm202_vm1, %v200_v2, 0  ;;  %315 = vrot.lane.b32.xlu1 %v200_v2, %s575_s21 }
  0x14   : > { %522 = vmatpush3.bf16.xpose.msra.mxu0 %v207_v3  ;;  %v269_v19 = vsel %vm267_vm3, %v201_v18, 0 }
  0x15   : > { %539 = vmatprep.subr.bf16.mxu0 %v573_v0  ;;  %528 = vmatpush3.bf16.msra.mxu1 %v269_v19 }
  0x16   : > { %533 = vmatprep.subr.bf16.mxu1 %v573_v0 }
  0x17   : > { %312 = vrot.lane.b32.xlu1 %v199_v5, %s575_s21 }
  0x1b   : > { %524 = vmatmul.mubr.msk.bf16.vlgmr.msra.gmra.mrb[0].mxu0 %vm202_vm1, %v199_v5 }
  0x1c   : > { %541 = vmatprep.mubr.msk.bf16.mxu0 %vm574_vm0, %v573_v0 }
  0x85   : > { %v316_v22 = vpop.permute.xlu1 %315 }
  0x86   : > { %v321_v24 = vsel %vm202_vm1, %v316_v22, 0 }
  0x89   : > { %v313_v26 = vpop.permute.xlu1 %312 }
  0xee   : > { %v243_v6 = vpop.f32.mrb[0].mxu0 }
  0xef   : > { %v249_v7 = vmul.f32 0.25, %v243_v6  ;;  %v525_v8 = vpop.f32.mrb[1].mxu0 }
  0xf0   : > { %v246_v9 = vpop.f32.mrb[2].mxu0 }
  0xf1   : > { %v526_v10 = vpop.f32.mrb[3].mxu0  ;;  %v251_v11 = vsel %vm250_vm2, %v249_v7, -inf }
  0xf2   : > { %252 = vmax.xlane.f32.xlu0 %v251_v11 }
 0x17f   : > { %v253_v12 = vpop.xlane.xlu0 %252 }
 0x180   : > { %v254_v13 = vsub.f32 %v249_v7, %v253_v12 }
 0x182   : > { %v255_v14 = vmul.f32 1.442695, %v254_v13 }
 0x184   : > { %557 = vpow2.f32 %v255_v14 }
 0x18e   : > { %v558_v15 = vpop.eup %557 }
 0x18f   : > { %v257_v16 = vsel %vm250_vm2, %v558_v15, 0.0 }
 0x190   : > { %258 = vadd.xlane.f32.xlu0 %v257_v16 }
 0x21d   : > { %v259_v20 = vpop.xlane.xlu0 %258 }
 0x21e   : > { %559 = vrcp.f32 %v259_v20 }
 0x228   : > { %v560_v21 = vpop.eup %559 }
 0x229   : > { %v261_v23 = vmul.f32 %v560_v21, %v558_v15 }
 0x22b   : > { %v262_v25 = vpack.c.bf16 %v261_v23, %v261_v23 }
 0x22d   : > { %530 = vmatmul.mubr.msk.bf16.vlgmr.msra.gmra.mrb[0].mxu1 %vm263_vm4, %v262_v25 }
 0x22e   : > { %534 = vmatpush3.bf16.xpose.msra.mxu1 %v321_v24  ;;  %535 = vmatprep.mubr.msk.bf16.mxu1 %vm574_vm0, %v573_v0 }
 0x235   : > { %536 = vmatmul.mubr.msk.bf16.vlgmr.msra.gmra.mrb[4].mxu1 %vm202_vm1, %v313_v26 }
 0x300   : > { %v305_v27 = vpop.f32.mrb[0].mxu1 }
 0x301   : > { %v531_v28 = vpop.f32.mrb[1].mxu1 }
 0x302   : > { %v308_v29 = vpop.f32.mrb[2].mxu1 }
 0x303   : > { %v532_v30 = vpop.f32.mrb[3].mxu1 }
 0x308   : > { %v357_v31 = vpop.f32.mrb[4].mxu1 }
 0x309   : > { %v363_v32 = vmul.f32 0.25, %v357_v31  ;;  %v537_v33 = vpop.f32.mrb[5].mxu1 }
 0x30a   : > { %v360_v34 = vpop.f32.mrb[6].mxu1 }
 0x30b   : > { %v538_v35 = vpop.f32.mrb[7].mxu1  ;;  %v364_v36 = vsel %vm250_vm2, %v363_v32, -inf }
 0x30c   : > { %365 = vmax.xlane.f32.xlu0 %v364_v36 }
 0x322   : > { %377 = vrot.lane.b32.xlu0 %v201_v18, %s575_s21 }
 0x399   : > { %v366_v37 = vpop.xlane.xlu0 %365 }
 0x39a   : > { %v367_v38 = vsub.f32 %v363_v32, %v366_v37 }
 0x39c   : > { %v368_v39 = vmul.f32 1.442695, %v367_v38 }
 0x39d   : > { %v378_v42 = vpop.permute.xlu0 %377 }
 0x39e   : > { %561 = vpow2.f32 %v368_v39  ;;  %v383_v43 = vsel %vm267_vm3, %v378_v42, 0 }
 0x39f   : > { %540 = vmatpush3.bf16.msra.mxu0 %v383_v43 }
 0x3a8   : > { %v562_v40 = vpop.eup %561 }
 0x3a9   : > { %v370_v41 = vsel %vm250_vm2, %v562_v40, 0.0 }
 0x3aa   : > { %371 = vadd.xlane.f32.xlu1 %v370_v41 }
 0x437   : > { %v372_v44 = vpop.xlane.xlu1 %371 }
 0x438   : > { %563 = vrcp.f32 %v372_v44 }
 0x442   : > { %v564_v45 = vpop.eup %563 }
 0x443   : > { %v374_v46 = vmul.f32 %v564_v45, %v562_v40 }
 0x445   : > { %v375_v47 = vpack.c.bf16 %v374_v46, %v374_v46 }
 0x447   : > { %542 = vmatmul.mubr.msk.bf16.vlgmr.msra.gmra.mrb[4].mxu0 %vm263_vm4, %v375_v47 }
 0x51a   : > { %v419_v48 = vpop.f32.mrb[4].mxu0 }
 0x51b   : > { %426 = vrot.lane.b32.xlu0 %v419_v48, %s576_s25  ;;  %v543_v49 = vpop.f32.mrb[5].mxu0 }
 0x51c   : > { %v422_v50 = vpop.f32.mrb[6].mxu0 }
 0x51d   : > { %v544_v51 = vpop.f32.mrb[7].mxu0 }
 0x58d   : > { %v427_v52 = vpop.permute.xlu0 %426 }
 0x58e   : > { %v429_v53 = vsel %vm202_vm1, %v305_v27, %v427_v52 }
 0x58f   : > { %431 = vst.msk [vmem:[%s194_s28] sm:$0x1] %vm430_vm5, %v429_v53 }
 0x590 PF: > { %s13_s12 = sadd.s32 1, %s571_s12  }
 0x591   : > { %p10_p4 = scmp.ge.s32.totalorder %s13_s12, 4  }
 0x593   :  { %12 = sbr.rel (!%p10_p4) target bundleno = 1 (0x1), region = 68 }

// kernel: bivision_vqa_forward.69
= control target key start
LH: loop header
LB: loop body
LE: loop exit
PB: predicated region body
PF: predicated region fallthrough
CT: control target
= control target key end

     0   :  { %s474_s12 = smov 0   ;;  %s503_s0 = inlined_call_operand.vmem [shape: f32[2,1,32], index: 0, kind: input, shape index: {}]   ;;  %s504_s1 = inlined_call_operand.vmem [shape: f32[2,1,32], index: 1, kind: input, shape index: {}]   ;;  %s505_s2 = inlined_call_operand.vmem [shape: f32[2,1,32], index: 2, kind: input, shape index: {}]   ;;  %s506_s3 = inlined_call_operand.vmem [shape: f32[2,1,32], index: 3, kind: output, shape index: {}]  }
   0x1 LB: > { %s395_s13 = sadd.s32 4294967295, %s447_s12   ;;  %p399_p0 = scmp.ge.s32.totalorder %s447_s12, 1  ;;  %s447_s12 = sphi %s474_s12, %s13_s12  }
   0x2   : > { %p151_p1 = scmp.lt.s32.totalorder %s447_s12, 3 }
   0x4   : > { %p152_p2 = pnand %p399_p0, %p151_p1 }
   0x5   : > { %p177_p3 = scmp.lt.s32.totalorder (!%p152_p2), %s395_s13, 1  ;;  %s449_s23 = smov (!%p152_p2), 112   ;;  %vm199_vm0 = vcmask (!%p152_p2), 122880   ;;  %vm215_vm1 = vcmask (!%p152_p2), 1040384   ;;  %v450_v13 = vmov (!%p152_p2), 0   ;;  %v451_v15 = vmov (!%p152_p2), 0.0  }
   0x6   : > { %155 = sbr.rel (%p152_p2) target bundleno = 642 (0x282), region = 32  ;;  %v217_v14 = vsel (!%p152_p2), %vm215_vm1, 65535, %v450_v13  ;;  %414 = vmatprep.subr.bf16.mxu1 (!%p152_p2), %v451_v15  ;;  %vm452_vm2 = vmmov (!%p152_p2), 0   ;;  %408 = vmatprep.subr.bf16.mxu0 (!%p152_p2), %v451_v15  ;;  %vm211_vm3 = vcmask (!%p152_p2), 7168   ;;  %s453_s24 = smov (!%p152_p2), 16   ;;  %vm329_vm4 = vcmask (!%p152_p2), 130048  }
   0x7   : > { %416 = vmatprep.mubr.msk.bf16.mxu1 (!%p152_p2), %vm452_vm2, %v451_v15  ;;  %410 = vmatprep.mubr.msk.bf16.mxu0 (!%p152_p2), %vm452_vm2, %v451_v15  ;;  %vm331_vm5 = vcmask (!%p152_p2), 253952  }
   0xd   : > { %s508_s13 = smov (!%p177_p3, %s395_s13), 1 }
   0xe   : > { %s179_s16 = scalar_lea.vmem %s503_s0, %s508_s13  ;;  %s182_s19 = scalar_lea.vmem %s504_s1, %s508_s13 }
   0xf   : > { %v190_v0 = vld [vmem:[%s179_s16] sm:$0x1]  ;;  %s185_s22 = scalar_lea.vmem %s505_s2, %s508_s13  ;;  %s188_s27 = scalar_lea.vmem %s506_s3, %s508_s13 }
  0x10   : > { %v191_v1 = vld [vmem:[%s182_s19] sm:$0x1]  ;;  %v193_v2 = vpack.c.bf16 %v190_v0, %v190_v0 }
  0x11   : > { %v194_v3 = vpack.c.bf16 %v191_v1, %v191_v1  ;;  %v192_v4 = vld [vmem:[%s185_s22] sm:$0x1] }
  0x12   : > { %v195_v5 = vpack.c.bf16 %v192_v4, %v192_v4  ;;  %v196_v6 = vunpack.c.l.bf16 %v193_v2 }
  0x13   : > { %v197_v7 = vunpack.c.l.bf16 %v194_v3 }
  0x14   : > { %277 = vrot.lane.b32.xlu1 %v195_v5, %s449_s23  ;;  %v219_v17 = vand.u32 %v217_v14, %v195_v5 }
  0x15   : > { %v198_v8 = vmul.f32 %v197_v7, %v196_v6 }
  0x16   : > { %409 = vmatpush3.bf16.msra.mxu0 %v219_v17 }
  0x17   : > { %262 = vrot.lane.b32.xlu0 %v198_v8, %s449_s23  ;;  %v200_v9 = vsel %vm199_vm0, %v198_v8, 0.0 }
  0x38   : > { %201 = vadd.xlane.f32.xlu1 %v200_v9 }
  0x86   : > { %v278_v12 = vpop.permute.xlu1 %277 }
  0x87   : > { %v283_v16 = vand.u32 %v278_v12, %v217_v14 }
  0x89   : > { %v263_v10 = vpop.permute.xlu0 %262  ;;  %415 = vmatpush3.bf16.msra.mxu1 %v283_v16 }
  0x8a   : > { %v265_v11 = vsel %vm199_vm0, %v263_v10, 0.0 }
  0x8b   : > { %266 = vadd.xlane.f32.xlu0 %v265_v11 }
  0xc5   : > { %v202_v18 = vpop.xlane.xlu1 %201 }
  0xc6   : > { %v203_v19 = vmul.f32 0.25, %v202_v18 }
  0xc8   : > { %v204_v20 = vsub.f32 %v203_v19, %v203_v19 }
  0xca   : > { %v205_v21 = vmul.f32 1.442695, %v204_v20 }
  0xcc   : > { %433 = vpow2.f32 %v205_v21 }
  0xd6   : > { %v434_v22 = vpop.eup %433 }
  0xd7   : > { %435 = vrcp.f32 %v434_v22 }
  0xe1   : > { %v436_v23 = vpop.eup %435 }
  0xe2   : > { %v209_v24 = vmul.f32 %v436_v23, %v434_v22 }
  0xe4   : > { %v210_v25 = vpack.c.bf16 %v209_v24, %v209_v24 }
  0xe6   : > { %411 = vmatmul.mubr.msk.bf16.vlgmr.msra.gmra.mrb[0].mxu0 %vm211_vm3, %v210_v25 }
 0x118   : > { %v267_v26 = vpop.xlane.xlu0 %266 }
 0x119   : > { %v268_v27 = vmul.f32 0.25, %v267_v26 }
 0x11b   : > { %v269_v28 = vsub.f32 %v268_v27, %v268_v27 }
 0x11d   : > { %v270_v29 = vmul.f32 1.442695, %v269_v28 }
 0x11f   : > { %437 = vpow2.f32 %v270_v29 }
 0x129   : > { %v438_v30 = vpop.eup %437 }
 0x12a   : > { %439 = vrcp.f32 %v438_v30 }
 0x134   : > { %v440_v31 = vpop.eup %439 }
 0x135   : > { %v274_v32 = vmul.f32 %v440_v31, %v438_v30 }
 0x137   : > { %v275_v33 = vpack.c.bf16 %v274_v32, %v274_v32 }
 0x139   : > { %417 = vmatmul.mubr.msk.bf16.vlgmr.msra.gmra.mrb[0].mxu1 %vm211_vm3, %v275_v33 }
 0x1b9   : > { %v255_v34 = vpop.f32.mrb[0].mxu0 }
 0x1ba   : > { %v412_v35 = vpop.f32.mrb[1].mxu0 }
 0x1bb   : > { %v258_v36 = vpop.f32.mrb[2].mxu0 }
 0x1bc   : > { %v413_v37 = vpop.f32.mrb[3].mxu0 }
 0x20c   : > { %v319_v38 = vpop.f32.mrb[0].mxu1 }
 0x20d   : > { %326 = vrot.lane.b32.xlu0 %v319_v38, %s453_s24  ;;  %v418_v39 = vpop.f32.mrb[1].mxu1 }
 0x20e   : > { %v322_v40 = vpop.f32.mrb[2].mxu1 }
 0x20f   : > { %v419_v41 = vpop.f32.mrb[3].mxu1 }
 0x27f   : > { %v327_v42 = vpop.permute.xlu0 %326 }
 0x280   : > { %v330_v43 = vsel %vm329_vm4, %v255_v34, %v327_v42 }
 0x281   : > { %332 = vst.msk [vmem:[%s188_s27] sm:$0x1] %vm331_vm5, %v330_v43 }
 0x282 PF: > { %s13_s12 = sadd.s32 1, %s447_s12  }
 0x283   : > { %p10_p4 = scmp.ge.s32.totalorder %s13_s12, 4  }
 0x285   :  { %12 = sbr.rel (!%p10_p4) target bundleno = 1 (0x1), region = 68 }

// kernel: bivision_vqa_forward.71
= control target key start
LH: loop header
LB: loop body
LE: loop exit
PB: predicated region body
PF: predicated region fallthrough
CT: control target
= control target key end

     0   :  { %v278_v1 = vmov 0.0   ;;  %vm279_vm0 = vmmov 0   ;;  %s353_s0 = inlined_call_operand.vmem [shape: f32[2,64], index: 0, kind: input, shape index: {}]   ;;  %s354_s1 = inlined_call_operand.vmem [shape: bf16[64,32], index: 1, kind: input, shape index: {}]   ;;  %s355_s2 = inlined_call_operand.vmem [shape: f32[1,32], index: 2, kind: input, shape index: {}]   ;;  %s356_s3 = inlined_call_operand.vmem [shape: bf16[32,16], index: 3, kind: input, shape index: {}]   ;;  %s357_s4 = inlined_call_operand.vmem [shape: f32[1,16], index: 4, kind: input, shape index: {}]   ;;  %s358_s5 = inlined_call_operand.hbm [shape: f32[2,16], index: 5, kind: output, shape index: {}]  }
   0x1   :  { %v244_v0 = vld [vmem:[%s354_s1] sm:$0xff]   ;;  %221 = vmatprep.subr.bf16.mxu0 %v278_v1  ;;  %233 = vmatprep.subr.bf16.mxu1 %v278_v1  ;;  %v245_v2 = vld [vmem:[%s354_s1 + $0x8] sm:$0xff]   ;;  %v246_v3 = vld [vmem:[%s354_s1 + $0x10] sm:$0xff]  }
   0x2   :  { %222 = vmatpush3.bf16.msra.mxu0 %v244_v0  ;;  %229 = vmatprep.mubr.msk.bf16.mxu0 %vm279_vm0, %v278_v1 }
   0x3   :  { %223 = vmatprep.subr.bf16.mxu0 %v278_v1  ;;  %237 = vmatprep.mubr.msk.bf16.mxu1 %vm279_vm0, %v278_v1 }
   0x6   :  { %224 = vmatpush3.bf16.msra.mxu0 %v245_v2 }
   0x7   :  { %10 = vsyncpa [#allocation3], 0  ;;  %225 = vmatprep.subr.bf16.mxu0 %v278_v1  ;;  %v247_v4 = vld [vmem:[%s354_s1 + $0x18] sm:$0xff]   ;;  %v22_v5 = vld [vmem:[%s353_s0] sm:$0x3]  ;;  %vm63_vm1 = vcmask 523264  }
   0x8   :  { %v23_v6 = vpack.c.bf16 %v22_v5, %v22_v5  ;;  %v248_v7 = vld [vmem:[%s356_s3] sm:$0xff]   ;;  %v249_v8 = vld [vmem:[%s356_s3 + $0x8] sm:$0xff]   ;;  %vm132_vm2 = vcmask 261120   ;;  %vm176_vm3 = vcmask 123904  }
   0x9   :  { %234 = vmatpush3.bf16.msra.mxu1 %v248_v7  ;;  %v203_v9 = vld [vmem:[%s355_s2] ss:$0 sm:$0xff]  ;;  %s280_s2 = smov [#allocation2]  }
   0xa   :  { %226 = vmatpush3.bf16.msra.mxu0 %v246_v3  ;;  %235 = vmatprep.subr.bf16.mxu1 %v278_v1  ;;  %v209_v17 = vld [vmem:[%s357_s4] ss:$0 sm:$0xff]  ;;  %s195_s3 = sshll.u32 %s280_s2, 4  ;;  %s196_s3 = int_to_ptr.vmem [resolvable:$true] %s195_s3 }
   0xb   :  { %227 = vmatprep.subr.bf16.mxu0 %v278_v1  ;;  %s254_s4 = scalar_lea.vmem %s196_s3, 32  ;;  %p259_p1 = scmp.lt.s32.totalorder %s196_s3, %s196_s3 }
   0xc   :  { %p255_p0 = scmp.ne.s32.totalorder %s196_s3, %s254_s4  ;;  %p260_p2 = scmp.lt.s32.totalorder %s254_s4, %s254_s4 }
   0xd   :  { %236 = vmatpush3.bf16.msra.mxu1 %v249_v8 }
   0xe   :  { %228 = vmatpush3.bf16.msra.mxu0 %v247_v4  ;;  %p261_p3 = por %p260_p2, %p259_p1 }
  0x10   :  { %p262_p4 = pnand %p261_p3, %p255_p0 }
  0x11   :  { %230 = vmatmul.mubr.msk.bf16.vlgmr.msra.gmra.mrb[0].mxu0 %vm63_vm1, %v23_v6 }
  0xe4   :  { %v101_v10 = vpop.f32.mrb[0].mxu0 }
  0xe5   :  { %v102_v11 = vadd.f32 %v203_v9, %v101_v10  ;;  %v231_v12 = vpop.f32.mrb[1].mxu0 }
  0xe6   :  { %v104_v13 = vpop.f32.mrb[2].mxu0 }
  0xe7   :  { %v107_v14 = vmax.f32 %v102_v11, 0.0  ;;  %v232_v15 = vpop.f32.mrb[3].mxu0 }
  0xe9   :  { %v108_v16 = vpack.c.bf16 %v107_v14, %v107_v14 }
  0xeb   :  { %238 = vmatmul.mubr.msk.bf16.vlgmr.msra.gmra.mrb[0].mxu1 %vm132_vm2, %v108_v16 }
 0x1be   :  { %v170_v18 = vpop.f32.mrb[0].mxu1 }
 0x1bf   :  { %v171_v19 = vadd.f32 %v209_v17, %v170_v18  ;;  %v239_v20 = vpop.f32.mrb[1].mxu1 }
 0x1c0   :  { %v173_v21 = vpop.f32.mrb[2].mxu1 }
 0x1c1   :  { %v240_v22 = vpop.f32.mrb[3].mxu1  ;;  %v177_v23 = vsel %vm176_vm3, %v171_v19, -inf }
 0x1c2   :  { %178 = vmax.xlane.f32.xlu0 %v177_v23 }
 0x24f   :  { %v179_v24 = vpop.xlane.xlu0 %178 }
 0x250   :  { %v180_v25 = vsub.f32 %v171_v19, %v179_v24 }
 0x252   :  { %v181_v26 = vmul.f32 1.442695, %v180_v25 }
 0x254   :  { %250 = vpow2.f32 %v181_v26 }
 0x25e   :  { %v251_v27 = vpop.eup %250 }
 0x25f   :  { %v183_v28 = vsel %vm176_vm3, %v251_v27, 0.0 }
 0x260   :  { %184 = vadd.xlane.f32.xlu0 %v183_v28 }
 0x2ed   :  { %v185_v29 = vpop.xlane.xlu0 %184 }
 0x2ee   :  { %252 = vrcp.f32 %v185_v29 }
 0x2f8   :  { %v253_v30 = vpop.eup %252 }
 0x2f9   :  { %v187_v31 = vmul.f32 %v253_v30, %v251_v27 }
 0x2fb   :  { %188 = vst.msk [vmem:[#allocation2] sm:$0x3] %vm176_vm3, %v187_v31 }
 0x2fc   :  { %265 = shalt.err (!%p262_p4)
}
 0x2fd   :  { %s266_s11 = scalar_lea.hbm %s358_s5, 32 }
 0x2fe   :  { %p267_p5 = scmp.ne.s32.totalorder %s358_s5, %s266_s11  ;;  %p270_p6 = scmp.lt.u32.totalorder %s266_s11, %s358_s5 }
 0x300   :  { %p272_p7 = pnand %p270_p6, %p267_p5 }
 0x302   :  { %275 = shalt.err (!%p272_p7)
}
 0x303   :  { %198 = dma.vmem_to_hbm [thread:$0]  %s196_s3, 32, %s358_s5, [#allocation3]  }
 0x304   :  { %276 = dma.done.wait [#allocation3], 32  }
 0x305   :  { %277 = vsyncadd [#allocation3], 4294967264 }
 0x306   :  { %202 = vsyncpa [#allocation3], 1 }

</bundles_post_ra>
